<compile_context>
chip_gen: v6e
topology: v6e:2x2x1
jax: 0.10.0
libtpu: 0.0.40
codegen_flags: <defaults>
</compile_context>

<pallas_src>
import functools

import jax
import jax.numpy as jnp
from jax.experimental import pallas as pl
from jax.experimental.pallas import tpu as pltpu
from jax.scipy.linalg import block_diag

EPS = 0.01  # `epsilon` in the reference code

# MXU operand dtype. float32 keeps exact parity with the PyTorch reference.
# TODO(synk): flip to jnp.bfloat16 on v6e/v7x to feed the 256x256 MXU at full rate
#             (accumulation stays f32 via preferred_element_type); kept f32 here to
#             preserve reference numerics exactly.
MXU_DTYPE = jnp.float32


# ===================================================================== Pallas kernels
def _mm_bias_kernel(a_ref, b_ref, bias_ref, o_ref):
    # (M,K) @ (K,N) + bias; bias is (M,1) or (1,N) and broadcasts.
    o_ref[...] = (jnp.dot(a_ref[...], b_ref[...], preferred_element_type=jnp.float32)
                  + bias_ref[...])


def pallas_matmul_bias(a, b, bias):
    """Single lane-dense matmul+bias, full-array blocks (Mosaic pads internally)."""
    M, K = a.shape
    K2, N = b.shape
    assert K == K2
    a = a.astype(MXU_DTYPE)
    b = b.astype(MXU_DTYPE)
    bias = bias.astype(jnp.float32)
    return pl.pallas_call(
        _mm_bias_kernel,
        out_shape=jax.ShapeDtypeStruct((M, N), jnp.float32),
        grid=(1,),
        in_specs=[pl.BlockSpec((M, K), lambda i: (0, 0)),
                  pl.BlockSpec((K, N), lambda i: (0, 0)),
                  pl.BlockSpec(bias.shape, lambda i: (0, 0))],
        out_specs=pl.BlockSpec((M, N), lambda i: (0, 0)),
    )(a, b, bias)


def _gated_res_skip_kernel(w12_ref, b12_ref, wres_ref, bres_ref, wskip_ref, bskip_ref,
                           x_ref, xz_ref, s_ref, *, K, BN, Tp, pred):
    """Fused: in-kernel im2col + (conv_1|conv_2) matmul + tanh*sigmoid gate
    + residual_conv / skip_conv 1x1 epilogues."""
    OC = wres_ref.shape[0]
    T_out = Tp - K + 1
    T1 = T_out - pred
    x = x_ref[...]                                      # (C14, BN*Tp)
    # im2col built from shifted lane slices: rows (k-major, channel-minor),
    # columns (series-major, time-minor).
    cols = jnp.concatenate(
        [jnp.concatenate([x[:, j * Tp + k: j * Tp + k + T_out] for k in range(K)],
                         axis=0)
         for j in range(BN)], axis=1)                   # (C14*K, BN*T_out)
    acc = (jnp.dot(w12_ref[...], cols, preferred_element_type=jnp.float32)
           + b12_ref[...])                              # (2*OC, BN*T_out)
    g = jnp.tanh(acc[:OC]) * jax.nn.sigmoid(acc[OC:])   # (OC, BN*T_out)
    gm = g.astype(wres_ref.dtype)
    yres = (jnp.dot(wres_ref[...], gm, preferred_element_type=jnp.float32)
            + bres_ref[...])
    yskip = (jnp.dot(wskip_ref[...], gm, preferred_element_type=jnp.float32)
             + bskip_ref[...])
    # split the per-series time axis: first T1 steps -> residual path, last pred -> skip
    xz_ref[...] = jnp.concatenate(
        [yres[:, j * T_out: j * T_out + T1] for j in range(BN)], axis=1)
    s_ref[...] = jnp.concatenate(
        [yskip[:, j * T_out + T1: (j + 1) * T_out] for j in range(BN)], axis=1)


def gated_res_skip(xcat, p, K, pred):
    """One Pallas call: pad -> (conv_1,conv_2) -> tanh*sigmoid -> residual/skip convs."""
    B_, C14, N, Tc = xcat.shape
    Tp = Tc + K - 1
    T_out = Tc
    T1 = T_out - pred
    BN = B_ * N
    OC = p['conv1_w'].shape[0]

    xpad = jnp.pad(xcat, ((0, 0), (0, 0), (0, 0), (K - 1, 0)))
    xflat = jnp.transpose(xpad, (1, 0, 2, 3)).reshape(C14, BN * Tp).astype(MXU_DTYPE)

    # fuse conv_1 / conv_2 into one LHS; column order (k-major, channel-minor)
    W12 = jnp.concatenate(
        [w.transpose(0, 2, 1).reshape(OC, K * C14) for w in (p['conv1_w'], p['conv2_w'])],
        axis=0).astype(MXU_DTYPE)                                       # (2*OC, K*C14)
    b12 = jnp.concatenate([p['conv1_b'], p['conv2_b']]).reshape(2 * OC, 1).astype(jnp.float32)
    wres = p['res_w'].astype(MXU_DTYPE)
    bres = p['res_b'].reshape(OC, 1).astype(jnp.float32)
    wskip = p['skip_w'].astype(MXU_DTYPE)
    bskip = p['skip_b'].reshape(OC, 1).astype(jnp.float32)

    kern = functools.partial(_gated_res_skip_kernel, K=K, BN=BN, Tp=Tp, pred=pred)
    xz, s = pl.pallas_call(
        kern,
        out_shape=(jax.ShapeDtypeStruct((OC, BN * T1), jnp.float32),
                   jax.ShapeDtypeStruct((OC, BN * pred), jnp.float32)),
        grid=(1,),
        in_specs=[pl.BlockSpec((2 * OC, K * C14), lambda i: (0, 0)),
                  pl.BlockSpec((2 * OC, 1), lambda i: (0, 0)),
                  pl.BlockSpec((OC, OC), lambda i: (0, 0)),
                  pl.BlockSpec((OC, 1), lambda i: (0, 0)),
                  pl.BlockSpec((OC, OC), lambda i: (0, 0)),
                  pl.BlockSpec((OC, 1), lambda i: (0, 0)),
                  pl.BlockSpec((C14, BN * Tp), lambda i: (0, 0))],
        out_specs=(pl.BlockSpec((OC, BN * T1), lambda i: (0, 0)),
                   pl.BlockSpec((OC, BN * pred), lambda i: (0, 0))),
    )(W12, b12, wres, bres, wskip, bskip, xflat)

    xz = xz.reshape(OC, B_, N, T1).transpose(1, 0, 2, 3)
    s = s.reshape(OC, B_, N, pred).transpose(1, 0, 2, 3)
    return xz, s


def _period_norm_kernel(x_ref, o_ref, *, p):
    x = x_ref[...]
    R, T = x.shape
    L = T - p + 1
    if L == 1:
        s1 = jnp.sum(x, axis=1, keepdims=True)
        s2 = jnp.sum(x * x, axis=1, keepdims=True)
    else:
        s1 = x[:, 0:L]
        s2 = x[:, 0:L] * x[:, 0:L]
        for i in range(1, p):
            xi = x[:, i:i + L]
            s1 = s1 + xi
            s2 = s2 + xi * xi
    mean_l = s1 / p
    var_l = s2 / p - mean_l * mean_l + 1e-5
    if p > 1:
        mean = jnp.concatenate(
            [jnp.broadcast_to(mean_l[:, 0:1], (R, p - 1)), mean_l], axis=1)
        var = jnp.concatenate(
            [jnp.broadcast_to(var_l[:, 0:1], (R, p - 1)), var_l], axis=1)
    else:
        mean, var = mean_l, var_l
    out = (x - mean) / jnp.sqrt(var + EPS)
    # single stacked writeback: out | mean | std
    o_ref[...] = jnp.concatenate([out, mean, jnp.sqrt(var)], axis=1)


def _row_blocks(R):
    # small "parallel" grid over independent rows (lets v7x use both TensorCores)
    if R >= 16 and R % 16 == 0:
        return 2
    return 1


def period_norm(x, period_len):
    B_, C, N, T = x.shape
    R = B_ * C * N
    xf = x.reshape(R, T).astype(jnp.float32)
    nb = _row_blocks(R)
    rb = R // nb
    kern = functools.partial(_period_norm_kernel, p=period_len)
    full = pl.pallas_call(
        kern,
        out_shape=jax.ShapeDtypeStruct((R, 3 * T), jnp.float32),
        grid=(nb,),
        in_specs=[pl.BlockSpec((rb, T), lambda i: (i, 0))],
        out_specs=pl.BlockSpec((rb, 3 * T), lambda i: (i, 0)),
        compiler_params=pltpu.CompilerParams(dimension_semantics=("parallel",)),
    )(xf)
    rs = lambda a: a.reshape(B_, C, N, T)
    return rs(full[:, :T]), rs(full[:, T:2 * T]), rs(full[:, 2 * T:])


def _seasonal_norm_kernel(x_ref, o_ref, *, P):
    x = x_ref[...]
    R, T = x.shape
    num = T // P
    s1 = x[:, 0:P]
    s2 = x[:, 0:P] * x[:, 0:P]
    for j in range(1, num):
        xj = x[:, j * P:(j + 1) * P]
        s1 = s1 + xj
        s2 = s2 + xj * xj
    mean_p = s1 / num
    var_p = s2 / num - mean_p * mean_p + 1e-5
    mean = jnp.concatenate([mean_p] * num, axis=1)
    var = jnp.concatenate([var_p] * num, axis=1)
    out = (x - mean) / jnp.sqrt(var + EPS)
    o_ref[...] = jnp.concatenate([out, mean, jnp.sqrt(var)], axis=1)


def seasonal_norm(x, P):
    B_, C, N, T = x.shape
    assert T % P == 0, "seq_len must be divisible by cycle_len (circular pad of 0)"
    R = B_ * C * N
    xf = x.reshape(R, T).astype(jnp.float32)
    nb = _row_blocks(R)
    rb = R // nb
    kern = functools.partial(_seasonal_norm_kernel, P=P)
    full = pl.pallas_call(
        kern,
        out_shape=jax.ShapeDtypeStruct((R, 3 * T), jnp.float32),
        grid=(nb,),
        in_specs=[pl.BlockSpec((rb, T), lambda i: (i, 0))],
        out_specs=pl.BlockSpec((rb, 3 * T), lambda i: (i, 0)),
        compiler_params=pltpu.CompilerParams(dimension_semantics=("parallel",)),
    )(xf)
    rs = lambda a: a.reshape(B_, C, N, T)
    return rs(full[:, :T]), rs(full[:, T:2 * T]), rs(full[:, 2 * T:])


def _spatial_norm_kernel(emb_ref, x_ref, o_ref):
    e = emb_ref[...]
    x = x_ref[...]
    Nn = e.shape[0]
    # adjacency: softmax(node_emb @ node_emb.T - 10*I)
    adj = jax.lax.dot_general(e, e, (((1,), (1,)), ((), ())),
                              preferred_element_type=jnp.float32)
    rows = jax.lax.broadcasted_iota(jnp.int32, (Nn, Nn), 0)
    cols = jax.lax.broadcasted_iota(jnp.int32, (Nn, Nn), 1)
    adj = adj - 10.0 * (rows == cols).astype(jnp.float32)
    adj = adj - jnp.max(adj, axis=-1, keepdims=True)
    ea = jnp.exp(adj)
    adj = ea / jnp.sum(ea, axis=-1, keepdims=True)
    mean = jnp.dot(adj, x, preferred_element_type=jnp.float32)
    var = jnp.dot(adj, x * x, preferred_element_type=jnp.float32) - mean * mean + 1e-5
    out = (x - mean) / jnp.sqrt(var + EPS)
    o_ref[...] = jnp.concatenate([out, mean, jnp.sqrt(var)], axis=1)


def ada_spatial_norm(x, node_emb):
    """AdaSpatialNorm: adjacency softmax + adjacency matmuls + normalise, fused."""
    B_, C, N, T = x.shape
    M = B_ * T * C
    xm = (x.transpose(0, 3, 2, 1).reshape(B_ * T, N, C)
           .transpose(1, 0, 2).reshape(N, M)).astype(jnp.float32)
    D = node_emb.shape[1]
    full = pl.pallas_call(
        _spatial_norm_kernel,
        out_shape=jax.ShapeDtypeStruct((N, 3 * M), jnp.float32),
        grid=(1,),
        in_specs=[pl.BlockSpec((N, D), lambda i: (0, 0)),
                  pl.BlockSpec((N, M), lambda i: (0, 0))],
        out_specs=pl.BlockSpec((N, 3 * M), lambda i: (0, 0)),
    )(node_emb.astype(jnp.float32), xm)

    def back(a):
        return (a.reshape(N, B_ * T, C).transpose(1, 0, 2)
                 .reshape(B_, T, N, C).transpose(0, 3, 2, 1))

    return back(full[:, :M]), back(full[:, M:2 * M]), back(full[:, 2 * M:])


# ===================================================================== fused-matmul wrappers
def residual_extrapolate_all(xs, ws, bs, spl, pred):
    """All G ResidualExtrapolate (1,spl) convs of a layer in ONE block-diag matmul.

    LHS (B*N, G*C*spl) stacks each input's last spl steps along the contraction rows;
    RHS is block-diagonal (G*C*spl, G*d*pred) -> lane-dense (B*N, G*d*pred) output.
    """
    B_, C, N, _ = xs[0].shape
    G = len(xs)
    dp = ws[0].shape[0]                                                 # d*pred
    A = jnp.concatenate(
        [jnp.transpose(x[..., -spl:], (0, 2, 1, 3)).reshape(B_ * N, C * spl)
         for x in xs], axis=1)                                          # (B*N, G*C*spl)
    Wbd = block_diag(*[w.reshape(dp, C * spl).T for w in ws])           # (G*C*spl, G*dp)
    brow = jnp.concatenate(list(bs)).reshape(1, G * dp)
    Y = pallas_matmul_bias(A, Wbd, brow)                                # (B*N, G*dp)
    outs = []
    for g, x in enumerate(xs):
        yg = (Y[:, g * dp:(g + 1) * dp]
              .reshape(B_, N, pred, C).transpose(0, 3, 1, 2))           # (B,C,N,pred)
        outs.append(jnp.concatenate([x, yg], axis=-1))
    return outs


def bn_eval(x):
    # BatchNorm2d with default running stats (mean=0, var=1, gamma=1, beta=0), eval mode.
    return x / jnp.sqrt(1.0 + 1e-5)


def start_conv(x, w, b):
    # Conv2d(1, d, 1): degenerate 1-input-channel contraction -> JAX glue broadcast.
    return x * w.reshape(1, -1, 1, 1) + b.reshape(1, -1, 1, 1)


def depthwise_conv_n(x, w, b, dilation, padding):
    # TODO(synk): depthwise (K,1) conv over nodes kept as shifted-slice sum in JAX glue.
    Bb, C, N, T = x.shape
    K = w.shape[1]
    xp = jnp.pad(x, ((0, 0), (0, 0), (padding, padding), (0, 0)))
    n_out = N + 2 * padding - (K - 1) * dilation
    acc = jnp.zeros((Bb, C, n_out, T), jnp.float32)
    for k in range(K):
        acc = acc + xp[:, :, k * dilation:k * dilation + n_out, :] * w[None, :, k, None, None]
    return acc + b[None, :, None, None]


def interpolate_nearest(x, n_out, t_out):
    Bb, C, n_in, t_in = x.shape
    ni = jnp.floor(jnp.arange(n_out) * (n_in / n_out)).astype(jnp.int32)
    ti = jnp.floor(jnp.arange(t_out) * (t_in / t_out)).astype(jnp.int32)
    return x[:, :, ni][:, :, :, ti]


# ===================================================================== functional blocks
def constant_extrapolate(x, num_pred):
    return jnp.concatenate([x, jnp.repeat(x[..., -1:], num_pred, axis=-1)], axis=-1)


def seasonal_extrapolate(x, cycle_len, pred_len, cycle_num):
    B_, C, N, T = x.shape
    Pc = pred_len // cycle_len + 1
    # reference weight = softmax(zeros) == uniform -> projection is the mean over cycles
    x_cycle = x.reshape(B_, C, N, cycle_num, cycle_len).transpose(0, 2, 4, 3, 1)  # (B,N,cl,cn,C)
    proj = jnp.mean(x_cycle, axis=3, keepdims=True)
    proj = jnp.repeat(proj, Pc, axis=3)                                           # (B,N,cl,Pc,C)
    full = jnp.concatenate([x_cycle, proj], axis=3)                               # (B,N,cl,cn+Pc,C)
    out = full.transpose(0, 4, 1, 3, 2).reshape(B_, C, N, -1)[..., :T + pred_len]
    return out


def multi_scale_conv(x, branches, kernel_size, dilations):
    B_, C, N, T = x.shape
    outs = []
    for (w, b), d in zip(branches, dilations):
        eff = kernel_size + (kernel_size - 1) * (d - 1)
        pad = (eff - 1) // 2
        y = jax.nn.relu(bn_eval(depthwise_conv_n(x, w, b, d, pad)))
        if y.shape[2] != N:
            y = interpolate_nearest(y, N, T)
        outs.append(y)
    out = sum(outs) / float(len(outs))
    return out + x                                                  # dropout = identity (eval)


def improved_mstf(x1, x2, x3, p):
    B_, C, N, T = x1.shape
    residual = (x1 + x2 + x3) / 3.0
    BNT = B_ * N * T
    # the 3 enhancement 1x1 convs as ONE block-diagonal lane-dense matmul
    Xall = jnp.concatenate(
        [jnp.transpose(x, (1, 0, 2, 3)).reshape(C, BNT) for x in (x1, x2, x3)], axis=0)
    Wbd = block_diag(p['e1_w'], p['e2_w'], p['e3_w'])                # (3C, 3C)
    bcol = jnp.concatenate([p['e1_b'], p['e2_b'], p['e3_b']]).reshape(3 * C, 1)
    Y = pallas_matmul_bias(Wbd, Xall, bcol)                          # (3C, BNT)

    gelu = lambda v: jax.nn.gelu(bn_eval(v), approximate=False)
    back = lambda rows: rows.reshape(C, B_, N, T).transpose(1, 0, 2, 3)
    e1, e2, e3 = gelu(back(Y[:C])), gelu(back(Y[C:2 * C])), gelu(back(Y[2 * C:]))

    combined = jnp.concatenate(
        [e1.mean(axis=(2, 3)), e2.mean(axis=(2, 3)), e3.mean(axis=(2, 3))], axis=1)
    # SE excitation is far below Pallas-launch scale -> plain JAX (XLA fuses it).
    h = jax.nn.gelu(combined @ p['se_w1'].T, approximate=False)
    w = jax.nn.softmax(h @ p['se_w2'].T, axis=1)                     # (B, 3)
    out = (e1 * w[:, 0][:, None, None, None]
           + e2 * w[:, 1][:, None, None, None]
           + e3 * w[:, 2][:, None, None, None])
    return out + residual                                            # dropout = identity (eval)


def encoder_layer_forward(x, p, cfg):
    seq_len, pred_len = cfg['seq_len'], cfg['pred_len']
    cycle_len, spl, ks = cfg['cycle_len'], cfg['short_period_len'], cfg['kernel_size']
    residual = x

    # --- cascaded normalisations (each a fused stats+normalise Pallas kernel) ---
    x_ln, ltm, lts = period_norm(x, seq_len)
    x_seasonal, sm, ss = seasonal_norm(x_ln, cycle_len)
    x_short, stm, sts = period_norm(x_seasonal, spl)
    x_spatial, spm, sps = ada_spatial_norm(x_short, p['node_emb'])

    # --- multi-scale branches (JAX glue for the tiny depthwise (K,1) convs) ---
    msl = multi_scale_conv(residual, p['ms_long'], 5, (2, 5, 8, 11))
    mss = multi_scale_conv(x_ln, p['ms_season'], 3, (1, 4, 7))
    msh = multi_scale_conv(x_seasonal, p['ms_short'], 2, (1, 2))

    # --- all 7 ResidualExtrapolate convs of this layer in one block-diag matmul ---
    re_out = residual_extrapolate_all(
        [x_ln, x_seasonal, x_short, x_spatial, msl, mss, msh],
        [p['re1_w'], p['re2_w'], p['re3_w'], p['re4_w'],
         p['re_long_w'], p['re_season_w'], p['re_short_w']],
        [p['re1_b'], p['re2_b'], p['re3_b'], p['re4_b'],
         p['re_long_b'], p['re_season_b'], p['re_short_b']],
        spl, pred_len)
    re1, re2, re3, re4, msl_proj, mss_proj, msh_proj = re_out

    fused = improved_mstf(msl_proj, mss_proj, msh_proj, p['mstf'])

    cn = seq_len // cycle_len
    xs = [constant_extrapolate(x, pred_len),
          re1, constant_extrapolate(ltm, pred_len), constant_extrapolate(lts, pred_len),
          re2, seasonal_extrapolate(sm, cycle_len, pred_len, cn),
          seasonal_extrapolate(ss, cycle_len, pred_len, cn),
          re3, constant_extrapolate(stm, pred_len), constant_extrapolate(sts, pred_len),
          re4, constant_extrapolate(spm, pred_len), constant_extrapolate(sps, pred_len),
          fused]
    min_t = min(a.shape[-1] for a in xs)
    xs = [a[..., :min_t] for a in xs]
    xcat = jnp.concatenate(xs, axis=1)                               # (B, 14*C, N, min_t)

    # pad + gate convs + tanh*sigmoid + residual/skip 1x1 convs, all in one Pallas call
    x_z, s = gated_res_skip(xcat, p, ks, pred_len)
    return x_z, s


def model_forward(x_enc, x_mark_enc, x_dec, x_mark_dec, params, cfg):
    del x_mark_enc, x_dec, x_mark_dec                                # unused by the reference forward
    B_, T, Nn = x_enc.shape
    means = x_enc.mean(axis=1, keepdims=True)
    xc = x_enc - means
    stdev = jnp.sqrt(xc.var(axis=1, keepdims=True) + 1e-5)           # unbiased=False
    xn = xc / stdev
    inp = xn.transpose(0, 2, 1)[:, None, :, :]                       # (B, 1, N, T)
    x = start_conv(inp, params['start_w'], params['start_b'])

    pred, dm = cfg['pred_len'], cfg['d_model']
    out = jnp.zeros((B_, dm, Nn, pred), jnp.float32)
    for lp in params['layers']:
        residual = x
        x_z, s_i = encoder_layer_forward(x, lp, cfg)
        x = x_z + residual
        out = s_i + out

    # grouped end_conv expressed as a plain einsum (launch-overhead dominated as a kernel)
    dec = jnp.einsum('pc,bcnp->bpn', params['end_w'], out) + params['end_b'][None, :, None]
    dec = dec * stdev[:, 0, :][:, None, :]
    dec = dec + means[:, 0, :][:, None, :]
    return dec


# ===================================================================== parameter init
def init_params(key, cfg):
    d, pred, spl = cfg['d_model'], cfg['pred_len'], cfg['short_period_len']
    ks, n_nodes = cfg['kernel_size'], cfg['enc_in']
    keys = iter(jax.random.split(key, 512))

    def nrm(shape, scale=0.1):
        return (scale * jax.random.normal(next(keys), shape)).astype(jnp.float32)

    params = {'start_w': nrm((d, 1)), 'start_b': nrm((d,)),
              'end_w': nrm((pred, d)), 'end_b': nrm((pred,)),
              'layers': []}
    for _ in range(cfg['e_layers']):
        lp = {'node_emb': jnp.zeros((n_nodes, d), jnp.float32)}      # matches torch.zeros init
        for name in ('re1', 're2', 're3', 're4', 're_long', 're_season', 're_short'):
            lp[name + '_w'] = nrm((d * pred, d, spl))
            lp[name + '_b'] = nrm((d * pred,))
        lp['ms_long'] = [(nrm((d, 5)), nrm((d,))) for _ in range(4)]
        lp['ms_season'] = [(nrm((d, 3)), nrm((d,))) for _ in range(3)]
        lp['ms_short'] = [(nrm((d, 2)), nrm((d,))) for _ in range(2)]
        rc = max(1, d // 4)
        lp['mstf'] = {'e1_w': nrm((d, d)), 'e1_b': nrm((d,)),
                      'e2_w': nrm((d, d)), 'e2_b': nrm((d,)),
                      'e3_w': nrm((d, d)), 'e3_b': nrm((d,)),
                      'se_w1': nrm((rc, 3 * d)), 'se_w2': nrm((3, rc))}
        lp['conv1_w'] = nrm((d, 14 * d, ks)); lp['conv1_b'] = nrm((d,))
        lp['conv2_w'] = nrm((d, 14 * d, ks)); lp['conv2_b'] = nrm((d,))
        lp['skip_w'] = nrm((d, d)); lp['skip_b'] = nrm((d,))
        lp['res_w'] = nrm((d, d)); lp['res_b'] = nrm((d,))
        params['layers'].append(lp)
    return params


# ===================================================================== main
if __name__ == "__main__":
    cfg = dict(seq_len=16, pred_len=4, enc_in=4, d_model=8, cycle_len=4,
               short_period_len=4, kernel_size=3, e_layers=1, dropout=0.1)
    key = jax.random.PRNGKey(0)
    k_param, k_x = jax.random.split(key)
    params = init_params(k_param, cfg)

    B = 2
    x_enc = jax.random.normal(k_x, (B, cfg['seq_len'], cfg['enc_in']), jnp.float32)
    # x_mark_enc / x_dec / x_mark_dec are unused by Model.forward; pass deterministic dummies.
    x_mark_enc = jnp.zeros((B, cfg['seq_len'], 1), jnp.float32)
    x_dec = jnp.zeros((B, cfg['pred_len'], cfg['enc_in']), jnp.float32)
    x_mark_dec = jnp.zeros((B, cfg['pred_len'], 1), jnp.float32)

    fwd = jax.jit(functools.partial(model_forward, cfg=cfg))
    dec_out = fwd(x_enc, x_mark_enc, x_dec, x_mark_dec, params)
    dec_out = jax.block_until_ready(dec_out)
    assert dec_out.shape == (B, cfg['pred_len'], cfg['enc_in'])
    assert bool(jnp.all(jnp.isfinite(dec_out)))
    print("KERNEL_OK")
</pallas_src>

<mosaic_0001>
module attributes {stable_mosaic.version = 11 : i64} {
  func.func @_period_norm_kernel(%arg0: i32, %arg1: memref<32x16xf32, #tpu.memory_space<vmem>>, %arg2: memref<32x48xf32, #tpu.memory_space<vmem>>) attributes {dimension_semantics = [#tpu.dimension_semantics<parallel>], iteration_bounds = array<i64: 2>, scalar_prefetch = 0 : i64, scratch_operands = 0 : i64, tpu.core_type = #tpu.core_type<tc>, window_params = [{transform_indices = @transform_0, window_bounds = array<i64: 32, 16>}, {transform_indices = @transform_1, window_bounds = array<i64: 32, 48>}]} {
    %c0 = arith.constant 0 : index
    %c0_0 = arith.constant 0 : index
    %0 = vector.load %arg1[%c0, %c0_0] : memref<32x16xf32, #tpu.memory_space<vmem>>, vector<32x16xf32>
    %cst = arith.constant dense<0.000000e+00> : vector<32xf32>
    %1 = vector.multi_reduction <add>, %0, %cst [1] : vector<32x16xf32> to vector<32xf32>
    %2 = vector.shape_cast %1 : vector<32xf32> to vector<32x1xf32>
    %3 = arith.mulf %0, %0 : vector<32x16xf32>
    %cst_1 = arith.constant dense<0.000000e+00> : vector<32xf32>
    %4 = vector.multi_reduction <add>, %3, %cst_1 [1] : vector<32x16xf32> to vector<32xf32>
    %5 = vector.shape_cast %4 : vector<32xf32> to vector<32x1xf32>
    %cst_2 = arith.constant 1.600000e+01 : f32
    %6 = vector.broadcast %cst_2 : f32 to vector<32x1xf32>
    %7 = arith.divf %2, %6 : vector<32x1xf32>
    %cst_3 = arith.constant 1.600000e+01 : f32
    %8 = vector.broadcast %cst_3 : f32 to vector<32x1xf32>
    %9 = arith.divf %5, %8 : vector<32x1xf32>
    %10 = arith.mulf %7, %7 : vector<32x1xf32>
    %11 = arith.subf %9, %10 : vector<32x1xf32>
    %cst_4 = arith.constant 9.99999974E-6 : f32
    %12 = vector.broadcast %cst_4 : f32 to vector<32x1xf32>
    %13 = arith.addf %11, %12 : vector<32x1xf32>
    %14 = vector.shape_cast %7 : vector<32x1xf32> to vector<32x1xf32>
    %15 = vector.broadcast %14 : vector<32x1xf32> to vector<32x15xf32>
    %16 = tpu.concatenate %15, %7 in 1 : vector<32x15xf32>, vector<32x1xf32> -> vector<32x16xf32>
    %17 = vector.shape_cast %13 : vector<32x1xf32> to vector<32x1xf32>
    %18 = vector.broadcast %17 : vector<32x1xf32> to vector<32x15xf32>
    %19 = tpu.concatenate %18, %13 in 1 : vector<32x15xf32>, vector<32x1xf32> -> vector<32x16xf32>
    %20 = arith.subf %0, %16 : vector<32x16xf32>
    %cst_5 = arith.constant 0.00999999977 : f32
    %21 = vector.broadcast %cst_5 : f32 to vector<32x16xf32>
    %22 = arith.addf %19, %21 : vector<32x16xf32>
    %23 = math.sqrt %22 : vector<32x16xf32>
    %24 = arith.divf %20, %23 : vector<32x16xf32>
    %25 = math.sqrt %19 : vector<32x16xf32>
    %26 = tpu.concatenate %24, %16, %25 in 1 : vector<32x16xf32>, vector<32x16xf32>, vector<32x16xf32> -> vector<32x48xf32>
    %c0_6 = arith.constant 0 : index
    %c0_7 = arith.constant 0 : index
    %27 = vector.load %arg2[%c0_6, %c0_7] : memref<32x48xf32, #tpu.memory_space<vmem>>, vector<32x48xf32>
    tpu.vector_store %arg2[%c0_6, %c0_7], %26 {strides = array<i32>} : memref<32x48xf32, #tpu.memory_space<vmem>>, vector<32x48xf32>,
    return
  }
  func.func @transform_0(%arg0: i32) -> (i32, i32) {
    %c0_i32 = arith.constant 0 : i32
    %c0_i32_0 = arith.constant 0 : i32
    return %arg0, %c0_i32 : i32, i32
  }
  func.func @transform_1(%arg0: i32) -> (i32, i32) {
    %c0_i32 = arith.constant 0 : i32
    %c0_i32_0 = arith.constant 0 : i32
    return %arg0, %c0_i32 : i32, i32
  }
}

module attributes {stable_mosaic.version = 11 : i64} {
  func.func @_seasonal_norm_kernel(%arg0: i32, %arg1: memref<32x16xf32, #tpu.memory_space<vmem>>, %arg2: memref<32x48xf32, #tpu.memory_space<vmem>>) attributes {dimension_semantics = [#tpu.dimension_semantics<parallel>], iteration_bounds = array<i64: 2>, scalar_prefetch = 0 : i64, scratch_operands = 0 : i64, tpu.core_type = #tpu.core_type<tc>, window_params = [{transform_indices = @transform_0, window_bounds = array<i64: 32, 16>}, {transform_indices = @transform_1, window_bounds = array<i64: 32, 48>}]} {
    %c0 = arith.constant 0 : index
    %c0_0 = arith.constant 0 : index
    %0 = vector.load %arg1[%c0, %c0_0] : memref<32x16xf32, #tpu.memory_space<vmem>>, vector<32x16xf32>
    %1 = vector.extract_strided_slice %0 {offsets = [0, 0], sizes = [32, 4], strides = [1, 1]} : vector<32x16xf32> to vector<32x4xf32>
    %2 = vector.extract_strided_slice %0 {offsets = [0, 0], sizes = [32, 4], strides = [1, 1]} : vector<32x16xf32> to vector<32x4xf32>
    %3 = vector.extract_strided_slice %0 {offsets = [0, 0], sizes = [32, 4], strides = [1, 1]} : vector<32x16xf32> to vector<32x4xf32>
    %4 = arith.mulf %2, %3 : vector<32x4xf32>
    %5 = vector.extract_strided_slice %0 {offsets = [0, 4], sizes = [32, 4], strides = [1, 1]} : vector<32x16xf32> to vector<32x4xf32>
    %6 = arith.addf %1, %5 : vector<32x4xf32>
    %7 = arith.mulf %5, %5 : vector<32x4xf32>
    %8 = arith.addf %4, %7 : vector<32x4xf32>
    %9 = vector.extract_strided_slice %0 {offsets = [0, 8], sizes = [32, 4], strides = [1, 1]} : vector<32x16xf32> to vector<32x4xf32>
    %10 = arith.addf %6, %9 : vector<32x4xf32>
    %11 = arith.mulf %9, %9 : vector<32x4xf32>
    %12 = arith.addf %8, %11 : vector<32x4xf32>
    %13 = vector.extract_strided_slice %0 {offsets = [0, 12], sizes = [32, 4], strides = [1, 1]} : vector<32x16xf32> to vector<32x4xf32>
    %14 = arith.addf %10, %13 : vector<32x4xf32>
    %15 = arith.mulf %13, %13 : vector<32x4xf32>
    %16 = arith.addf %12, %15 : vector<32x4xf32>
    %cst = arith.constant 4.000000e+00 : f32
    %17 = vector.broadcast %cst : f32 to vector<32x4xf32>
    %18 = arith.divf %14, %17 : vector<32x4xf32>
    %cst_1 = arith.constant 4.000000e+00 : f32
    %19 = vector.broadcast %cst_1 : f32 to vector<32x4xf32>
    %20 = arith.divf %16, %19 : vector<32x4xf32>
    %21 = arith.mulf %18, %18 : vector<32x4xf32>
    %22 = arith.subf %20, %21 : vector<32x4xf32>
    %cst_2 = arith.constant 9.99999974E-6 : f32
    %23 = vector.broadcast %cst_2 : f32 to vector<32x4xf32>
    %24 = arith.addf %22, %23 : vector<32x4xf32>
    %25 = tpu.concatenate %18, %18, %18, %18 in 1 : vector<32x4xf32>, vector<32x4xf32>, vector<32x4xf32>, vector<32x4xf32> -> vector<32x16xf32>
    %26 = tpu.concatenate %24, %24, %24, %24 in 1 : vector<32x4xf32>, vector<32x4xf32>, vector<32x4xf32>, vector<32x4xf32> -> vector<32x16xf32>
    %27 = arith.subf %0, %25 : vector<32x16xf32>
    %cst_3 = arith.constant 0.00999999977 : f32
    %28 = vector.broadcast %cst_3 : f32 to vector<32x16xf32>
    %29 = arith.addf %26, %28 : vector<32x16xf32>
    %30 = math.sqrt %29 : vector<32x16xf32>
    %31 = arith.divf %27, %30 : vector<32x16xf32>
    %32 = math.sqrt %26 : vector<32x16xf32>
    %33 = tpu.concatenate %31, %25, %32 in 1 : vector<32x16xf32>, vector<32x16xf32>, vector<32x16xf32> -> vector<32x48xf32>
    %c0_4 = arith.constant 0 : index
    %c0_5 = arith.constant 0 : index
    %34 = vector.load %arg2[%c0_4, %c0_5] : memref<32x48xf32, #tpu.memory_space<vmem>>, vector<32x48xf32>
    tpu.vector_store %arg2[%c0_4, %c0_5], %33 {strides = array<i32>} : memref<32x48xf32, #tpu.memory_space<vmem>>, vector<32x48xf32>,
    return
  }
  func.func @transform_0(%arg0: i32) -> (i32, i32) {
    %c0_i32 = arith.constant 0 : i32
    %c0_i32_0 = arith.constant 0 : i32
    return %arg0, %c0_i32 : i32, i32
  }
  func.func @transform_1(%arg0: i32) -> (i32, i32) {
    %c0_i32 = arith.constant 0 : i32
    %c0_i32_0 = arith.constant 0 : i32
    return %arg0, %c0_i32 : i32, i32
  }
}

module attributes {stable_mosaic.version = 11 : i64} {
  func.func @_period_norm_kernel(%arg0: i32, %arg1: memref<32x16xf32, #tpu.memory_space<vmem>>, %arg2: memref<32x48xf32, #tpu.memory_space<vmem>>) attributes {dimension_semantics = [#tpu.dimension_semantics<parallel>], iteration_bounds = array<i64: 2>, scalar_prefetch = 0 : i64, scratch_operands = 0 : i64, tpu.core_type = #tpu.core_type<tc>, window_params = [{transform_indices = @transform_0, window_bounds = array<i64: 32, 16>}, {transform_indices = @transform_1, window_bounds = array<i64: 32, 48>}]} {
    %c0 = arith.constant 0 : index
    %c0_0 = arith.constant 0 : index
    %0 = vector.load %arg1[%c0, %c0_0] : memref<32x16xf32, #tpu.memory_space<vmem>>, vector<32x16xf32>
    %1 = vector.extract_strided_slice %0 {offsets = [0, 0], sizes = [32, 13], strides = [1, 1]} : vector<32x16xf32> to vector<32x13xf32>
    %2 = vector.extract_strided_slice %0 {offsets = [0, 0], sizes = [32, 13], strides = [1, 1]} : vector<32x16xf32> to vector<32x13xf32>
    %3 = vector.extract_strided_slice %0 {offsets = [0, 0], sizes = [32, 13], strides = [1, 1]} : vector<32x16xf32> to vector<32x13xf32>
    %4 = arith.mulf %2, %3 : vector<32x13xf32>
    %5 = vector.extract_strided_slice %0 {offsets = [0, 1], sizes = [32, 13], strides = [1, 1]} : vector<32x16xf32> to vector<32x13xf32>
    %6 = arith.addf %1, %5 : vector<32x13xf32>
    %7 = arith.mulf %5, %5 : vector<32x13xf32>
    %8 = arith.addf %4, %7 : vector<32x13xf32>
    %9 = vector.extract_strided_slice %0 {offsets = [0, 2], sizes = [32, 13], strides = [1, 1]} : vector<32x16xf32> to vector<32x13xf32>
    %10 = arith.addf %6, %9 : vector<32x13xf32>
    %11 = arith.mulf %9, %9 : vector<32x13xf32>
    %12 = arith.addf %8, %11 : vector<32x13xf32>
    %13 = vector.extract_strided_slice %0 {offsets = [0, 3], sizes = [32, 13], strides = [1, 1]} : vector<32x16xf32> to vector<32x13xf32>
    %14 = arith.addf %10, %13 : vector<32x13xf32>
    %15 = arith.mulf %13, %13 : vector<32x13xf32>
    %16 = arith.addf %12, %15 : vector<32x13xf32>
    %cst = arith.constant 4.000000e+00 : f32
    %17 = vector.broadcast %cst : f32 to vector<32x13xf32>
    %18 = arith.divf %14, %17 : vector<32x13xf32>
    %cst_1 = arith.constant 4.000000e+00 : f32
    %19 = vector.broadcast %cst_1 : f32 to vector<32x13xf32>
    %20 = arith.divf %16, %19 : vector<32x13xf32>
    %21 = arith.mulf %18, %18 : vector<32x13xf32>
    %22 = arith.subf %20, %21 : vector<32x13xf32>
    %cst_2 = arith.constant 9.99999974E-6 : f32
    %23 = vector.broadcast %cst_2 : f32 to vector<32x13xf32>
    %24 = arith.addf %22, %23 : vector<32x13xf32>
    %25 = vector.extract_strided_slice %18 {offsets = [0, 0], sizes = [32, 1], strides = [1, 1]} : vector<32x13xf32> to vector<32x1xf32>
    %26 = vector.shape_cast %25 : vector<32x1xf32> to vector<32x1xf32>
    %27 = vector.broadcast %26 : vector<32x1xf32> to vector<32x3xf32>
    %28 = tpu.concatenate %27, %18 in 1 : vector<32x3xf32>, vector<32x13xf32> -> vector<32x16xf32>
    %29 = vector.extract_strided_slice %24 {offsets = [0, 0], sizes = [32, 1], strides = [1, 1]} : vector<32x13xf32> to vector<32x1xf32>
    %30 = vector.shape_cast %29 : vector<32x1xf32> to vector<32x1xf32>
    %31 = vector.broadcast %30 : vector<32x1xf32> to vector<32x3xf32>
    %32 = tpu.concatenate %31, %24 in 1 : vector<32x3xf32>, vector<32x13xf32> -> vector<32x16xf32>
    %33 = arith.subf %0, %28 : vector<32x16xf32>
    %cst_3 = arith.constant 0.00999999977 : f32
    %34 = vector.broadcast %cst_3 : f32 to vector<32x16xf32>
    %35 = arith.addf %32, %34 : vector<32x16xf32>
    %36 = math.sqrt %35 : vector<32x16xf32>
    %37 = arith.divf %33, %36 : vector<32x16xf32>
    %38 = math.sqrt %32 : vector<32x16xf32>
    %39 = tpu.concatenate %37, %28, %38 in 1 : vector<32x16xf32>, vector<32x16xf32>, vector<32x16xf32> -> vector<32x48xf32>
    %c0_4 = arith.constant 0 : index
    %c0_5 = arith.constant 0 : index
    %40 = vector.load %arg2[%c0_4, %c0_5] : memref<32x48xf32, #tpu.memory_space<vmem>>, vector<32x48xf32>
    tpu.vector_store %arg2[%c0_4, %c0_5], %39 {strides = array<i32>} : memref<32x48xf32, #tpu.memory_space<vmem>>, vector<32x48xf32>,
    return
  }
  func.func @transform_0(%arg0: i32) -> (i32, i32) {
    %c0_i32 = arith.constant 0 : i32
    %c0_i32_0 = arith.constant 0 : i32
    return %arg0, %c0_i32 : i32, i32
  }
  func.func @transform_1(%arg0: i32) -> (i32, i32) {
    %c0_i32 = arith.constant 0 : i32
    %c0_i32_0 = arith.constant 0 : i32
    return %arg0, %c0_i32 : i32, i32
  }
}

module attributes {stable_mosaic.version = 11 : i64} {
  func.func @_spatial_norm_kernel(%arg0: i32, %arg1: memref<4x8xf32, #tpu.memory_space<vmem>>, %arg2: memref<4x256xf32, #tpu.memory_space<vmem>>, %arg3: memref<4x768xf32, #tpu.memory_space<vmem>>) attributes {dimension_semantics = [#tpu.dimension_semantics<arbitrary>], iteration_bounds = array<i64: 1>, scalar_prefetch = 0 : i64, scratch_operands = 0 : i64, tpu.core_type = #tpu.core_type<tc>, window_params = [{pipeline_mode = #tpu.pipeline_mode<synchronous>, transform_indices = @transform_0, window_bounds = array<i64: 4, 8>}, {pipeline_mode = #tpu.pipeline_mode<synchronous>, transform_indices = @transform_1, window_bounds = array<i64: 4, 256>}, {pipeline_mode = #tpu.pipeline_mode<synchronous>, transform_indices = @transform_2, window_bounds = array<i64: 4, 768>}]} {
    %c0 = arith.constant 0 : index
    %c0_0 = arith.constant 0 : index
    %0 = vector.load %arg1[%c0, %c0_0] : memref<4x8xf32, #tpu.memory_space<vmem>>, vector<4x8xf32>
    %c0_1 = arith.constant 0 : index
    %c0_2 = arith.constant 0 : index
    %1 = vector.load %arg2[%c0_1, %c0_2] : memref<4x256xf32, #tpu.memory_space<vmem>>, vector<4x256xf32>
    %cst = arith.constant dense<0.000000e+00> : vector<4x4xf32>
    %2 = tpu.matmul %0, %0, %cst {dimension_numbers = #tpu.dot_dimension_numbers<[1], [1], [0], [0], [0, 0, 1, 0], [], []>} : vector<4x8xf32>, vector<4x8xf32>, vector<4x4xf32> -> vector<4x4xf32>
    %3 = tpu.iota {dimensions = array<i32: 0>} : vector<4x4xi32>
    %4 = tpu.iota {dimensions = array<i32: 1>} : vector<4x4xi32>
    %5 = arith.cmpi eq, %3, %4 : vector<4x4xi32>
    %6 = arith.extui %5 : vector<4x4xi1> to vector<4x4xi32>
    %7 = arith.sitofp %6 : vector<4x4xi32> to vector<4x4xf32>
    %cst_3 = arith.constant 1.000000e+01 : f32
    %8 = vector.broadcast %cst_3 : f32 to vector<4x4xf32>
    %9 = arith.mulf %8, %7 : vector<4x4xf32>
    %10 = arith.subf %2, %9 : vector<4x4xf32>
    %cst_4 = arith.constant dense<0xFF800000> : vector<4xf32>
    %11 = vector.multi_reduction <maximumf>, %10, %cst_4 [1] : vector<4x4xf32> to vector<4xf32>
    %12 = vector.shape_cast %11 : vector<4xf32> to vector<4x1xf32>
    %13 = vector.broadcast %12 : vector<4x1xf32> to vector<4x4xf32>
    %14 = arith.subf %10, %13 : vector<4x4xf32>
    %15 = math.exp %14 : vector<4x4xf32>
    %cst_5 = arith.constant dense<0.000000e+00> : vector<4xf32>
    %16 = vector.multi_reduction <add>, %15, %cst_5 [1] : vector<4x4xf32> to vector<4xf32>
    %17 = vector.shape_cast %16 : vector<4xf32> to vector<4x1xf32>
    %18 = vector.broadcast %17 : vector<4x1xf32> to vector<4x4xf32>
    %19 = arith.divf %15, %18 : vector<4x4xf32>
    %cst_6 = arith.constant dense<0.000000e+00> : vector<4x256xf32>
    %20 = tpu.matmul %19, %1, %cst_6 {dimension_numbers = #tpu.dot_dimension_numbers<[1], [0], [0], [1], [0, 0, 1, 1], [], []>} : vector<4x4xf32>, vector<4x256xf32>, vector<4x256xf32> -> vector<4x256xf32>
    %21 = arith.mulf %1, %1 : vector<4x256xf32>
    %cst_7 = arith.constant dense<0.000000e+00> : vector<4x256xf32>
    %22 = tpu.matmul %19, %21, %cst_7 {dimension_numbers = #tpu.dot_dimension_numbers<[1], [0], [0], [1], [0, 0, 1, 1], [], []>} : vector<4x4xf32>, vector<4x256xf32>, vector<4x256xf32> -> vector<4x256xf32>
    %23 = arith.mulf %20, %20 : vector<4x256xf32>
    %24 = arith.subf %22, %23 : vector<4x256xf32>
    %cst_8 = arith.constant 9.99999974E-6 : f32
    %25 = vector.broadcast %cst_8 : f32 to vector<4x256xf32>
    %26 = arith.addf %24, %25 : vector<4x256xf32>
    %27 = arith.subf %1, %20 : vector<4x256xf32>
    %cst_9 = arith.constant 0.00999999977 : f32
    %28 = vector.broadcast %cst_9 : f32 to vector<4x256xf32>
    %29 = arith.addf %26, %28 : vector<4x256xf32>
    %30 = math.sqrt %29 : vector<4x256xf32>
    %31 = arith.divf %27, %30 : vector<4x256xf32>
    %32 = math.sqrt %26 : vector<4x256xf32>
    %33 = tpu.concatenate %31, %20, %32 in 1 : vector<4x256xf32>, vector<4x256xf32>, vector<4x256xf32> -> vector<4x768xf32>
    %c0_10 = arith.constant 0 : index
    %c0_11 = arith.constant 0 : index
    %34 = vector.load %arg3[%c0_10, %c0_11] : memref<4x768xf32, #tpu.memory_space<vmem>>, vector<4x768xf32>
    tpu.vector_store %arg3[%c0_10, %c0_11], %33 {strides = array<i32>} : memref<4x768xf32, #tpu.memory_space<vmem>>, vector<4x768xf32>,
    return
  }
  func.func @transform_0(%arg0: i32) -> (i32, i32) {
    %c0_i32 = arith.constant 0 : i32
    %c0_i32_0 = arith.constant 0 : i32
    %c0_i32_1 = arith.constant 0 : i32
    return %c0_i32, %c0_i32_0 : i32, i32
  }
  func.func @transform_1(%arg0: i32) -> (i32, i32) {
    %c0_i32 = arith.constant 0 : i32
    %c0_i32_0 = arith.constant 0 : i32
    %c0_i32_1 = arith.constant 0 : i32
    return %c0_i32, %c0_i32_0 : i32, i32
  }
  func.func @transform_2(%arg0: i32) -> (i32, i32) {
    %c0_i32 = arith.constant 0 : i32
    %c0_i32_0 = arith.constant 0 : i32
    %c0_i32_1 = arith.constant 0 : i32
    return %c0_i32, %c0_i32_0 : i32, i32
  }
}

module attributes {stable_mosaic.version = 11 : i64} {
  func.func @_mm_bias_kernel(%arg0: i32, %arg1: memref<8x224xf32, #tpu.memory_space<vmem>>, %arg2: memref<224x224xf32, #tpu.memory_space<vmem>>, %arg3: memref<1x224xf32, #tpu.memory_space<vmem>>, %arg4: memref<8x224xf32, #tpu.memory_space<vmem>>) attributes {dimension_semantics = [#tpu.dimension_semantics<arbitrary>], iteration_bounds = array<i64: 1>, scalar_prefetch = 0 : i64, scratch_operands = 0 : i64, tpu.core_type = #tpu.core_type<tc>, window_params = [{pipeline_mode = #tpu.pipeline_mode<synchronous>, transform_indices = @transform_0, window_bounds = array<i64: 8, 224>}, {pipeline_mode = #tpu.pipeline_mode<synchronous>, transform_indices = @transform_1, window_bounds = array<i64: 224, 224>}, {pipeline_mode = #tpu.pipeline_mode<synchronous>, transform_indices = @transform_2, window_bounds = array<i64: 1, 224>}, {pipeline_mode = #tpu.pipeline_mode<synchronous>, transform_indices = @transform_3, window_bounds = array<i64: 8, 224>}]} {
    %c0 = arith.constant 0 : index
    %c0_0 = arith.constant 0 : index
    %0 = vector.load %arg1[%c0, %c0_0] : memref<8x224xf32, #tpu.memory_space<vmem>>, vector<8x224xf32>
    %c0_1 = arith.constant 0 : index
    %c0_2 = arith.constant 0 : index
    %1 = vector.load %arg2[%c0_1, %c0_2] : memref<224x224xf32, #tpu.memory_space<vmem>>, vector<224x224xf32>
    %cst = arith.constant dense<0.000000e+00> : vector<8x224xf32>
    %2 = tpu.matmul %0, %1, %cst {dimension_numbers = #tpu.dot_dimension_numbers<[1], [0], [0], [1], [0, 0, 1, 1], [], []>} : vector<8x224xf32>, vector<224x224xf32>, vector<8x224xf32> -> vector<8x224xf32>
    %c0_3 = arith.constant 0 : index
    %c0_4 = arith.constant 0 : index
    %3 = vector.load %arg3[%c0_3, %c0_4] : memref<1x224xf32, #tpu.memory_space<vmem>>, vector<1x224xf32>
    %4 = vector.broadcast %3 : vector<1x224xf32> to vector<8x224xf32>
    %5 = arith.addf %2, %4 : vector<8x224xf32>
    %c0_5 = arith.constant 0 : index
    %c0_6 = arith.constant 0 : index
    %6 = vector.load %arg4[%c0_5, %c0_6] : memref<8x224xf32, #tpu.memory_space<vmem>>, vector<8x224xf32>
    tpu.vector_store %arg4[%c0_5, %c0_6], %5 {strides = array<i32>} : memref<8x224xf32, #tpu.memory_space<vmem>>, vector<8x224xf32>,
    return
  }
  func.func @transform_0(%arg0: i32) -> (i32, i32) {
    %c0_i32 = arith.constant 0 : i32
    %c0_i32_0 = arith.constant 0 : i32
    %c0_i32_1 = arith.constant 0 : i32
    return %c0_i32, %c0_i32_0 : i32, i32
  }
  func.func @transform_1(%arg0: i32) -> (i32, i32) {
    %c0_i32 = arith.constant 0 : i32
    %c0_i32_0 = arith.constant 0 : i32
    %c0_i32_1 = arith.constant 0 : i32
    return %c0_i32, %c0_i32_0 : i32, i32
  }
  func.func @transform_2(%arg0: i32) -> (i32, i32) {
    %c0_i32 = arith.constant 0 : i32
    %c0_i32_0 = arith.constant 0 : i32
    %c0_i32_1 = arith.constant 0 : i32
    return %c0_i32, %c0_i32_0 : i32, i32
  }
  func.func @transform_3(%arg0: i32) -> (i32, i32) {
    %c0_i32 = arith.constant 0 : i32
    %c0_i32_0 = arith.constant 0 : i32
    %c0_i32_1 = arith.constant 0 : i32
    return %c0_i32, %c0_i32_0 : i32, i32
  }
}

module attributes {stable_mosaic.version = 11 : i64} {
  func.func @_mm_bias_kernel(%arg0: i32, %arg1: memref<24x24xf32, #tpu.memory_space<vmem>>, %arg2: memref<24x160xf32, #tpu.memory_space<vmem>>, %arg3: memref<24x1xf32, #tpu.memory_space<vmem>>, %arg4: memref<24x160xf32, #tpu.memory_space<vmem>>) attributes {dimension_semantics = [#tpu.dimension_semantics<arbitrary>], iteration_bounds = array<i64: 1>, scalar_prefetch = 0 : i64, scratch_operands = 0 : i64, tpu.core_type = #tpu.core_type<tc>, window_params = [{pipeline_mode = #tpu.pipeline_mode<synchronous>, transform_indices = @transform_0, window_bounds = array<i64: 24, 24>}, {pipeline_mode = #tpu.pipeline_mode<synchronous>, transform_indices = @transform_1, window_bounds = array<i64: 24, 160>}, {pipeline_mode = #tpu.pipeline_mode<synchronous>, transform_indices = @transform_2, window_bounds = array<i64: 24, 1>}, {pipeline_mode = #tpu.pipeline_mode<synchronous>, transform_indices = @transform_3, window_bounds = array<i64: 24, 160>}]} {
    %c0 = arith.constant 0 : index
    %c0_0 = arith.constant 0 : index
    %0 = vector.load %arg1[%c0, %c0_0] : memref<24x24xf32, #tpu.memory_space<vmem>>, vector<24x24xf32>
    %c0_1 = arith.constant 0 : index
    %c0_2 = arith.constant 0 : index
    %1 = vector.load %arg2[%c0_1, %c0_2] : memref<24x160xf32, #tpu.memory_space<vmem>>, vector<24x160xf32>
    %cst = arith.constant dense<0.000000e+00> : vector<24x160xf32>
    %2 = tpu.matmul %0, %1, %cst {dimension_numbers = #tpu.dot_dimension_numbers<[1], [0], [0], [1], [0, 0, 1, 1], [], []>} : vector<24x24xf32>, vector<24x160xf32>, vector<24x160xf32> -> vector<24x160xf32>
    %c0_3 = arith.constant 0 : index
    %c0_4 = arith.constant 0 : index
    %3 = vector.load %arg3[%c0_3, %c0_4] : memref<24x1xf32, #tpu.memory_space<vmem>>, vector<24x1xf32>
    %4 = vector.broadcast %3 : vector<24x1xf32> to vector<24x160xf32>
    %5 = arith.addf %2, %4 : vector<24x160xf32>
    %c0_5 = arith.constant 0 : index
    %c0_6 = arith.constant 0 : index
    %6 = vector.load %arg4[%c0_5, %c0_6] : memref<24x160xf32, #tpu.memory_space<vmem>>, vector<24x160xf32>
    tpu.vector_store %arg4[%c0_5, %c0_6], %5 {strides = array<i32>} : memref<24x160xf32, #tpu.memory_space<vmem>>, vector<24x160xf32>,
    return
  }
  func.func @transform_0(%arg0: i32) -> (i32, i32) {
    %c0_i32 = arith.constant 0 : i32
    %c0_i32_0 = arith.constant 0 : i32
    %c0_i32_1 = arith.constant 0 : i32
    return %c0_i32, %c0_i32_0 : i32, i32
  }
  func.func @transform_1(%arg0: i32) -> (i32, i32) {
    %c0_i32 = arith.constant 0 : i32
    %c0_i32_0 = arith.constant 0 : i32
    %c0_i32_1 = arith.constant 0 : i32
    return %c0_i32, %c0_i32_0 : i32, i32
  }
  func.func @transform_2(%arg0: i32) -> (i32, i32) {
    %c0_i32 = arith.constant 0 : i32
    %c0_i32_0 = arith.constant 0 : i32
    %c0_i32_1 = arith.constant 0 : i32
    return %c0_i32, %c0_i32_0 : i32, i32
  }
  func.func @transform_3(%arg0: i32) -> (i32, i32) {
    %c0_i32 = arith.constant 0 : i32
    %c0_i32_0 = arith.constant 0 : i32
    %c0_i32_1 = arith.constant 0 : i32
    return %c0_i32, %c0_i32_0 : i32, i32
  }
}

module attributes {stable_mosaic.version = 11 : i64} {
  func.func @_gated_res_skip_kernel(%arg0: i32, %arg1: memref<16x336xf32, #tpu.memory_space<vmem>>, %arg2: memref<16x1xf32, #tpu.memory_space<vmem>>, %arg3: memref<8x8xf32, #tpu.memory_space<vmem>>, %arg4: memref<8x1xf32, #tpu.memory_space<vmem>>, %arg5: memref<8x8xf32, #tpu.memory_space<vmem>>, %arg6: memref<8x1xf32, #tpu.memory_space<vmem>>, %arg7: memref<112x176xf32, #tpu.memory_space<vmem>>, %arg8: memref<8x128xf32, #tpu.memory_space<vmem>>, %arg9: memref<8x32xf32, #tpu.memory_space<vmem>>) attributes {dimension_semantics = [#tpu.dimension_semantics<arbitrary>], iteration_bounds = array<i64: 1>, scalar_prefetch = 0 : i64, scratch_operands = 0 : i64, tpu.core_type = #tpu.core_type<tc>, window_params = [{pipeline_mode = #tpu.pipeline_mode<synchronous>, transform_indices = @transform_0, window_bounds = array<i64: 16, 336>}, {pipeline_mode = #tpu.pipeline_mode<synchronous>, transform_indices = @transform_1, window_bounds = array<i64: 16, 1>}, {pipeline_mode = #tpu.pipeline_mode<synchronous>, transform_indices = @transform_2, window_bounds = array<i64: 8, 8>}, {pipeline_mode = #tpu.pipeline_mode<synchronous>, transform_indices = @transform_3, window_bounds = array<i64: 8, 1>}, {pipeline_mode = #tpu.pipeline_mode<synchronous>, transform_indices = @transform_4, window_bounds = array<i64: 8, 8>}, {pipeline_mode = #tpu.pipeline_mode<synchronous>, transform_indices = @transform_5, window_bounds = array<i64: 8, 1>}, {pipeline_mode = #tpu.pipeline_mode<synchronous>, transform_indices = @transform_6, window_bounds = array<i64: 112, 176>}, {pipeline_mode = #tpu.pipeline_mode<synchronous>, transform_indices = @transform_7, window_bounds = array<i64: 8, 128>}, {pipeline_mode = #tpu.pipeline_mode<synchronous>, transform_indices = @transform_8, window_bounds = array<i64: 8, 32>}]} {
    %c0 = arith.constant 0 : index
    %c0_0 = arith.constant 0 : index
    %0 = vector.load %arg7[%c0, %c0_0] : memref<112x176xf32, #tpu.memory_space<vmem>>, vector<112x176xf32>
    %1 = vector.extract_strided_slice %0 {offsets = [0, 0], sizes = [112, 20], strides = [1, 1]} : vector<112x176xf32> to vector<112x20xf32>
    %2 = vector.extract_strided_slice %0 {offsets = [0, 1], sizes = [112, 20], strides = [1, 1]} : vector<112x176xf32> to vector<112x20xf32>
    %3 = vector.extract_strided_slice %0 {offsets = [0, 2], sizes = [112, 20], strides = [1, 1]} : vector<112x176xf32> to vector<112x20xf32>
    %4 = tpu.concatenate %1, %2, %3 in 0 : vector<112x20xf32>, vector<112x20xf32>, vector<112x20xf32> -> vector<336x20xf32>
    %5 = vector.extract_strided_slice %0 {offsets = [0, 22], sizes = [112, 20], strides = [1, 1]} : vector<112x176xf32> to vector<112x20xf32>
    %6 = vector.extract_strided_slice %0 {offsets = [0, 23], sizes = [112, 20], strides = [1, 1]} : vector<112x176xf32> to vector<112x20xf32>
    %7 = vector.extract_strided_slice %0 {offsets = [0, 24], sizes = [112, 20], strides = [1, 1]} : vector<112x176xf32> to vector<112x20xf32>
    %8 = tpu.concatenate %5, %6, %7 in 0 : vector<112x20xf32>, vector<112x20xf32>, vector<112x20xf32> -> vector<336x20xf32>
    %9 = vector.extract_strided_slice %0 {offsets = [0, 44], sizes = [112, 20], strides = [1, 1]} : vector<112x176xf32> to vector<112x20xf32>
    %10 = vector.extract_strided_slice %0 {offsets = [0, 45], sizes = [112, 20], strides = [1, 1]} : vector<112x176xf32> to vector<112x20xf32>
    %11 = vector.extract_strided_slice %0 {offsets = [0, 46], sizes = [112, 20], strides = [1, 1]} : vector<112x176xf32> to vector<112x20xf32>
    %12 = tpu.concatenate %9, %10, %11 in 0 : vector<112x20xf32>, vector<112x20xf32>, vector<112x20xf32> -> vector<336x20xf32>
    %13 = vector.extract_strided_slice %0 {offsets = [0, 66], sizes = [112, 20], strides = [1, 1]} : vector<112x176xf32> to vector<112x20xf32>
    %14 = vector.extract_strided_slice %0 {offsets = [0, 67], sizes = [112, 20], strides = [1, 1]} : vector<112x176xf32> to vector<112x20xf32>
    %15 = vector.extract_strided_slice %0 {offsets = [0, 68], sizes = [112, 20], strides = [1, 1]} : vector<112x176xf32> to vector<112x20xf32>
    %16 = tpu.concatenate %13, %14, %15 in 0 : vector<112x20xf32>, vector<112x20xf32>, vector<112x20xf32> -> vector<336x20xf32>
    %17 = vector.extract_strided_slice %0 {offsets = [0, 88], sizes = [112, 20], strides = [1, 1]} : vector<112x176xf32> to vector<112x20xf32>
    %18 = vector.extract_strided_slice %0 {offsets = [0, 89], sizes = [112, 20], strides = [1, 1]} : vector<112x176xf32> to vector<112x20xf32>
    %19 = vector.extract_strided_slice %0 {offsets = [0, 90], sizes = [112, 20], strides = [1, 1]} : vector<112x176xf32> to vector<112x20xf32>
    %20 = tpu.concatenate %17, %18, %19 in 0 : vector<112x20xf32>, vector<112x20xf32>, vector<112x20xf32> -> vector<336x20xf32>
    %21 = vector.extract_strided_slice %0 {offsets = [0, 110], sizes = [112, 20], strides = [1, 1]} : vector<112x176xf32> to vector<112x20xf32>
    %22 = vector.extract_strided_slice %0 {offsets = [0, 111], sizes = [112, 20], strides = [1, 1]} : vector<112x176xf32> to vector<112x20xf32>
    %23 = vector.extract_strided_slice %0 {offsets = [0, 112], sizes = [112, 20], strides = [1, 1]} : vector<112x176xf32> to vector<112x20xf32>
    %24 = tpu.concatenate %21, %22, %23 in 0 : vector<112x20xf32>, vector<112x20xf32>, vector<112x20xf32> -> vector<336x20xf32>
    %25 = vector.extract_strided_slice %0 {offsets = [0, 132], sizes = [112, 20], strides = [1, 1]} : vector<112x176xf32> to vector<112x20xf32>
    %26 = vector.extract_strided_slice %0 {offsets = [0, 133], sizes = [112, 20], strides = [1, 1]} : vector<112x176xf32> to vector<112x20xf32>
    %27 = vector.extract_strided_slice %0 {offsets = [0, 134], sizes = [112, 20], strides = [1, 1]} : vector<112x176xf32> to vector<112x20xf32>
    %28 = tpu.concatenate %25, %26, %27 in 0 : vector<112x20xf32>, vector<112x20xf32>, vector<112x20xf32> -> vector<336x20xf32>
    %29 = vector.extract_strided_slice %0 {offsets = [0, 154], sizes = [112, 20], strides = [1, 1]} : vector<112x176xf32> to vector<112x20xf32>
    %30 = vector.extract_strided_slice %0 {offsets = [0, 155], sizes = [112, 20], strides = [1, 1]} : vector<112x176xf32> to vector<112x20xf32>
    %31 = vector.extract_strided_slice %0 {offsets = [0, 156], sizes = [112, 20], strides = [1, 1]} : vector<112x176xf32> to vector<112x20xf32>
    %32 = tpu.concatenate %29, %30, %31 in 0 : vector<112x20xf32>, vector<112x20xf32>, vector<112x20xf32> -> vector<336x20xf32>
    %33 = tpu.concatenate %4, %8, %12, %16, %20, %24, %28, %32 in 1 : vector<336x20xf32>, vector<336x20xf32>, vector<336x20xf32>, vector<336x20xf32>, vector<336x20xf32>, vector<336x20xf32>, vector<336x20xf32>, vector<336x20xf32> -> vector<336x160xf32>
    %c0_1 = arith.constant 0 : index
    %c0_2 = arith.constant 0 : index
    %34 = vector.load %arg1[%c0_1, %c0_2] : memref<16x336xf32, #tpu.memory_space<vmem>>, vector<16x336xf32>
    %cst = arith.constant dense<0.000000e+00> : vector<16x160xf32>
    %35 = tpu.matmul %34, %33, %cst {dimension_numbers = #tpu.dot_dimension_numbers<[1], [0], [0], [1], [0, 0, 1, 1], [], []>} : vector<16x336xf32>, vector<336x160xf32>, vector<16x160xf32> -> vector<16x160xf32>
    %c0_3 = arith.constant 0 : index
    %c0_4 = arith.constant 0 : index
    %36 = vector.load %arg2[%c0_3, %c0_4] : memref<16x1xf32, #tpu.memory_space<vmem>>, vector<16x1xf32>
    %37 = vector.broadcast %36 : vector<16x1xf32> to vector<16x160xf32>
    %38 = arith.addf %35, %37 : vector<16x160xf32>
    %39 = vector.extract_strided_slice %38 {offsets = [0, 0], sizes = [8, 160], strides = [1, 1]} : vector<16x160xf32> to vector<8x160xf32>
    %40 = math.tanh %39 : vector<8x160xf32>
    %41 = vector.extract_strided_slice %38 {offsets = [8, 0], sizes = [8, 160], strides = [1, 1]} : vector<16x160xf32> to vector<8x160xf32>
    %42 = arith.negf %41 : vector<8x160xf32>
    %43 = math.exp %42 : vector<8x160xf32>
    %cst_5 = arith.constant 1.000000e+00 : f32
    %44 = vector.broadcast %cst_5 : f32 to vector<8x160xf32>
    %45 = arith.addf %44, %43 : vector<8x160xf32>
    %46 = arith.divf %44, %45 : vector<8x160xf32>
    %47 = arith.mulf %40, %46 : vector<8x160xf32>
    %c0_6 = arith.constant 0 : index
    %c0_7 = arith.constant 0 : index
    %48 = vector.load %arg3[%c0_6, %c0_7] : memref<8x8xf32, #tpu.memory_space<vmem>>, vector<8x8xf32>
    %cst_8 = arith.constant dense<0.000000e+00> : vector<8x160xf32>
    %49 = tpu.matmul %48, %47, %cst_8 {dimension_numbers = #tpu.dot_dimension_numbers<[1], [0], [0], [1], [0, 0, 1, 1], [], []>} : vector<8x8xf32>, vector<8x160xf32>, vector<8x160xf32> -> vector<8x160xf32>
    %c0_9 = arith.constant 0 : index
    %c0_10 = arith.constant 0 : index
    %50 = vector.load %arg4[%c0_9, %c0_10] : memref<8x1xf32, #tpu.memory_space<vmem>>, vector<8x1xf32>
    %51 = vector.broadcast %50 : vector<8x1xf32> to vector<8x160xf32>
    %52 = arith.addf %49, %51 : vector<8x160xf32>
    %c0_11 = arith.constant 0 : index
    %c0_12 = arith.constant 0 : index
    %53 = vector.load %arg5[%c0_11, %c0_12] : memref<8x8xf32, #tpu.memory_space<vmem>>, vector<8x8xf32>
    %cst_13 = arith.constant dense<0.000000e+00> : vector<8x160xf32>
    %54 = tpu.matmul %53, %47, %cst_13 {dimension_numbers = #tpu.dot_dimension_numbers<[1], [0], [0], [1], [0, 0, 1, 1], [], []>} : vector<8x8xf32>, vector<8x160xf32>, vector<8x160xf32> -> vector<8x160xf32>
    %c0_14 = arith.constant 0 : index
    %c0_15 = arith.constant 0 : index
    %55 = vector.load %arg6[%c0_14, %c0_15] : memref<8x1xf32, #tpu.memory_space<vmem>>, vector<8x1xf32>
    %56 = vector.broadcast %55 : vector<8x1xf32> to vector<8x160xf32>
    %57 = arith.addf %54, %56 : vector<8x160xf32>
    %58 = vector.extract_strided_slice %52 {offsets = [0, 0], sizes = [8, 16], strides = [1, 1]} : vector<8x160xf32> to vector<8x16xf32>
    %59 = vector.extract_strided_slice %52 {offsets = [0, 20], sizes = [8, 16], strides = [1, 1]} : vector<8x160xf32> to vector<8x16xf32>
    %60 = vector.extract_strided_slice %52 {offsets = [0, 40], sizes = [8, 16], strides = [1, 1]} : vector<8x160xf32> to vector<8x16xf32>
    %61 = vector.extract_strided_slice %52 {offsets = [0, 60], sizes = [8, 16], strides = [1, 1]} : vector<8x160xf32> to vector<8x16xf32>
    %62 = vector.extract_strided_slice %52 {offsets = [0, 80], sizes = [8, 16], strides = [1, 1]} : vector<8x160xf32> to vector<8x16xf32>
    %63 = vector.extract_strided_slice %52 {offsets = [0, 100], sizes = [8, 16], strides = [1, 1]} : vector<8x160xf32> to vector<8x16xf32>
    %64 = vector.extract_strided_slice %52 {offsets = [0, 120], sizes = [8, 16], strides = [1, 1]} : vector<8x160xf32> to vector<8x16xf32>
    %65 = vector.extract_strided_slice %52 {offsets = [0, 140], sizes = [8, 16], strides = [1, 1]} : vector<8x160xf32> to vector<8x16xf32>
    %66 = tpu.concatenate %58, %59, %60, %61, %62, %63, %64, %65 in 1 : vector<8x16xf32>, vector<8x16xf32>, vector<8x16xf32>, vector<8x16xf32>, vector<8x16xf32>, vector<8x16xf32>, vector<8x16xf32>, vector<8x16xf32> -> vector<8x128xf32>
    %c0_16 = arith.constant 0 : index
    %c0_17 = arith.constant 0 : index
    %67 = vector.load %arg8[%c0_16, %c0_17] : memref<8x128xf32, #tpu.memory_space<vmem>>, vector<8x128xf32>
    tpu.vector_store %arg8[%c0_16, %c0_17], %66 {strides = array<i32>} : memref<8x128xf32, #tpu.memory_space<vmem>>, vector<8x128xf32>,
    %68 = vector.extract_strided_slice %57 {offsets = [0, 16], sizes = [8, 4], strides = [1, 1]} : vector<8x160xf32> to vector<8x4xf32>
    %69 = vector.extract_strided_slice %57 {offsets = [0, 36], sizes = [8, 4], strides = [1, 1]} : vector<8x160xf32> to vector<8x4xf32>
    %70 = vector.extract_strided_slice %57 {offsets = [0, 56], sizes = [8, 4], strides = [1, 1]} : vector<8x160xf32> to vector<8x4xf32>
    %71 = vector.extract_strided_slice %57 {offsets = [0, 76], sizes = [8, 4], strides = [1, 1]} : vector<8x160xf32> to vector<8x4xf32>
    %72 = vector.extract_strided_slice %57 {offsets = [0, 96], sizes = [8, 4], strides = [1, 1]} : vector<8x160xf32> to vector<8x4xf32>
    %73 = vector.extract_strided_slice %57 {offsets = [0, 116], sizes = [8, 4], strides = [1, 1]} : vector<8x160xf32> to vector<8x4xf32>
    %74 = vector.extract_strided_slice %57 {offsets = [0, 136], sizes = [8, 4], strides = [1, 1]} : vector<8x160xf32> to vector<8x4xf32>
    %75 = vector.extract_strided_slice %57 {offsets = [0, 156], sizes = [8, 4], strides = [1, 1]} : vector<8x160xf32> to vector<8x4xf32>
    %76 = tpu.concatenate %68, %69, %70, %71, %72, %73, %74, %75 in 1 : vector<8x4xf32>, vector<8x4xf32>, vector<8x4xf32>, vector<8x4xf32>, vector<8x4xf32>, vector<8x4xf32>, vector<8x4xf32>, vector<8x4xf32> -> vector<8x32xf32>
    %c0_18 = arith.constant 0 : index
    %c0_19 = arith.constant 0 : index
    %77 = vector.load %arg9[%c0_18, %c0_19] : memref<8x32xf32, #tpu.memory_space<vmem>>, vector<8x32xf32>
    tpu.vector_store %arg9[%c0_18, %c0_19], %76 {strides = array<i32>} : memref<8x32xf32, #tpu.memory_space<vmem>>, vector<8x32xf32>,
    return
  }
  func.func @transform_0(%arg0: i32) -> (i32, i32) {
    %c0_i32 = arith.constant 0 : i32
    %c0_i32_0 = arith.constant 0 : i32
    %c0_i32_1 = arith.constant 0 : i32
    return %c0_i32, %c0_i32_0 : i32, i32
  }
  func.func @transform_1(%arg0: i32) -> (i32, i32) {
    %c0_i32 = arith.constant 0 : i32
    %c0_i32_0 = arith.constant 0 : i32
    %c0_i32_1 = arith.constant 0 : i32
    return %c0_i32, %c0_i32_0 : i32, i32
  }
  func.func @transform_2(%arg0: i32) -> (i32, i32) {
    %c0_i32 = arith.constant 0 : i32
    %c0_i32_0 = arith.constant 0 : i32
    %c0_i32_1 = arith.constant 0 : i32
    return %c0_i32, %c0_i32_0 : i32, i32
  }
  func.func @transform_3(%arg0: i32) -> (i32, i32) {
    %c0_i32 = arith.constant 0 : i32
    %c0_i32_0 = arith.constant 0 : i32
    %c0_i32_1 = arith.constant 0 : i32
    return %c0_i32, %c0_i32_0 : i32, i32
  }
  func.func @transform_4(%arg0: i32) -> (i32, i32) {
    %c0_i32 = arith.constant 0 : i32
    %c0_i32_0 = arith.constant 0 : i32
    %c0_i32_1 = arith.constant 0 : i32
    return %c0_i32, %c0_i32_0 : i32, i32
  }
  func.func @transform_5(%arg0: i32) -> (i32, i32) {
    %c0_i32 = arith.constant 0 : i32
    %c0_i32_0 = arith.constant 0 : i32
    %c0_i32_1 = arith.constant 0 : i32
    return %c0_i32, %c0_i32_0 : i32, i32
  }
  func.func @transform_6(%arg0: i32) -> (i32, i32) {
    %c0_i32 = arith.constant 0 : i32
    %c0_i32_0 = arith.constant 0 : i32
    %c0_i32_1 = arith.constant 0 : i32
    return %c0_i32, %c0_i32_0 : i32, i32
  }
  func.func @transform_7(%arg0: i32) -> (i32, i32) {
    %c0_i32 = arith.constant 0 : i32
    %c0_i32_0 = arith.constant 0 : i32
    %c0_i32_1 = arith.constant 0 : i32
    return %c0_i32, %c0_i32_0 : i32, i32
  }
  func.func @transform_8(%arg0: i32) -> (i32, i32) {
    %c0_i32 = arith.constant 0 : i32
    %c0_i32_0 = arith.constant 0 : i32
    %c0_i32_1 = arith.constant 0 : i32
    return %c0_i32, %c0_i32_0 : i32, i32
  }
}

</mosaic_0001>

<bundles_post_ra>
// kernel: mul.170.clone
= control target key start
LH: loop header
LB: loop body
LE: loop exit
PB: predicated region body
PF: predicated region fallthrough
CT: control target
= control target key end

     0   :  { %s118_s0 = inlined_call_operand.vmem [shape: f32[2,4,16], index: 0, kind: input, shape index: {}]   ;;  %s119_s1 = inlined_call_operand.vmem [shape: f32[2,8,4,16], index: 1, kind: output, shape index: {}]  }
   0x1   :  { %v4_v0 = vld [vmem:[%s118_s0] sm:$0xf]  ;;  %v38_v1 = vld [vmem:[%s118_s0 + $0x4] sm:$0xf] }
   0x2   :  { %5 = vst [vmem:[%s119_s1] sm:$0xf] %v4_v0  ;;  %39 = vst [vmem:[%s119_s1 + $0x20] sm:$0xf] %v38_v1 }
   0x3   :  { %40 = vst [vmem:[%s119_s1 + $0x4] sm:$0xf] %v4_v0  ;;  %41 = vst [vmem:[%s119_s1 + $0x24] sm:$0xf] %v38_v1 }
   0x4   :  { %42 = vst [vmem:[%s119_s1 + $0x8] sm:$0xf] %v4_v0  ;;  %43 = vst [vmem:[%s119_s1 + $0x28] sm:$0xf] %v38_v1 }
   0x5   :  { %44 = vst [vmem:[%s119_s1 + $0xc] sm:$0xf] %v4_v0  ;;  %45 = vst [vmem:[%s119_s1 + $0x2c] sm:$0xf] %v38_v1 }
   0x6   :  { %46 = vst [vmem:[%s119_s1 + $0x10] sm:$0xf] %v4_v0  ;;  %47 = vst [vmem:[%s119_s1 + $0x30] sm:$0xf] %v38_v1 }
   0x7   :  { %48 = vst [vmem:[%s119_s1 + $0x14] sm:$0xf] %v4_v0  ;;  %49 = vst [vmem:[%s119_s1 + $0x34] sm:$0xf] %v38_v1 }
   0x8   :  { %50 = vst [vmem:[%s119_s1 + $0x18] sm:$0xf] %v4_v0  ;;  %51 = vst [vmem:[%s119_s1 + $0x38] sm:$0xf] %v38_v1 }
   0x9   :  { %52 = vst [vmem:[%s119_s1 + $0x1c] sm:$0xf] %v4_v0  ;;  %53 = vst [vmem:[%s119_s1 + $0x3c] sm:$0xf] %v38_v1 }

// kernel: model_forward.7
= control target key start
LH: loop header
LB: loop body
LE: loop exit
PB: predicated region body
PF: predicated region fallthrough
CT: control target
= control target key end

     0   :  { %s413_s6 = smov 0   ;;  %s543_s0 = inlined_call_operand.vmem [shape: f32[64,16], index: 0, kind: input, shape index: {}]   ;;  %s544_s1 = inlined_call_operand.vmem [shape: f32[64,48], index: 1, kind: output, shape index: {}]  }
   0x1 LB: > { %s348_s7 = sadd.s32 4294967295, %s399_s6   ;;  %p352_p0 = scmp.ge.s32.totalorder %s399_s6, 1  ;;  %s399_s6 = sphi %s413_s6, %s11_s6  }
   0x2   : > { %p88_p1 = scmp.lt.s32.totalorder %s399_s6, 3 }
   0x4   : > { %p89_p2 = pnand %p352_p0, %p88_p1 }
   0x5   : > { %s353_s8 = sshll.u32 (!%p89_p2), %s348_s7, 2  ;;  %s401_s13 = smov (!%p89_p2), 16  }
   0x6   : > { %92 = sbr.rel (%p89_p2) target bundleno = 308 (0x134), region = 24  ;;  %p109_p3 = scmp.lt.s32.totalorder (!%p89_p2), %s353_s8, 7 }
   0x7   : > { %s402_s14 = smov (!%p89_p2), 32  }
   0xb   : > { %s546_s8 = smov (!%p109_p3, %s353_s8), 7  ;;  %vm124_vm0 = vcmask 130048  }
   0xc   : > { %s354_s9 = sshll.u32 %s546_s8, 3 }
   0xd   : > { %s112_s12 = scalar_lea.vmem %s543_s0, %s354_s9  ;;  %s118_s17 = scalar_lea.vmem %s544_s1, %s354_s9 }
   0xe   : > { %v429_v0 = vld [vmem:[%s112_s12 + $0x10] sm:$0xff]  ;;  %v431_v1 = vld [vmem:[%s112_s12] sm:$0xff]  ;;  %v433_v2 = vld [vmem:[%s112_s12 + $0x8] sm:$0xff] }
   0xf   : > { %v131_v3 = vsel %vm124_vm0, %v429_v0, 0.0  ;;  %v125_v4 = vsel %vm124_vm0, %v431_v1, 0.0  ;;  %v137_v5 = vmul.f32 %v431_v1, %v431_v1  ;;  %v128_v7 = vsel %vm124_vm0, %v433_v2, 0.0  ;;  %v446_v9 = vld [vmem:[%s112_s12 + $0x18] sm:$0xff] }
  0x10   : > { %132 = vadd.xlane.f32.xlu1 %v131_v3  ;;  %126 = vadd.xlane.f32.xlu0 %v125_v4  ;;  %v138_v8 = vmul.f32 %v433_v2, %v433_v2  ;;  %v134_v11 = vsel %vm124_vm0, %v446_v9, 0.0  ;;  %v140_v12 = vmul.f32 %v446_v9, %v446_v9  ;;  %v139_v13 = vmul.f32 %v429_v0, %v429_v0 }
  0x11   : > { %v141_v6 = vsel %vm124_vm0, %v137_v5, 0.0 }
  0x12   : > { %v144_v10 = vsel %vm124_vm0, %v138_v8, 0.0  ;;  %v150_v14 = vsel %vm124_vm0, %v140_v12, 0.0  ;;  %v147_v15 = vsel %vm124_vm0, %v139_v13, 0.0 }
  0x14   : > { %142 = vadd.xlane.f32.xlu1 %v141_v6  ;;  %129 = vadd.xlane.f32.xlu0 %v128_v7 }
  0x18   : > { %145 = vadd.xlane.f32.xlu1 %v144_v10  ;;  %135 = vadd.xlane.f32.xlu0 %v134_v11 }
  0x1c   : > { %151 = vadd.xlane.f32.xlu1 %v150_v14  ;;  %148 = vadd.xlane.f32.xlu0 %v147_v15 }
  0x99   : > { %v133_v16 = vpop.xlane.xlu1 %132  ;;  %v127_v17 = vpop.xlane.xlu0 %126 }
  0x9a   : > { %v457_v18 = vmul.f32 0.0625, %v127_v17  ;;  %v467_v25 = vmul.f32 0.0625, %v133_v16 }
  0x9c   : > { %250 = vrot.lane.b32.xlu0 %v457_v18, %s401_s13  ;;  %v162_v22 = vmul.f32 %v457_v18, %v457_v18  ;;  %v164_v36 = vmul.f32 %v467_v25, %v467_v25 }
  0x9d   : > { %v143_v19 = vpop.xlane.xlu1 %142  ;;  %v130_v20 = vpop.xlane.xlu0 %129 }
  0x9e   : > { %v158_v21 = vmul.f32 0.0625, %v143_v19  ;;  %v463_v23 = vmul.f32 0.0625, %v130_v20 }
  0xa0   : > { %v166_v24 = vsub.f32 %v158_v21, %v162_v22  ;;  %252 = vrot.lane.b32.xlu1 %v463_v23, %s401_s13  ;;  %v163_v30 = vmul.f32 %v463_v23, %v463_v23 }
  0xa1   : > { %v146_v26 = vpop.xlane.xlu1 %145  ;;  %v136_v27 = vpop.xlane.xlu0 %135 }
  0xa2   : > { %v170_v28 = vadd.f32 1e-05, %v166_v24  ;;  %v159_v29 = vmul.f32 0.0625, %v146_v26  ;;  %v471_v31 = vmul.f32 0.0625, %v136_v27 }
  0xa4   : > { %v178_v32 = vadd.f32 0.01, %v170_v28  ;;  %v167_v33 = vsub.f32 %v159_v29, %v163_v30  ;;  %254 = vrot.lane.b32.xlu1 %v467_v25, %s401_s13  ;;  %v165_v35 = vmul.f32 %v471_v31, %v471_v31  ;;  %369 = vrsqrt.f32 %v170_v28 }
  0xa5   : > { %v152_v34 = vpop.xlane.xlu1 %151  ;;  %v149_v37 = vpop.xlane.xlu0 %148  ;;  %vm220_vm1 = vcmp.eq.f32.partialorder %v170_v28, inf  ;;  %vm222_vm2 = vcmp.eq.f32.partialorder %v170_v28, 0.0  ;;  %v223_v51 = vand.u32 2147483648, %v170_v28 }
  0xa6   : > { %v171_v38 = vadd.f32 1e-05, %v167_v33  ;;  %v161_v39 = vmul.f32 0.0625, %v152_v34  ;;  %v160_v40 = vmul.f32 0.0625, %v149_v37  ;;  %371 = vrsqrt.f32 %v178_v32 }
  0xa7   : > { %vm184_vm3 = vcmp.eq.f32.partialorder %v178_v32, inf  ;;  %vm186_vm5 = vcmp.eq.f32.partialorder %v178_v32, 0.0  ;;  %v187_v55 = vand.u32 2147483648, %v178_v32 }
  0xa8   : > { %v179_v41 = vadd.f32 0.01, %v171_v38  ;;  %v169_v42 = vsub.f32 %v161_v39, %v165_v35  ;;  %v168_v43 = vsub.f32 %v160_v40, %v164_v36  ;;  %256 = vrot.lane.b32.xlu1 %v471_v31, %s401_s13  ;;  %373 = vrsqrt.f32 %v171_v38 }
  0xa9   : > { %vm227_vm4 = vcmp.eq.f32.partialorder %v171_v38, inf  ;;  %vm229_vm6 = vcmp.eq.f32.partialorder %v171_v38, 0.0  ;;  %v230_v60 = vand.u32 2147483648, %v171_v38  ;;  %v175_v35 = vsub.f32 %v433_v2, %v463_v23 }
  0xaa   : > { %v173_v44 = vadd.f32 1e-05, %v169_v42  ;;  %v481_v45 = vadd.f32 1e-05, %v168_v43  ;;  %375 = vrsqrt.f32 %v179_v41  ;;  %vm191_vm7 = vcmp.eq.f32.partialorder %v179_v41, inf }
  0xab   : > { %vm193_vm8 = vcmp.eq.f32.partialorder %v179_v41, 0.0  ;;  %v194_v3 = vand.u32 2147483648, %v179_v41  ;;  %v177_v40 = vsub.f32 %v446_v9, %v471_v31 }
  0xac   : > { %v483_v46 = vadd.f32 0.01, %v173_v44  ;;  %v486_v47 = vadd.f32 0.01, %v481_v45  ;;  %377 = vrsqrt.f32 %v173_v44  ;;  %vm241_vm9 = vcmp.eq.f32.partialorder %v173_v44, inf }
  0xad   : > { %379 = vrsqrt.f32 %v481_v45  ;;  %vm243_vm10 = vcmp.eq.f32.partialorder %v173_v44, 0.0  ;;  %v244_v6 = vand.u32 2147483648, %v173_v44  ;;  %vm234_vm11 = vcmp.eq.f32.partialorder %v481_v45, inf }
  0xae   : > { %381 = vrsqrt.f32 %v486_v47  ;;  %vm236_vm12 = vcmp.eq.f32.partialorder %v481_v45, 0.0  ;;  %v237_v13 = vand.u32 2147483648, %v481_v45  ;;  %vm198_vm13 = vcmp.eq.f32.partialorder %v486_v47, inf }
  0xaf   : > { %383 = vrsqrt.f32 %v483_v46  ;;  %vm200_vm14 = vcmp.eq.f32.partialorder %v486_v47, 0.0  ;;  %v201_v21 = vand.u32 2147483648, %v486_v47  ;;  %vm205_vm15 = vcmp.eq.f32.partialorder %v483_v46, inf }
  0xb0   : > { %v208_v27 = vand.u32 2147483648, %v483_v46 }
  0xb1   : > { %v370_v48 = vpop.eup %369 }
  0xb2   : > { %v219_v50 = vmul.f32 %v370_v48, %v170_v28 }
  0xb3   : > { %v372_v49 = vpop.eup %371 }
  0xb4   : > { %v183_v52 = vmul.f32 %v372_v49, %v178_v32  ;;  %v221_v54 = vsel %vm220_vm1, %v170_v28, %v219_v50  ;;  %vm207_vm1 = vcmp.eq.f32.partialorder %v483_v46, 0.0 }
  0xb5   : > { %v374_v53 = vpop.eup %373  ;;  %v224_v56 = vsel %vm222_vm2, %v223_v51, %v221_v54  ;;  %vm282_vm2 = vcmask 261120  }
  0xb6   : > { %v226_v57 = vmul.f32 %v374_v53, %v171_v38  ;;  %v185_v58 = vsel %vm184_vm3, %v178_v32, %v183_v52  ;;  %266 = vrot.lane.b32.xlu1 %v224_v56, %s402_s14  ;;  %v174_v32 = vsub.f32 %v431_v1, %v457_v18  ;;  %vm287_vm3 = vcmask 392192  }
  0xb7   : > { %v376_v59 = vpop.eup %375  ;;  %v188_v61 = vsel %vm186_vm5, %v187_v55, %v185_v58 }
  0xb8   : > { %v228_v62 = vsel %vm227_vm4, %v171_v38, %v226_v57  ;;  %385 = vrcp.f32 %v188_v61  ;;  %v190_v63 = vmul.f32 %v376_v59, %v179_v41  ;;  %v176_v38 = vsub.f32 %v429_v0, %v467_v25 }
  0xb9   : > { %v378_v4 = vpop.eup %377  ;;  %v231_v5 = vsel %vm229_vm6, %v230_v60, %v228_v62 }
  0xba   : > { %v380_v7 = vpop.eup %379  ;;  %268 = vrot.lane.b32.xlu0 %v231_v5, %s402_s14  ;;  %v240_v8 = vmul.f32 %v378_v4, %v173_v44  ;;  %v192_v10 = vsel %vm191_vm7, %v179_v41, %v190_v63 }
  0xbb   : > { %v382_v11 = vpop.eup %381  ;;  %v233_v12 = vmul.f32 %v380_v7, %v481_v45  ;;  %v195_v14 = vsel %vm193_vm8, %v194_v3, %v192_v10 }
  0xbc   : > { %v384_v15 = vpop.eup %383  ;;  %v242_v16 = vsel %vm241_vm9, %v173_v44, %v240_v8  ;;  %387 = vrcp.f32 %v195_v14  ;;  %v197_v17 = vmul.f32 %v382_v11, %v486_v47 }
  0xbd   : > { %v245_v19 = vsel %vm243_vm10, %v244_v6, %v242_v16  ;;  %v235_v20 = vsel %vm234_vm11, %v481_v45, %v233_v12  ;;  %v204_v22 = vmul.f32 %v384_v15, %v483_v46 }
  0xbe   : > { %272 = vrot.lane.b32.xlu1 %v245_v19, %s402_s14  ;;  %v238_v24 = vsel %vm236_vm12, %v237_v13, %v235_v20  ;;  %v199_v26 = vsel %vm198_vm13, %v486_v47, %v197_v17 }
  0xbf   : > { %270 = vrot.lane.b32.xlu0 %v238_v24, %s402_s14  ;;  %v202_v28 = vsel %vm200_vm14, %v201_v21, %v199_v26  ;;  %v206_v29 = vsel %vm205_vm15, %v483_v46, %v204_v22 }
  0xc0   : > { %389 = vrcp.f32 %v202_v28  ;;  %v209_v30 = vsel %vm207_vm1, %v208_v27, %v206_v29 }
  0xc1   : > { %391 = vrcp.f32 %v209_v30 }
  0xc5   : > { %v386_v33 = vpop.eup %385 }
  0xc6   : > { %v211_v34 = vmul.f32 %v386_v33, %v174_v32 }
  0xc9   : > { %v388_v36 = vpop.eup %387 }
  0xca   : > { %v213_v37 = vmul.f32 %v388_v36, %v175_v35 }
  0xcd   : > { %v390_v39 = vpop.eup %389 }
  0xce   : > { %v392_v41 = vpop.eup %391  ;;  %v215_v42 = vmul.f32 %v390_v39, %v176_v38 }
  0xcf   : > { %v217_v43 = vmul.f32 %v392_v41, %v177_v40 }
 0x10e   : > { %v251_v45 = vpop.permute.xlu0 %250 }
 0x10f   : > { %v278_v0 = vsel %vm124_vm0, %v211_v34, %v251_v45 }
 0x112   : > { %v253_v44 = vpop.permute.xlu1 %252 }
 0x113   : > { %v279_v9 = vsel %vm124_vm0, %v213_v37, %v253_v44 }
 0x116   : > { %v255_v1 = vpop.permute.xlu1 %254 }
 0x117   : > { %v280_v48 = vsel %vm124_vm0, %v215_v42, %v255_v1 }
 0x11a   : > { %v257_v18 = vpop.permute.xlu1 %256 }
 0x11b   : > { %v281_v46 = vsel %vm124_vm0, %v217_v43, %v257_v18 }
 0x128   : > { %v267_v2 = vpop.permute.xlu1 %266 }
 0x129   : > { %v283_v23 = vsel %vm282_vm2, %v278_v0, %v267_v2 }
 0x12a   : > { %288 = vst.msk [vmem:[%s118_s17] sm:$0xff] %vm287_vm3, %v283_v23 }
 0x12c   : > { %v269_v25 = vpop.permute.xlu0 %268 }
 0x12d   : > { %v284_v31 = vsel %vm282_vm2, %v279_v9, %v269_v25 }
 0x12e   : > { %289 = vst.msk [vmem:[%s118_s17 + $0x8] sm:$0xff] %vm287_vm3, %v284_v31 }
 0x130   : > { %v273_v47 = vpop.permute.xlu1 %272 }
 0x131   : > { %v286_v49 = vsel %vm282_vm2, %v281_v46, %v273_v47  ;;  %v271_v50 = vpop.permute.xlu0 %270 }
 0x132   : > { %v285_v51 = vsel %vm282_vm2, %v280_v48, %v271_v50  ;;  %291 = vst.msk [vmem:[%s118_s17 + $0x18] sm:$0xff] %vm287_vm3, %v286_v49 }
 0x133   : > { %290 = vst.msk [vmem:[%s118_s17 + $0x10] sm:$0xff] %vm287_vm3, %v285_v51 }
 0x134 PF: > { %s11_s6 = sadd.s32 1, %s399_s6  }
 0x135   : > { %p8_p4 = scmp.ge.s32.totalorder %s11_s6, 4  }
 0x137   :  { %10 = sbr.rel (!%p8_p4) target bundleno = 1 (0x1), region = 54 }

// kernel: model_forward.8
= control target key start
LH: loop header
LB: loop body
LE: loop exit
PB: predicated region body
PF: predicated region fallthrough
CT: control target
= control target key end

     0   :  { %s612_s6 = smov 0   ;;  %s815_s0 = inlined_call_operand.vmem [shape: f32[64,16], index: 0, kind: input, shape index: {}]   ;;  %s816_s1 = inlined_call_operand.vmem [shape: f32[64,48], index: 1, kind: output, shape index: {}]  }
   0x1 LB: > { %s535_s7 = sadd.s32 4294967295, %s592_s6   ;;  %p539_p0 = scmp.ge.s32.totalorder %s592_s6, 1  ;;  %s592_s6 = sphi %s612_s6, %s11_s6  }
   0x2   : > { %p88_p1 = scmp.lt.s32.totalorder %s592_s6, 3 }
   0x4   : > { %p89_p2 = pnand %p539_p0, %p88_p1 }
   0x5   : > { %s540_s8 = sshll.u32 (!%p89_p2), %s535_s7, 2  ;;  %s594_s13 = smov (!%p89_p2), 124  }
   0x6   : > { %92 = sbr.rel (%p89_p2) target bundleno = 455 (0x1c7), region = 24  ;;  %p109_p3 = scmp.lt.s32.totalorder (!%p89_p2), %s540_s8, 7 }
   0x7   : > { %s595_s14 = smov (!%p89_p2), 120   ;;  %s596_s15 = smov (!%p89_p2), 116  }
   0x8   : > { %s597_s16 = smov (!%p89_p2), 4   ;;  %s598_s17 = smov (!%p89_p2), 8  }
   0x9   : > { %s599_s18 = smov (!%p89_p2), 12   ;;  %s600_s19 = smov (!%p89_p2), 16  }
   0xa   : > { %s601_s20 = smov (!%p89_p2), 32  }
   0xb   : > { %s818_s8 = smov (!%p109_p3, %s540_s8), 7  ;;  %vm298_vm0 = vcmask 64512   ;;  %vm293_vm1 = vcmask 31744   ;;  %vm303_vm2 = vcmask 97280  }
   0xc   : > { %s541_s9 = sshll.u32 %s818_s8, 3 }
   0xd   : > { %s112_s12 = scalar_lea.vmem %s815_s0, %s541_s9  ;;  %s118_s23 = scalar_lea.vmem %s816_s1, %s541_s9 }
   0xe   : > { %v628_v0 = vld [vmem:[%s112_s12 + $0x10] sm:$0xff]  ;;  %v630_v1 = vld [vmem:[%s112_s12] sm:$0xff]  ;;  %v634_v2 = vld [vmem:[%s112_s12 + $0x18] sm:$0xff] }
   0xf   : > { %136 = vrot.lane.b32.xlu1 %v628_v0, %s594_s13  ;;  %132 = vrot.lane.b32.xlu0 %v630_v1, %s594_s13  ;;  %v636_v3 = vld [vmem:[%s112_s12 + $0x8] sm:$0xff]  ;;  %v124_v4 = vmul.f32 %v630_v1, %v630_v1  ;;  %v126_v6 = vmul.f32 %v628_v0, %v628_v0  ;;  %v127_v7 = vmul.f32 %v634_v2, %v634_v2 }
  0x10   : > { %v125_v5 = vmul.f32 %v636_v3, %v636_v3 }
  0x13   : > { %138 = vrot.lane.b32.xlu1 %v634_v2, %s594_s13  ;;  %134 = vrot.lane.b32.xlu0 %v636_v3, %s594_s13 }
  0x17   : > { %168 = vrot.lane.b32.xlu0 %v630_v1, %s595_s14  ;;  %152 = vrot.lane.b32.xlu1 %v124_v4, %s594_s13 }
  0x1b   : > { %154 = vrot.lane.b32.xlu0 %v125_v5, %s594_s13  ;;  %170 = vrot.lane.b32.xlu1 %v636_v3, %s595_s14 }
  0x1f   : > { %156 = vrot.lane.b32.xlu0 %v126_v6, %s594_s13  ;;  %172 = vrot.lane.b32.xlu1 %v628_v0, %s595_s14 }
  0x23   : > { %184 = vrot.lane.b32.xlu0 %v124_v4, %s595_s14  ;;  %200 = vrot.lane.b32.xlu1 %v630_v1, %s596_s15 }
  0x27   : > { %158 = vrot.lane.b32.xlu0 %v127_v7, %s594_s13  ;;  %174 = vrot.lane.b32.xlu1 %v634_v2, %s595_s14 }
  0x2b   : > { %186 = vrot.lane.b32.xlu0 %v125_v5, %s595_s14  ;;  %202 = vrot.lane.b32.xlu1 %v636_v3, %s596_s15 }
  0x2f   : > { %188 = vrot.lane.b32.xlu0 %v126_v6, %s595_s14  ;;  %204 = vrot.lane.b32.xlu1 %v628_v0, %s596_s15 }
  0x33   : > { %216 = vrot.lane.b32.xlu0 %v124_v4, %s596_s15  ;;  %190 = vrot.lane.b32.xlu1 %v127_v7, %s595_s14 }
  0x37   : > { %206 = vrot.lane.b32.xlu0 %v634_v2, %s596_s15  ;;  %218 = vrot.lane.b32.xlu1 %v125_v5, %s596_s15 }
  0x3b   : > { %220 = vrot.lane.b32.xlu0 %v126_v6, %s596_s15  ;;  %222 = vrot.lane.b32.xlu1 %v127_v7, %s596_s15 }
  0x81   : > { %v137_v8 = vpop.permute.xlu1 %136  ;;  %v133_v9 = vpop.permute.xlu0 %132 }
  0x82   : > { %v144_v18 = vadd.f32 %v133_v9, %v630_v1  ;;  %v146_v35 = vadd.f32 %v137_v8, %v628_v0 }
  0x85   : > { %v139_v10 = vpop.permute.xlu1 %138  ;;  %v135_v11 = vpop.permute.xlu0 %134 }
  0x86   : > { %v145_v26 = vadd.f32 %v135_v11, %v636_v3  ;;  %v147_v37 = vadd.f32 %v139_v10, %v634_v2 }
  0x89   : > { %v169_v12 = vpop.permute.xlu0 %168  ;;  %v153_v13 = vpop.permute.xlu1 %152 }
  0x8a   : > { %v180_v19 = vadd.f32 %v169_v12, %v144_v18  ;;  %v164_v34 = vadd.f32 %v153_v13, %v124_v4 }
  0x8d   : > { %v155_v14 = vpop.permute.xlu0 %154  ;;  %v171_v15 = vpop.permute.xlu1 %170 }
  0x8e   : > { %v181_v27 = vadd.f32 %v171_v15, %v145_v26  ;;  %v165_v40 = vadd.f32 %v155_v14, %v125_v5 }
  0x91   : > { %v157_v16 = vpop.permute.xlu0 %156  ;;  %v173_v17 = vpop.permute.xlu1 %172 }
  0x92   : > { %v182_v41 = vadd.f32 %v173_v17, %v146_v35  ;;  %v166_v48 = vadd.f32 %v157_v16, %v126_v6 }
  0x95   : > { %v185_v20 = vpop.permute.xlu0 %184  ;;  %v201_v21 = vpop.permute.xlu1 %200 }
  0x96   : > { %v212_v22 = vadd.f32 %v201_v21, %v180_v19  ;;  %v196_v36 = vadd.f32 %v185_v20, %v164_v34 }
  0x98   : > { %v657_v23 = vmul.f32 0.25, %v212_v22 }
  0x99   : > { %v159_v24 = vpop.permute.xlu0 %158  ;;  %v175_v25 = vpop.permute.xlu1 %174 }
  0x9a   : > { %257 = vrot.lane.b32.xlu0 %v657_v23, %s597_s16  ;;  %v183_v43 = vadd.f32 %v175_v25, %v147_v37  ;;  %v241_v47 = vmul.f32 %v657_v23, %v657_v23  ;;  %v167_v51 = vadd.f32 %v159_v24, %v127_v7 }
  0x9d   : > { %v187_v28 = vpop.permute.xlu0 %186  ;;  %v203_v29 = vpop.permute.xlu1 %202 }
  0x9e   : > { %v213_v30 = vadd.f32 %v203_v29, %v181_v27  ;;  %v197_v44 = vadd.f32 %v187_v28, %v165_v40 }
  0xa0   : > { %v662_v31 = vmul.f32 0.25, %v213_v30 }
  0xa1   : > { %v189_v32 = vpop.permute.xlu0 %188  ;;  %v205_v33 = vpop.permute.xlu1 %204 }
  0xa2   : > { %259 = vrot.lane.b32.xlu1 %v662_v31, %s597_s16  ;;  %v214_v45 = vadd.f32 %v205_v33, %v182_v41  ;;  %v198_v55 = vadd.f32 %v189_v32, %v166_v48  ;;  %v242_v56 = vmul.f32 %v662_v31, %v662_v31 }
  0xa4   : > { %v672_v57 = vmul.f32 0.25, %v214_v45 }
  0xa5   : > { %v217_v38 = vpop.permute.xlu0 %216  ;;  %v191_v39 = vpop.permute.xlu1 %190 }
  0xa6   : > { %v228_v42 = vadd.f32 %v217_v38, %v196_v36  ;;  %v199_v59 = vadd.f32 %v191_v39, %v167_v51  ;;  %v243_v9 = vmul.f32 %v672_v57, %v672_v57 }
  0xa8   : > { %v237_v46 = vmul.f32 0.25, %v228_v42 }
  0xa9   : > { %v207_v49 = vpop.permute.xlu0 %206  ;;  %v219_v50 = vpop.permute.xlu1 %218 }
  0xaa   : > { %v245_v52 = vsub.f32 %v237_v46, %v241_v47  ;;  %v215_v53 = vadd.f32 %v207_v49, %v183_v43  ;;  %v229_v54 = vadd.f32 %v219_v50, %v197_v44 }
  0xac   : > { %v249_v58 = vadd.f32 1e-05, %v245_v52  ;;  %v238_v60 = vmul.f32 0.25, %v229_v54  ;;  %v674_v63 = vmul.f32 0.25, %v215_v53 }
  0xad   : > { %v221_v61 = vpop.permute.xlu0 %220  ;;  %v223_v62 = vpop.permute.xlu1 %222 }
  0xae   : > { %v246_v4 = vsub.f32 %v238_v60, %v242_v56  ;;  %v230_v5 = vadd.f32 %v221_v61, %v198_v55  ;;  %v231_v6 = vadd.f32 %v223_v62, %v199_v59  ;;  %312 = vrot.lane.b32.xlu0 %v249_v58, %s597_s16  ;;  %v244_v12 = vmul.f32 %v674_v63, %v674_v63 }
  0xb0   : > { %v250_v7 = vadd.f32 1e-05, %v246_v4  ;;  %v239_v8 = vmul.f32 0.25, %v230_v5  ;;  %v240_v10 = vmul.f32 0.25, %v231_v6 }
  0xb2   : > { %v247_v11 = vsub.f32 %v239_v8, %v243_v9  ;;  %324 = vrot.lane.b32.xlu0 %v249_v58, %s598_s17  ;;  %314 = vrot.lane.b32.xlu1 %v250_v7, %s597_s16  ;;  %v248_v14 = vsub.f32 %v240_v10, %v244_v12 }
  0xb4   : > { %v251_v13 = vadd.f32 1e-05, %v247_v11  ;;  %v252_v15 = vadd.f32 1e-05, %v248_v14 }
  0xb6   : > { %326 = vrot.lane.b32.xlu0 %v250_v7, %s598_s17  ;;  %316 = vrot.lane.b32.xlu1 %v251_v13, %s597_s16 }
  0xba   : > { %336 = vrot.lane.b32.xlu1 %v249_v58, %s599_s18  ;;  %318 = vrot.lane.b32.xlu0 %v252_v15, %s597_s16 }
  0xbe   : > { %328 = vrot.lane.b32.xlu1 %v251_v13, %s598_s17  ;;  %338 = vrot.lane.b32.xlu0 %v250_v7, %s599_s18 }
  0xc2   : > { %330 = vrot.lane.b32.xlu1 %v252_v15, %s598_s17  ;;  %340 = vrot.lane.b32.xlu0 %v251_v13, %s599_s18 }
  0xc6   : > { %342 = vrot.lane.b32.xlu1 %v252_v15, %s599_s18  ;;  %269 = vrot.lane.b32.xlu0 %v657_v23, %s598_s17 }
  0xca   : > { %261 = vrot.lane.b32.xlu1 %v672_v57, %s597_s16  ;;  %271 = vrot.lane.b32.xlu0 %v662_v31, %s598_s17 }
  0xce   : > { %281 = vrot.lane.b32.xlu1 %v657_v23, %s599_s18  ;;  %263 = vrot.lane.b32.xlu0 %v674_v63, %s597_s16 }
  0xd2   : > { %273 = vrot.lane.b32.xlu1 %v672_v57, %s598_s17  ;;  %283 = vrot.lane.b32.xlu0 %v662_v31, %s599_s18 }
  0xd6   : > { %275 = vrot.lane.b32.xlu1 %v674_v63, %s598_s17  ;;  %285 = vrot.lane.b32.xlu0 %v672_v57, %s599_s18 }
  0xda   : > { %287 = vrot.lane.b32.xlu1 %v674_v63, %s599_s18 }
 0x10c   : > { %v258_v16 = vpop.permute.xlu0 %257 }
 0x10d   : > { %v294_v56 = vsel %vm293_vm1, %v657_v23, %v258_v16 }
 0x114   : > { %v696_v17 = vpop.permute.xlu1 %259 }
 0x115   : > { %v295_v10 = vsel %vm293_vm1, %v662_v31, %v696_v17 }
 0x120   : > { %v313_v18 = vpop.permute.xlu0 %312 }
 0x121   : > { %v348_v24 = vsel %vm293_vm1, %v249_v58, %v313_v18 }
 0x124   : > { %v325_v19 = vpop.permute.xlu0 %324  ;;  %v315_v20 = vpop.permute.xlu1 %314 }
 0x125   : > { %v352_v25 = vsel %vm298_vm0, %v348_v24, %v325_v19  ;;  %v349_v30 = vsel %vm293_vm1, %v250_v7, %v315_v20 }
 0x128   : > { %v327_v21 = vpop.permute.xlu0 %326  ;;  %v317_v22 = vpop.permute.xlu1 %316 }
 0x129   : > { %v353_v32 = vsel %vm298_vm0, %v349_v30, %v327_v21  ;;  %v350_v37 = vsel %vm293_vm1, %v251_v13, %v317_v22 }
 0x12c   : > { %v319_v26 = vpop.permute.xlu0 %318  ;;  %v337_v27 = vpop.permute.xlu1 %336 }
 0x12d   : > { %v701_v28 = vsel %vm303_vm2, %v352_v25, %v337_v27  ;;  %v351_v43 = vsel %vm293_vm1, %v252_v15, %v319_v26 }
 0x12e   : > { %v364_v29 = vadd.f32 0.01, %v701_v28  ;;  %562 = vrsqrt.f32 %v701_v28  ;;  %vm406_vm5 = vcmp.eq.f32.partialorder %v701_v28, inf  ;;  %v409_v12 = vand.u32 2147483648, %v701_v28 }
 0x12f   : > { %vm408_vm8 = vcmp.eq.f32.partialorder %v701_v28, 0.0 }
 0x130   : > { %564 = vrsqrt.f32 %v364_v29  ;;  %v339_v33 = vpop.permute.xlu0 %338  ;;  %v329_v34 = vpop.permute.xlu1 %328  ;;  %vm370_vm3 = vcmp.eq.f32.partialorder %v364_v29, inf  ;;  %v373_v58 = vand.u32 2147483648, %v364_v29  ;;  %vm372_vm4 = vcmp.eq.f32.partialorder %v364_v29, 0.0 }
 0x131   : > { %v708_v35 = vsel %vm303_vm2, %v353_v32, %v339_v33  ;;  %v354_v38 = vsel %vm298_vm0, %v350_v37, %v329_v34 }
 0x132   : > { %v365_v36 = vadd.f32 0.01, %v708_v35  ;;  %566 = vrsqrt.f32 %v708_v35  ;;  %vm413_vm9 = vcmp.eq.f32.partialorder %v708_v35, inf  ;;  %v416_v26 = vand.u32 2147483648, %v708_v35 }
 0x133   : > { %vm415_vm11 = vcmp.eq.f32.partialorder %v708_v35, 0.0 }
 0x134   : > { %568 = vrsqrt.f32 %v365_v36  ;;  %v341_v39 = vpop.permute.xlu0 %340  ;;  %v331_v40 = vpop.permute.xlu1 %330  ;;  %vm377_vm6 = vcmp.eq.f32.partialorder %v365_v36, inf  ;;  %v380_v11 = vand.u32 2147483648, %v365_v36  ;;  %vm379_vm7 = vcmp.eq.f32.partialorder %v365_v36, 0.0 }
 0x135   : > { %v715_v41 = vsel %vm303_vm2, %v354_v38, %v341_v39  ;;  %v355_v44 = vsel %vm298_vm0, %v351_v43, %v331_v40 }
 0x136   : > { %v718_v42 = vadd.f32 0.01, %v715_v41  ;;  %570 = vrsqrt.f32 %v715_v41  ;;  %vm420_vm13 = vcmp.eq.f32.partialorder %v715_v41, inf  ;;  %v423_v40 = vand.u32 2147483648, %v715_v41 }
 0x137   : > { %vm422_vm15 = vcmp.eq.f32.partialorder %v715_v41, 0.0 }
 0x138   : > { %572 = vrsqrt.f32 %v718_v42  ;;  %v270_v45 = vpop.permute.xlu0 %269  ;;  %v343_v46 = vpop.permute.xlu1 %342  ;;  %vm384_vm10 = vcmp.eq.f32.partialorder %v718_v42, inf  ;;  %v387_v27 = vand.u32 2147483648, %v718_v42  ;;  %vm386_vm12 = vcmp.eq.f32.partialorder %v718_v42, 0.0 }
 0x139   : > { %v725_v47 = vsel %vm303_vm2, %v355_v44, %v343_v46  ;;  %v299_v59 = vsel %vm298_vm0, %v294_v56, %v270_v45 }
 0x13a   : > { %v728_v48 = vadd.f32 0.01, %v725_v47  ;;  %574 = vrsqrt.f32 %v725_v47 }
 0x13b   : > { %v563_v49 = vpop.eup %562 }
 0x13c   : > { %576 = vrsqrt.f32 %v728_v48  ;;  %v272_v50 = vpop.permute.xlu0 %271  ;;  %v262_v51 = vpop.permute.xlu1 %261  ;;  %v405_v54 = vmul.f32 %v563_v49, %v701_v28  ;;  %vm391_vm14 = vcmp.eq.f32.partialorder %v728_v48, inf }
 0x13d   : > { %v565_v52 = vpop.eup %564  ;;  %v300_v13 = vsel %vm298_vm0, %v295_v10, %v272_v50  ;;  %v296_v25 = vsel %vm293_vm1, %v672_v57, %v262_v51 }
 0x13e   : > { %v369_v53 = vmul.f32 %v565_v52, %v364_v29  ;;  %v407_v7 = vsel %vm406_vm5, %v701_v28, %v405_v54  ;;  %v430_v52 = vand.u32 2147483648, %v725_v47  ;;  %vm474_vm5 = vcmask 392192  }
 0x13f   : > { %v567_v55 = vpop.eup %566  ;;  %v410_v21 = vsel %vm408_vm8, %v409_v12, %v407_v7 }
 0x140   : > { %v264_v60 = vpop.permute.xlu0 %263  ;;  %v282_v61 = vpop.permute.xlu1 %281  ;;  %v371_v62 = vsel %vm370_vm3, %v364_v29, %v369_v53  ;;  %v412_v8 = vmul.f32 %v567_v55, %v708_v35  ;;  %vm393_vm3 = vcmp.eq.f32.partialorder %v728_v48, 0.0 }
 0x141   : > { %v569_v4 = vpop.eup %568  ;;  %v737_v5 = vsel %vm303_vm2, %v299_v59, %v282_v61  ;;  %v374_v6 = vsel %vm372_vm4, %v373_v58, %v371_v62  ;;  %v297_v39 = vsel %vm293_vm1, %v674_v63, %v264_v60  ;;  %vm427_vm1 = vcmp.eq.f32.partialorder %v725_v47, inf }
 0x142   : > { %578 = vrcp.f32 %v374_v6  ;;  %436 = vrot.lane.b32.xlu0 %v737_v5, %s600_s19  ;;  %v376_v23 = vmul.f32 %v569_v4, %v365_v36  ;;  %v414_v31 = vsel %vm413_vm9, %v708_v35, %v412_v8  ;;  %v360_v63 = vsub.f32 %v630_v1, %v737_v5 }
 0x143   : > { %v571_v9 = vpop.eup %570  ;;  %v417_v34 = vsel %vm415_vm11, %v416_v26, %v414_v31  ;;  %vm469_vm4 = vcmask 261120  }
 0x144   : > { %v284_v14 = vpop.permute.xlu0 %283  ;;  %v274_v15 = vpop.permute.xlu1 %273  ;;  %v378_v16 = vsel %vm377_vm6, %v365_v36, %v376_v23  ;;  %v419_v22 = vmul.f32 %v571_v9, %v715_v41 }
 0x145   : > { %v573_v18 = vpop.eup %572  ;;  %v305_v19 = vsel %vm303_vm2, %v300_v13, %v284_v14  ;;  %v381_v20 = vsel %vm379_vm7, %v380_v11, %v378_v16  ;;  %v301_v28 = vsel %vm298_vm0, %v296_v25, %v274_v15 }
 0x146   : > { %438 = vrot.lane.b32.xlu1 %v305_v19, %s600_s19  ;;  %580 = vrcp.f32 %v381_v20  ;;  %452 = vrot.lane.b32.xlu0 %v410_v21, %s601_s20  ;;  %v383_v17 = vmul.f32 %v573_v18, %v718_v42  ;;  %v421_v37 = vsel %vm420_vm13, %v715_v41, %v419_v22  ;;  %v361_v54 = vsub.f32 %v636_v3, %v305_v19 }
 0x147   : > { %v575_v24 = vpop.eup %574  ;;  %v424_v46 = vsel %vm422_vm15, %v423_v40, %v421_v37 }
 0x148   : > { %v286_v29 = vpop.permute.xlu0 %285  ;;  %v276_v30 = vpop.permute.xlu1 %275  ;;  %v385_v32 = vsel %vm384_vm10, %v718_v42, %v383_v17  ;;  %v426_v38 = vmul.f32 %v575_v24, %v725_v47  ;;  %v394_v42 = vand.u32 2147483648, %v728_v48 }
 0x149   : > { %v577_v33 = vpop.eup %576  ;;  %v306_v57 = vsel %vm303_vm2, %v301_v28, %v286_v29  ;;  %v388_v36 = vsel %vm386_vm12, %v387_v27, %v385_v32  ;;  %v302_v43 = vsel %vm298_vm0, %v297_v39, %v276_v30  ;;  %vm429_vm0 = vcmp.eq.f32.partialorder %v725_v47, 0.0 }
 0x14a   : > { %454 = vrot.lane.b32.xlu0 %v417_v34, %s601_s20  ;;  %582 = vrcp.f32 %v388_v36  ;;  %440 = vrot.lane.b32.xlu1 %v306_v57, %s600_s19  ;;  %v390_v35 = vmul.f32 %v577_v33, %v728_v48  ;;  %v428_v41 = vsel %vm427_vm1, %v725_v47, %v426_v38  ;;  %v362_v56 = vsub.f32 %v628_v0, %v306_v57 }
 0x14b   : > { %v431_v53 = vsel %vm429_vm0, %v430_v52, %v428_v41 }
 0x14c   : > { %v288_v44 = vpop.permute.xlu1 %287  ;;  %v392_v45 = vsel %vm391_vm14, %v728_v48, %v390_v35 }
 0x14d   : > { %v307_v49 = vsel %vm303_vm2, %v302_v43, %v288_v44  ;;  %v395_v50 = vsel %vm393_vm3, %v394_v42, %v392_v45  ;;  %vm464_vm2 = vcmask 130048  }
 0x14e   : > { %456 = vrot.lane.b32.xlu0 %v424_v46, %s601_s20  ;;  %584 = vrcp.f32 %v395_v50  ;;  %442 = vrot.lane.b32.xlu1 %v307_v49, %s600_s19  ;;  %v363_v60 = vsub.f32 %v634_v2, %v307_v49 }
 0x14f   : > { %v579_v51 = vpop.eup %578 }
 0x150   : > { %v397_v48 = vmul.f32 %v579_v51, %v360_v63 }
 0x152   : > { %458 = vrot.lane.b32.xlu1 %v431_v53, %s601_s20 }
 0x153   : > { %v581_v1 = vpop.eup %580 }
 0x154   : > { %v399_v55 = vmul.f32 %v581_v1, %v361_v54 }
 0x157   : > { %v583_v58 = vpop.eup %582 }
 0x158   : > { %v401_v59 = vmul.f32 %v583_v58, %v362_v56 }
 0x15b   : > { %v585_v61 = vpop.eup %584 }
 0x15c   : > { %v403_v62 = vmul.f32 %v585_v61, %v363_v60 }
 0x1b4   : > { %v437_v4 = vpop.permute.xlu0 %436 }
 0x1b5   : > { %v465_v3 = vsel %vm464_vm2, %v397_v48, %v437_v4 }
 0x1b8   : > { %v453_v47 = vpop.permute.xlu0 %452  ;;  %v439_v5 = vpop.permute.xlu1 %438 }
 0x1b9   : > { %v470_v0 = vsel %vm469_vm4, %v465_v3, %v453_v47  ;;  %v466_v2 = vsel %vm464_vm2, %v399_v55, %v439_v5 }
 0x1ba   : > { %475 = vst.msk [vmem:[%s118_s23] sm:$0xff] %vm474_vm5, %v470_v0 }
 0x1bc   : > { %v455_v6 = vpop.permute.xlu0 %454  ;;  %v441_v23 = vpop.permute.xlu1 %440 }
 0x1bd   : > { %v471_v7 = vsel %vm469_vm4, %v466_v2, %v455_v6  ;;  %v467_v8 = vsel %vm464_vm2, %v401_v59, %v441_v23 }
 0x1be   : > { %476 = vst.msk [vmem:[%s118_s23 + $0x8] sm:$0xff] %vm474_vm5, %v471_v7 }
 0x1c0   : > { %v457_v9 = vpop.permute.xlu0 %456  ;;  %v443_v10 = vpop.permute.xlu1 %442 }
 0x1c1   : > { %v472_v11 = vsel %vm469_vm4, %v467_v8, %v457_v9  ;;  %v468_v12 = vsel %vm464_vm2, %v403_v62, %v443_v10 }
 0x1c2   : > { %477 = vst.msk [vmem:[%s118_s23 + $0x10] sm:$0xff] %vm474_vm5, %v472_v11 }
 0x1c4   : > { %v459_v13 = vpop.permute.xlu1 %458 }
 0x1c5   : > { %v473_v14 = vsel %vm469_vm4, %v468_v12, %v459_v13 }
 0x1c6   : > { %478 = vst.msk [vmem:[%s118_s23 + $0x18] sm:$0xff] %vm474_vm5, %v473_v14 }
 0x1c7 PF: > { %s11_s6 = sadd.s32 1, %s592_s6  }
 0x1c8   : > { %p8_p4 = scmp.ge.s32.totalorder %s11_s6, 4  }
 0x1ca   :  { %10 = sbr.rel (!%p8_p4) target bundleno = 1 (0x1), region = 54 }

// kernel: model_forward.9
= control target key start
LH: loop header
LB: loop body
LE: loop exit
PB: predicated region body
PF: predicated region fallthrough
CT: control target
= control target key end

     0   :  { %s578_s6 = smov 0   ;;  %s740_s0 = inlined_call_operand.vmem [shape: f32[64,16], index: 0, kind: input, shape index: {}]   ;;  %s741_s1 = inlined_call_operand.vmem [shape: f32[64,48], index: 1, kind: output, shape index: {}]  }
   0x1 LB: > { %s501_s7 = sadd.s32 4294967295, %s559_s6   ;;  %p505_p0 = scmp.ge.s32.totalorder %s559_s6, 1  ;;  %s559_s6 = sphi %s578_s6, %s11_s6  }
   0x2   : > { %p88_p1 = scmp.lt.s32.totalorder %s559_s6, 3 }
   0x4   : > { %p89_p2 = pnand %p505_p0, %p88_p1 }
   0x5   : > { %s506_s8 = sshll.u32 (!%p89_p2), %s501_s7, 2  ;;  %s561_s13 = smov (!%p89_p2), 127  }
   0x6   : > { %92 = sbr.rel (%p89_p2) target bundleno = 457 (0x1c9), region = 24  ;;  %p109_p3 = scmp.lt.s32.totalorder (!%p89_p2), %s506_s8, 7 }
   0x7   : > { %s562_s14 = smov (!%p89_p2), 126   ;;  %s563_s15 = smov (!%p89_p2), 125  }
   0x8   : > { %s565_s16 = smov (!%p89_p2), 3   ;;  %s566_s17 = smov (!%p89_p2), 16  }
   0x9   : > { %s567_s18 = smov (!%p89_p2), 32  }
   0xb   : > { %s743_s8 = smov (!%p109_p3, %s506_s8), 7  ;;  %v564_v8 = vmov 0   ;;  %vm285_vm0 = vcmask 23552  }
   0xc   : > { %s507_s9 = sshll.u32 %s743_s8, 3  ;;  %527 = vset.pattern.permute.xlu0 %v564_v8  ;;  %528 = vset.pattern.permute.xlu1 %v564_v8 }
   0xd   : > { %s112_s12 = scalar_lea.vmem %s740_s0, %s507_s9  ;;  %s118_s21 = scalar_lea.vmem %s741_s1, %s507_s9 }
   0xe   : > { %v594_v0 = vld [vmem:[%s112_s12 + $0x10] sm:$0xff]  ;;  %v596_v1 = vld [vmem:[%s112_s12] sm:$0xff]  ;;  %v600_v2 = vld [vmem:[%s112_s12 + $0x18] sm:$0xff] }
   0xf   : > { %136 = vrot.lane.b32.xlu1 %v594_v0, %s561_s13  ;;  %132 = vrot.lane.b32.xlu0 %v596_v1, %s561_s13  ;;  %v602_v3 = vld [vmem:[%s112_s12 + $0x8] sm:$0xff]  ;;  %v124_v4 = vmul.f32 %v596_v1, %v596_v1  ;;  %v126_v6 = vmul.f32 %v594_v0, %v594_v0  ;;  %v127_v7 = vmul.f32 %v600_v2, %v600_v2 }
  0x10   : > { %v125_v5 = vmul.f32 %v602_v3, %v602_v3 }
  0x13   : > { %138 = vrot.lane.b32.xlu1 %v600_v2, %s561_s13  ;;  %134 = vrot.lane.b32.xlu0 %v602_v3, %s561_s13 }
  0x17   : > { %168 = vrot.lane.b32.xlu0 %v596_v1, %s562_s14  ;;  %152 = vrot.lane.b32.xlu1 %v124_v4, %s561_s13 }
  0x1b   : > { %154 = vrot.lane.b32.xlu0 %v125_v5, %s561_s13  ;;  %170 = vrot.lane.b32.xlu1 %v602_v3, %s562_s14 }
  0x1f   : > { %156 = vrot.lane.b32.xlu0 %v126_v6, %s561_s13  ;;  %172 = vrot.lane.b32.xlu1 %v594_v0, %s562_s14 }
  0x23   : > { %184 = vrot.lane.b32.xlu0 %v124_v4, %s562_s14  ;;  %200 = vrot.lane.b32.xlu1 %v596_v1, %s563_s15 }
  0x27   : > { %158 = vrot.lane.b32.xlu0 %v127_v7, %s561_s13  ;;  %174 = vrot.lane.b32.xlu1 %v600_v2, %s562_s14 }
  0x2b   : > { %186 = vrot.lane.b32.xlu0 %v125_v5, %s562_s14  ;;  %202 = vrot.lane.b32.xlu1 %v602_v3, %s563_s15 }
  0x2f   : > { %188 = vrot.lane.b32.xlu0 %v126_v6, %s562_s14  ;;  %204 = vrot.lane.b32.xlu1 %v594_v0, %s563_s15 }
  0x33   : > { %216 = vrot.lane.b32.xlu0 %v124_v4, %s563_s15  ;;  %190 = vrot.lane.b32.xlu1 %v127_v7, %s562_s14 }
  0x37   : > { %206 = vrot.lane.b32.xlu0 %v600_v2, %s563_s15  ;;  %218 = vrot.lane.b32.xlu1 %v125_v5, %s563_s15 }
  0x3b   : > { %220 = vrot.lane.b32.xlu0 %v126_v6, %s563_s15  ;;  %222 = vrot.lane.b32.xlu1 %v127_v7, %s563_s15 }
  0x81   : > { %v137_v9 = vpop.permute.xlu1 %136  ;;  %v133_v10 = vpop.permute.xlu0 %132 }
  0x82   : > { %v144_v23 = vadd.f32 %v133_v10, %v596_v1  ;;  %v146_v33 = vadd.f32 %v137_v9, %v594_v0 }
  0x85   : > { %v139_v11 = vpop.permute.xlu1 %138  ;;  %v135_v12 = vpop.permute.xlu0 %134 }
  0x86   : > { %v145_v27 = vadd.f32 %v135_v12, %v602_v3  ;;  %v147_v40 = vadd.f32 %v139_v11, %v600_v2 }
  0x89   : > { %v169_v13 = vpop.permute.xlu0 %168  ;;  %v153_v14 = vpop.permute.xlu1 %152 }
  0x8a   : > { %v180_v26 = vadd.f32 %v169_v13, %v144_v23  ;;  %v164_v32 = vadd.f32 %v153_v14, %v124_v4 }
  0x8d   : > { %v155_v15 = vpop.permute.xlu0 %154  ;;  %v171_v16 = vpop.permute.xlu1 %170 }
  0x8e   : > { %v181_v29 = vadd.f32 %v171_v16, %v145_v27  ;;  %v165_v41 = vadd.f32 %v155_v15, %v125_v5 }
  0x91   : > { %v157_v17 = vpop.permute.xlu0 %156  ;;  %v173_v18 = vpop.permute.xlu1 %172 }
  0x92   : > { %v182_v37 = vadd.f32 %v173_v18, %v146_v33  ;;  %v166_v49 = vadd.f32 %v157_v17, %v126_v6 }
  0x95   : > { %v185_v19 = vpop.permute.xlu0 %184  ;;  %v201_v20 = vpop.permute.xlu1 %200 }
  0x96   : > { %v212_v28 = vadd.f32 %v201_v20, %v180_v26  ;;  %v196_v35 = vadd.f32 %v185_v19, %v164_v32 }
  0x98   : > { %v233_v36 = vmul.f32 0.25, %v212_v28 }
  0x99   : > { %v159_v21 = vpop.permute.xlu0 %158  ;;  %v175_v22 = vpop.permute.xlu1 %174 }
  0x9a   : > { %v183_v45 = vadd.f32 %v175_v22, %v147_v40  ;;  %v241_v48 = vmul.f32 %v233_v36, %v233_v36  ;;  %v167_v52 = vadd.f32 %v159_v21, %v127_v7 }
  0x9d   : > { %v187_v24 = vpop.permute.xlu0 %186  ;;  %v203_v25 = vpop.permute.xlu1 %202 }
  0x9e   : > { %v213_v34 = vadd.f32 %v203_v25, %v181_v29  ;;  %v197_v46 = vadd.f32 %v187_v24, %v165_v41 }
  0xa0   : > { %v234_v43 = vmul.f32 0.25, %v213_v34 }
  0xa1   : > { %v189_v30 = vpop.permute.xlu0 %188  ;;  %v205_v31 = vpop.permute.xlu1 %204 }
  0xa2   : > { %v214_v44 = vadd.f32 %v205_v31, %v182_v37  ;;  %v198_v56 = vadd.f32 %v189_v30, %v166_v49  ;;  %v242_v58 = vmul.f32 %v234_v43, %v234_v43 }
  0xa4   : > { %v235_v57 = vmul.f32 0.25, %v214_v44 }
  0xa5   : > { %v217_v38 = vpop.permute.xlu0 %216  ;;  %v191_v39 = vpop.permute.xlu1 %190 }
  0xa6   : > { %v228_v42 = vadd.f32 %v217_v38, %v196_v35  ;;  %v199_v60 = vadd.f32 %v191_v39, %v167_v52  ;;  %v243_v6 = vmul.f32 %v235_v57, %v235_v57 }
  0xa8   : > { %v237_v47 = vmul.f32 0.25, %v228_v42 }
  0xa9   : > { %v207_v50 = vpop.permute.xlu0 %206  ;;  %v219_v51 = vpop.permute.xlu1 %218 }
  0xaa   : > { %v245_v53 = vsub.f32 %v237_v47, %v241_v48  ;;  %v215_v54 = vadd.f32 %v207_v50, %v183_v45  ;;  %v229_v55 = vadd.f32 %v219_v51, %v197_v46 }
  0xac   : > { %v249_v59 = vadd.f32 1e-05, %v245_v53  ;;  %v236_v61 = vmul.f32 0.25, %v215_v54  ;;  %v238_v62 = vmul.f32 0.25, %v229_v55 }
  0xad   : > { %v221_v63 = vpop.permute.xlu0 %220  ;;  %v223_v4 = vpop.permute.xlu1 %222 }
  0xae   : > { %v246_v5 = vsub.f32 %v238_v62, %v242_v58  ;;  %v230_v8 = vadd.f32 %v221_v63, %v198_v56  ;;  %v231_v9 = vadd.f32 %v223_v4, %v199_v60  ;;  %292 = vperm.xlu0 %527, %v249_v59   ;;  %v244_v7 = vmul.f32 %v236_v61, %v236_v61 }
  0xb0   : > { %v250_v10 = vadd.f32 1e-05, %v246_v5  ;;  %v239_v11 = vmul.f32 0.25, %v230_v8  ;;  %v240_v12 = vmul.f32 0.25, %v231_v9 }
  0xb2   : > { %v247_v13 = vsub.f32 %v239_v11, %v243_v6  ;;  %v248_v14 = vsub.f32 %v240_v12, %v244_v7  ;;  %297 = vperm.xlu1 %528, %v250_v10  }
  0xb4   : > { %v251_v15 = vadd.f32 1e-05, %v247_v13  ;;  %v252_v16 = vadd.f32 1e-05, %v248_v14 }
  0xb6   : > { %302 = vperm.xlu1 %528, %v251_v15   ;;  %307 = vperm.xlu0 %527, %v252_v16  }
  0xba   : > { %310 = vrot.lane.b32.xlu1 %v249_v59, %s565_s16  ;;  %312 = vrot.lane.b32.xlu0 %v250_v10, %s565_s16 }
  0xbe   : > { %314 = vrot.lane.b32.xlu1 %v251_v15, %s565_s16  ;;  %316 = vrot.lane.b32.xlu0 %v252_v16, %s565_s16 }
  0xc2   : > { %255 = vperm.xlu1 %528, %v233_v36   ;;  %260 = vperm.xlu0 %527, %v234_v43  }
  0xc6   : > { %265 = vperm.xlu1 %528, %v235_v57   ;;  %270 = vperm.xlu0 %527, %v236_v61  }
  0xca   : > { %273 = vrot.lane.b32.xlu1 %v233_v36, %s565_s16  ;;  %275 = vrot.lane.b32.xlu0 %v234_v43, %s565_s16 }
  0xce   : > { %277 = vrot.lane.b32.xlu1 %v235_v57, %s565_s16  ;;  %279 = vrot.lane.b32.xlu0 %v236_v61, %s565_s16 }
 0x129   : > { %v293_v17 = vpop.permute.xlu0 %292 }
 0x12d   : > { %v298_v18 = vpop.permute.xlu1 %297 }
 0x131   : > { %v308_v19 = vpop.permute.xlu0 %307  ;;  %v303_v20 = vpop.permute.xlu1 %302 }
 0x135   : > { %v313_v21 = vpop.permute.xlu0 %312  ;;  %v311_v22 = vpop.permute.xlu1 %310 }
 0x136   : > { %v627_v23 = vsel %vm285_vm0, %v298_v18, %v313_v21  ;;  %v322_v24 = vsel %vm285_vm0, %v293_v17, %v311_v22 }
 0x137   : > { %v331_v25 = vadd.f32 0.01, %v627_v23  ;;  %529 = vrsqrt.f32 %v627_v23  ;;  %v632_v26 = vadd.f32 0.01, %v322_v24  ;;  %vm372_vm1 = vcmp.eq.f32.partialorder %v322_v24, inf }
 0x138   : > { %531 = vrsqrt.f32 %v322_v24  ;;  %vm374_vm3 = vcmp.eq.f32.partialorder %v322_v24, 0.0  ;;  %v375_v38 = vand.u32 2147483648, %v322_v24  ;;  %vm379_vm4 = vcmp.eq.f32.partialorder %v627_v23, inf }
 0x139   : > { %533 = vrsqrt.f32 %v331_v25  ;;  %v317_v27 = vpop.permute.xlu0 %316  ;;  %v315_v28 = vpop.permute.xlu1 %314  ;;  %vm343_vm2 = vcmp.eq.f32.partialorder %v331_v25, inf  ;;  %vm345_vm5 = vcmp.eq.f32.partialorder %v331_v25, 0.0  ;;  %v346_v42 = vand.u32 2147483648, %v331_v25 }
 0x13a   : > { %535 = vrsqrt.f32 %v632_v26  ;;  %v636_v29 = vsel %vm285_vm0, %v308_v19, %v317_v27  ;;  %v639_v30 = vsel %vm285_vm0, %v303_v20, %v315_v28  ;;  %vm336_vm6 = vcmp.eq.f32.partialorder %v632_v26, inf }
 0x13b   : > { %v642_v31 = vadd.f32 0.01, %v636_v29  ;;  %537 = vrsqrt.f32 %v636_v29  ;;  %v646_v32 = vadd.f32 0.01, %v639_v30  ;;  %vm338_vm7 = vcmp.eq.f32.partialorder %v632_v26, 0.0 }
 0x13c   : > { %539 = vrsqrt.f32 %v639_v30  ;;  %v339_v50 = vand.u32 2147483648, %v632_v26  ;;  %vm381_vm8 = vcmp.eq.f32.partialorder %v627_v23, 0.0  ;;  %v382_v51 = vand.u32 2147483648, %v627_v23 }
 0x13d   : > { %541 = vrsqrt.f32 %v642_v31  ;;  %v261_v33 = vpop.permute.xlu0 %260  ;;  %v256_v34 = vpop.permute.xlu1 %255  ;;  %vm350_vm9 = vcmp.eq.f32.partialorder %v646_v32, inf  ;;  %vm352_vm10 = vcmp.eq.f32.partialorder %v646_v32, 0.0  ;;  %v353_v59 = vand.u32 2147483648, %v646_v32 }
 0x13e   : > { %543 = vrsqrt.f32 %v646_v32  ;;  %vm357_vm11 = vcmp.eq.f32.partialorder %v642_v31, inf  ;;  %vm359_vm12 = vcmp.eq.f32.partialorder %v642_v31, 0.0  ;;  %v360_v13 = vand.u32 2147483648, %v642_v31 }
 0x13f   : > { %vm386_vm13 = vcmp.eq.f32.partialorder %v639_v30, inf  ;;  %vm393_vm14 = vcmp.eq.f32.partialorder %v636_v29, inf  ;;  %v389_v21 = vand.u32 2147483648, %v639_v30  ;;  %v396_v22 = vand.u32 2147483648, %v636_v29 }
 0x140   : > { %vm388_vm15 = vcmp.eq.f32.partialorder %v639_v30, 0.0 }
 0x141   : > { %v651_v35 = vpop.permute.xlu0 %270  ;;  %v266_v36 = vpop.permute.xlu1 %265 }
 0x144   : > { %v530_v37 = vpop.eup %529 }
 0x145   : > { %v532_v39 = vpop.eup %531  ;;  %v276_v40 = vpop.permute.xlu0 %275  ;;  %v378_v43 = vmul.f32 %v530_v37, %v627_v23 }
 0x146   : > { %v274_v41 = vpop.permute.xlu1 %273  ;;  %v534_v44 = vpop.eup %533  ;;  %v657_v45 = vsel %vm285_vm0, %v261_v33, %v276_v40  ;;  %v371_v47 = vmul.f32 %v532_v39, %v322_v24 }
 0x147   : > { %v660_v46 = vsel %vm285_vm0, %v256_v34, %v274_v41  ;;  %v536_v48 = vpop.eup %535  ;;  %404 = vrot.lane.b32.xlu0 %v657_v45, %s566_s17  ;;  %v342_v49 = vmul.f32 %v534_v44, %v331_v25  ;;  %v380_v60 = vsel %vm379_vm4, %v627_v23, %v378_v43 }
 0x148   : > { %402 = vrot.lane.b32.xlu1 %v660_v46, %s566_s17  ;;  %v538_v52 = vpop.eup %537  ;;  %v335_v53 = vmul.f32 %v536_v48, %v632_v26  ;;  %v373_v54 = vsel %vm372_vm1, %v322_v24, %v371_v47  ;;  %v383_v12 = vsel %vm381_vm8, %v382_v51, %v380_v60  ;;  %v326_v27 = vsub.f32 %v596_v1, %v660_v46 }
 0x149   : > { %v540_v55 = vpop.eup %539  ;;  %v344_v56 = vsel %vm343_vm2, %v331_v25, %v342_v49  ;;  %v376_v58 = vsel %vm374_vm3, %v375_v38, %v373_v54  ;;  %v392_v5 = vmul.f32 %v538_v52, %v636_v29  ;;  %v280_v6 = vpop.permute.xlu0 %279  ;;  %v327_v25 = vsub.f32 %v602_v3, %v657_v45 }
 0x14a   : > { %v278_v57 = vpop.permute.xlu1 %277  ;;  %v542_v61 = vpop.eup %541  ;;  %v347_v62 = vsel %vm345_vm5, %v346_v42, %v344_v56  ;;  %v337_v63 = vsel %vm336_vm6, %v632_v26, %v335_v53  ;;  %v385_v7 = vmul.f32 %v540_v55, %v639_v30  ;;  %v289_v15 = vsel %vm285_vm0, %v651_v35, %v280_v6 }
 0x14b   : > { %v288_v4 = vsel %vm285_vm0, %v266_v36, %v278_v57  ;;  %v544_v8 = vpop.eup %543  ;;  %545 = vrcp.f32 %v347_v62  ;;  %v340_v9 = vsel %vm338_vm7, %v339_v50, %v337_v63  ;;  %v356_v11 = vmul.f32 %v542_v61, %v642_v31 }
 0x14c   : > { %418 = vrot.lane.b32.xlu1 %v376_v58, %s567_s18  ;;  %406 = vrot.lane.b32.xlu0 %v288_v4, %s566_s17  ;;  %547 = vrcp.f32 %v340_v9  ;;  %v349_v10 = vmul.f32 %v544_v8, %v646_v32  ;;  %v394_v17 = vsel %vm393_vm14, %v636_v29, %v392_v5  ;;  %v387_v20 = vsel %vm386_vm13, %v639_v30, %v385_v7 }
 0x14d   : > { %v358_v16 = vsel %vm357_vm11, %v642_v31, %v356_v11  ;;  %vm395_vm0 = vcmp.eq.f32.partialorder %v636_v29, 0.0  ;;  %v390_v23 = vsel %vm388_vm15, %v389_v21, %v387_v20  ;;  %v328_v30 = vsub.f32 %v594_v0, %v288_v4 }
 0x14e   : > { %v351_v14 = vsel %vm350_vm9, %v646_v32, %v349_v10  ;;  %v361_v19 = vsel %vm359_vm12, %v360_v13, %v358_v16  ;;  %v397_v24 = vsel %vm395_vm0, %v396_v22, %v394_v17  ;;  %v329_v33 = vsub.f32 %v600_v2, %v289_v15 }
 0x14f   : > { %v354_v18 = vsel %vm352_vm10, %v353_v59, %v351_v14  ;;  %vm430_vm1 = vcmask 130048   ;;  %vm435_vm2 = vcmask 261120   ;;  %vm440_vm3 = vcmask 392192  }
 0x150   : > { %420 = vrot.lane.b32.xlu1 %v383_v12, %s567_s18  ;;  %408 = vrot.lane.b32.xlu0 %v289_v15, %s566_s17  ;;  %549 = vrcp.f32 %v354_v18 }
 0x151   : > { %551 = vrcp.f32 %v361_v19 }
 0x154   : > { %422 = vrot.lane.b32.xlu1 %v390_v23, %s567_s18  ;;  %424 = vrot.lane.b32.xlu0 %v397_v24, %s567_s18 }
 0x158   : > { %v546_v26 = vpop.eup %545 }
 0x159   : > { %v548_v28 = vpop.eup %547  ;;  %v365_v31 = vmul.f32 %v546_v26, %v327_v25 }
 0x15a   : > { %v363_v32 = vmul.f32 %v548_v28, %v326_v27 }
 0x15d   : > { %v550_v29 = vpop.eup %549 }
 0x15e   : > { %v552_v34 = vpop.eup %551  ;;  %v367_v35 = vmul.f32 %v550_v29, %v328_v30 }
 0x15f   : > { %v369_v36 = vmul.f32 %v552_v34, %v329_v33 }
 0x1b9   : > { %v405_v37 = vpop.permute.xlu0 %404 }
 0x1ba   : > { %v403_v38 = vpop.permute.xlu1 %402  ;;  %v432_v2 = vsel %vm430_vm1, %v365_v31, %v405_v37 }
 0x1bb   : > { %v431_v1 = vsel %vm430_vm1, %v363_v32, %v403_v38 }
 0x1be   : > { %v407_v3 = vpop.permute.xlu0 %406  ;;  %v419_v39 = vpop.permute.xlu1 %418 }
 0x1bf   : > { %v436_v0 = vsel %vm435_vm2, %v431_v1, %v419_v39  ;;  %v433_v43 = vsel %vm430_vm1, %v367_v35, %v407_v3 }
 0x1c0   : > { %441 = vst.msk [vmem:[%s118_s21] sm:$0xff] %vm440_vm3, %v436_v0 }
 0x1c2   : > { %v409_v40 = vpop.permute.xlu0 %408  ;;  %v421_v41 = vpop.permute.xlu1 %420 }
 0x1c3   : > { %v437_v42 = vsel %vm435_vm2, %v432_v2, %v421_v41  ;;  %v434_v44 = vsel %vm430_vm1, %v369_v36, %v409_v40 }
 0x1c4   : > { %442 = vst.msk [vmem:[%s118_s21 + $0x8] sm:$0xff] %vm440_vm3, %v437_v42 }
 0x1c6   : > { %v425_v45 = vpop.permute.xlu0 %424  ;;  %v423_v46 = vpop.permute.xlu1 %422 }
 0x1c7   : > { %v439_v47 = vsel %vm435_vm2, %v434_v44, %v425_v45  ;;  %v438_v48 = vsel %vm435_vm2, %v433_v43, %v423_v46 }
 0x1c8   : > { %443 = vst.msk [vmem:[%s118_s21 + $0x10] sm:$0xff] %vm440_vm3, %v438_v48  ;;  %444 = vst.msk [vmem:[%s118_s21 + $0x18] sm:$0xff] %vm440_vm3, %v439_v47 }
 0x1c9 PF: > { %s11_s6 = sadd.s32 1, %s559_s6  }
 0x1ca   : > { %p8_p4 = scmp.ge.s32.totalorder %s11_s6, 4  }
 0x1cc   :  { %10 = sbr.rel (!%p8_p4) target bundleno = 1 (0x1), region = 54 }

// kernel: model_forward.10
= control target key start
LH: loop header
LB: loop body
LE: loop exit
PB: predicated region body
PF: predicated region fallthrough
CT: control target
= control target key end

     0   :  { %vm13_vm0 = vcmask 64512   ;;  %v363_v0 = vmov 0.0   ;;  %vm364_vm1 = vmmov 0   ;;  %v87_v2 = vlaneseq  ;;  %s403_s0 = inlined_call_operand.vmem [shape: f32[4,8], index: 0, kind: input, shape index: {}]   ;;  %s404_s1 = inlined_call_operand.vmem [shape: f32[4,256], index: 1, kind: input, shape index: {}]   ;;  %s405_s2 = inlined_call_operand.vmem [shape: f32[4,768], index: 2, kind: output, shape index: {}]  }
   0x1   :  { %341 = vmatprep.subr.mxu0 %v363_v0  ;;  %v11_v1 = vld [vmem:[%s403_s0] sm:$0xf]  ;;  %343 = vmatprep.mubr.msk.f32.mxu0 %vm364_vm1, %v363_v0  ;;  %vm96_vm3 = vcmask 27648   ;;  %vm114_vm4 = vcmask 1043456   ;;  %vm110_vm5 = vcmask 31744  }
   0x2   :  { %342 = vmatpush3.xpose.msk.msra.mxu0 %vm13_vm0, %v11_v1  ;;  %183 = vmatprep.mubr.f32.mxu1 %v363_v0  ;;  %v88_v3 = vshrl.u32 %v87_v2, 7  ;;  %v90_v4 = vand.u32 127, %v87_v2  ;;  %v386_v16 = vld [vmem:[%s404_s1] sm:$0xff] }
   0x3   :  { %v109_v17 = vcombine.high %v386_v16, %v386_v16  ;;  %v190_v18 = vmul.f32 %v386_v16, %v386_v16 }
   0x4   :  { %vm91_vm2 = vcmp.eq.s32.totalorder %v88_v3, %v90_v4 }
   0x5   :  { %344 = vmatmul.mubr.msk.f32.vlgmr.msra.gmra.mxu0 %vm13_vm0, %v11_v1  ;;  %v332_v5 = vsel %vm91_vm2, 1.0, %v363_v0  ;;  %333 = vmatprep.subr.msk.mxu1 %vm114_vm4, %v109_v17  ;;  %v192_v19 = vcombine.high %v190_v18, %v190_v18 }
   0x6   :  { %v94_v6 = vmul.f32 10.0, %v332_v5  ;;  %334 = vmatpush1.msk.msra.mxu1 %vm114_vm4, %v386_v16 }
   0x7   :  { %336 = vmatprep.subr.msk.mxu1 %vm114_vm4, %v192_v19 }
  0xc5   :  { %v83_v7 = vpop.f32.mrf.mxu0 }
  0xc6   :  { %v95_v8 = vsub.f32 %v83_v7, %v94_v6 }
  0xc7   :  { %v345_v9 = vpop.f32.mrf.mxu0 }
  0xc8   :  { %v97_v10 = vsel %vm96_vm3, %v95_v8, -inf }
  0xc9   :  { %98 = vmax.xlane.f32.xlu0 %v97_v10 }
 0x152   :  { %v99_v11 = vpop.xlane.xlu0 %98 }
 0x153   :  { %v100_v12 = vsub.f32 %v95_v8, %v99_v11 }
 0x155   :  { %v101_v13 = vmul.f32 1.442695, %v100_v12 }
 0x157   :  { %349 = vpow2.f32 %v101_v13 }
 0x164   :  { %v350_v14 = vpop.eup %349 }
 0x165   :  { %v103_v15 = vsel %vm96_vm3, %v350_v14, 0.0 }
 0x166   :  { %104 = vadd.xlane.f32.xlu0 %v103_v15 }
 0x1ef   :  { %v105_v20 = vpop.xlane.xlu0 %104 }
 0x1f0   :  { %351 = vrcp.f32 %v105_v20 }
 0x1fd   :  { %v352_v21 = vpop.eup %351 }
 0x1fe   :  { %v107_v22 = vmul.f32 %v352_v21, %v350_v14 }
 0x200   :  { %335 = vmatmul.mubr.msk.f32.vlgmr.msra.gmra.mxu1 %vm110_vm5, %v107_v22 }
 0x201   :  { %337 = vmatpush1.msk.msra.mxu1 %vm114_vm4, %v190_v18  ;;  %261 = vmatprep.mubr.f32.mxu1 %v363_v0 }
 0x204   :  { %338 = vmatmul.mubr.msk.f32.vlgmr.msra.gmra.mxu1 %vm110_vm5, %v107_v22 }
 0x2c0   :  { %v185_v23 = vpop.f32.mrf.mxu1 }
 0x2c1   :  { %v268_v25 = vmul.f32 %v185_v23, %v185_v23 }
 0x2c2   :  { %v187_v24 = vpop.f32.mrf.mxu1 }
 0x2c3   :  { %v276_v26 = vcombine.low %v185_v23, %v187_v24  ;;  %v269_v28 = vmul.f32 %v187_v24, %v187_v24 }
 0x2c4   :  { %v263_v27 = vpop.f32.mrf.mxu1 }
 0x2c5   :  { %324 = vst [vmem:[%s405_s2 + $0x8] sm:$0xff] %v276_v26  ;;  %v270_v29 = vsub.f32 %v263_v27, %v268_v25  ;;  %v278_v58 = vsub.f32 %v386_v16, %v276_v26 }
 0x2c6   :  { %v265_v30 = vpop.f32.mrf.mxu1 }
 0x2c7   :  { %v272_v31 = vadd.f32 1e-05, %v270_v29  ;;  %v271_v32 = vsub.f32 %v265_v30, %v269_v28 }
 0x2c9   :  { %v279_v33 = vadd.f32 0.01, %v272_v31  ;;  %353 = vrsqrt.f32 %v272_v31  ;;  %v273_v34 = vadd.f32 1e-05, %v271_v32  ;;  %vm303_vm6 = vcmp.eq.f32.partialorder %v272_v31, inf }
 0x2ca   :  { %vm305_vm7 = vcmp.eq.f32.partialorder %v272_v31, 0.0  ;;  %v306_v42 = vand.u32 2147483648, %v272_v31 }
 0x2cb   :  { %355 = vrsqrt.f32 %v279_v33  ;;  %v280_v35 = vadd.f32 0.01, %v273_v34  ;;  %vm283_vm8 = vcmp.eq.f32.partialorder %v279_v33, inf  ;;  %v286_v45 = vand.u32 2147483648, %v279_v33 }
 0x2cc   :  { %357 = vrsqrt.f32 %v273_v34  ;;  %vm310_vm9 = vcmp.eq.f32.partialorder %v273_v34, inf  ;;  %v313_v46 = vand.u32 2147483648, %v273_v34  ;;  %vm312_vm10 = vcmp.eq.f32.partialorder %v273_v34, 0.0 }
 0x2cd   :  { %359 = vrsqrt.f32 %v280_v35  ;;  %vm290_vm11 = vcmp.eq.f32.partialorder %v280_v35, inf  ;;  %v293_v51 = vand.u32 2147483648, %v280_v35  ;;  %vm285_vm12 = vcmp.eq.f32.partialorder %v279_v33, 0.0 }
 0x2ce   :  { %vm292_vm13 = vcmp.eq.f32.partialorder %v280_v35, 0.0 }
 0x2d6   :  { %v354_v36 = vpop.eup %353 }
 0x2d7   :  { %v302_v37 = vmul.f32 %v354_v36, %v272_v31 }
 0x2d8   :  { %v356_v38 = vpop.eup %355 }
 0x2d9   :  { %v358_v39 = vpop.eup %357  ;;  %v282_v40 = vmul.f32 %v356_v38, %v279_v33  ;;  %v304_v41 = vsel %vm303_vm6, %v272_v31, %v302_v37 }
 0x2da   :  { %v309_v43 = vmul.f32 %v358_v39, %v273_v34  ;;  %v360_v44 = vpop.eup %359  ;;  %v307_v50 = vsel %vm305_vm7, %v306_v42, %v304_v41 }
 0x2db   :  { %v284_v47 = vsel %vm283_vm8, %v279_v33, %v282_v40  ;;  %v289_v48 = vmul.f32 %v360_v44, %v280_v35 }
 0x2dc   :  { %v311_v49 = vsel %vm310_vm9, %v273_v34, %v309_v43  ;;  %v287_v55 = vsel %vm285_vm12, %v286_v45, %v284_v47 }
 0x2dd   :  { %v314_v52 = vsel %vm312_vm10, %v313_v46, %v311_v49  ;;  %v291_v53 = vsel %vm290_vm11, %v280_v35, %v289_v48 }
 0x2de   :  { %v320_v54 = vcombine.low %v307_v50, %v314_v52  ;;  %v294_v56 = vsel %vm292_vm13, %v293_v51, %v291_v53 }
 0x2df   :  { %v297_v57 = vcombine.low %v287_v55, %v294_v56 }
 0x2e0   :  { %325 = vst [vmem:[%s405_s2 + $0x10] sm:$0xff] %v320_v54 }
 0x2e1   :  { %361 = vrcp.f32 %v297_v57 }
 0x2ee   :  { %v362_v59 = vpop.eup %361 }
 0x2ef   :  { %v300_v60 = vmul.f32 %v362_v59, %v278_v58 }
 0x2f1   :  { %v316_v61 = vcombine.high %v300_v60, %v300_v60 }
 0x2f3   :  { %v319_v62 = vcombine.low %v300_v60, %v316_v61 }
 0x2f5   :  { %323 = vst [vmem:[%s405_s2] sm:$0xff] %v319_v62 }

// kernel: model_forward.11
= control target key start
LH: loop header
LB: loop body
LE: loop exit
PB: predicated region body
PF: predicated region fallthrough
CT: control target
= control target key end

     0   :  { %vm84_vm0 = vcmask 785408   ;;  %v74_v58 = vlaneseq  ;;  %s371_s1 = inlined_call_operand.vmem [shape: f32[224,224], index: 1, kind: input, shape index: {}]   ;;  %s372_s0 = inlined_call_operand.vmem [shape: f32[8,224], index: 0, kind: input, shape index: {}]   ;;  %s373_s2 = inlined_call_operand.vmem [shape: f32[1,224], index: 2, kind: input, shape index: {}]   ;;  %s374_s3 = inlined_call_operand.vmem [shape: f32[8,224], index: 3, kind: output, shape index: {}]  }
   0x1   :  { %v47_v0 = vld [vmem:[%s371_s1 + $0xf8] sm:$0xff]  ;;  %v46_v1 = vld [vmem:[%s371_s1 + $0xf0] sm:$0xff]  ;;  %v45_v2 = vld [vmem:[%s371_s1 + $0xe8] sm:$0xff] }
   0x2   :  { %88 = vmatprep.subr.mxu0 %v47_v0  ;;  %v44_v3 = vld [vmem:[%s371_s1 + $0xe0] sm:$0xff]  ;;  %v43_v4 = vld [vmem:[%s371_s1 + $0xd8] sm:$0xff]  ;;  %v42_v5 = vld [vmem:[%s371_s1 + $0xd0] sm:$0xff]  ;;  %v75_v59 = vshrl.u32 %v74_v58, 7 }
   0x3   :  { %89 = vmatpush1.msra.mxu0 %v46_v1  ;;  %v41_v6 = vld [vmem:[%s371_s1 + $0xc8] sm:$0xff]  ;;  %v40_v7 = vld [vmem:[%s371_s1 + $0xc0] sm:$0xff]  ;;  %v39_v8 = vld [vmem:[%s371_s1 + $0xb8] sm:$0xff] }
   0x4   :  { %90 = vmatprep.subr.mxu0 %v45_v2  ;;  %v38_v9 = vld [vmem:[%s371_s1 + $0xb0] sm:$0xff]  ;;  %v37_v10 = vld [vmem:[%s371_s1 + $0xa8] sm:$0xff]  ;;  %v36_v11 = vld [vmem:[%s371_s1 + $0xa0] sm:$0xff]  ;;  %v76_v60 = vsub.s32 0, %v75_v59  ;;  %v80_v62 = vsub.s32 1, %v75_v59 }
   0x5   :  { %91 = vmatpush1.msra.mxu0 %v44_v3  ;;  %v35_v12 = vld [vmem:[%s371_s1 + $0x98] sm:$0xff]  ;;  %v34_v13 = vld [vmem:[%s371_s1 + $0x90] sm:$0xff]  ;;  %v33_v14 = vld [vmem:[%s371_s1 + $0x88] sm:$0xff] }
   0x6   :  { %92 = vmatprep.subr.mxu0 %v43_v4  ;;  %v32_v15 = vld [vmem:[%s371_s1 + $0x80] sm:$0xff]  ;;  %v31_v16 = vld [vmem:[%s371_s1 + $0x78] sm:$0xff]  ;;  %v30_v17 = vld [vmem:[%s371_s1 + $0x70] sm:$0xff] }
   0x7   :  { %93 = vmatpush1.msra.mxu0 %v42_v5  ;;  %v29_v18 = vld [vmem:[%s371_s1 + $0x68] sm:$0xff]  ;;  %v28_v19 = vld [vmem:[%s371_s1 + $0x60] sm:$0xff]  ;;  %v27_v20 = vld [vmem:[%s371_s1 + $0x58] sm:$0xff] }
   0x8   :  { %94 = vmatprep.subr.mxu0 %v41_v6  ;;  %v15_v21 = vld [vmem:[%s372_s0 + $0x8] sm:$0xff]  ;;  %v26_v22 = vld [vmem:[%s371_s1 + $0x50] sm:$0xff]  ;;  %v24_v24 = vld [vmem:[%s371_s1 + $0x40] sm:$0xff] }
   0x9   :  { %95 = vmatpush1.msra.mxu0 %v40_v7  ;;  %165 = vmatprep.mubr.msk.f32.mxu0 %vm84_vm0, %v15_v21  ;;  %v25_v23 = vld [vmem:[%s371_s1 + $0x48] sm:$0xff]  ;;  %v23_v25 = vld [vmem:[%s371_s1 + $0x38] sm:$0xff]  ;;  %v22_v26 = vld [vmem:[%s371_s1 + $0x30] sm:$0xff] }
   0xa   :  { %96 = vmatprep.subr.mxu0 %v39_v8  ;;  %v21_v27 = vld [vmem:[%s371_s1 + $0x28] sm:$0xff]  ;;  %v20_v28 = vld [vmem:[%s371_s1 + $0x20] sm:$0xff]  ;;  %v19_v29 = vld [vmem:[%s371_s1 + $0x18] sm:$0xff] }
   0xb   :  { %97 = vmatpush1.msra.mxu0 %v38_v9  ;;  %v18_v30 = vld [vmem:[%s371_s1 + $0x10] sm:$0xff]  ;;  %v17_v31 = vld [vmem:[%s371_s1 + $0x8] sm:$0xff]  ;;  %v16_v32 = vld [vmem:[%s371_s1] sm:$0xff] }
   0xc   :  { %98 = vmatprep.subr.mxu0 %v37_v10  ;;  %v71_v33 = vld [vmem:[%s371_s1 + $0x1b8] sm:$0xff]  ;;  %v70_v34 = vld [vmem:[%s371_s1 + $0x1b0] sm:$0xff]  ;;  %v69_v35 = vld [vmem:[%s371_s1 + $0x1a8] sm:$0xff] }
   0xd   :  { %99 = vmatpush1.msra.mxu0 %v36_v11  ;;  %v68_v36 = vld [vmem:[%s371_s1 + $0x1a0] sm:$0xff]  ;;  %v67_v37 = vld [vmem:[%s371_s1 + $0x198] sm:$0xff]  ;;  %v66_v38 = vld [vmem:[%s371_s1 + $0x190] sm:$0xff] }
   0xe   :  { %100 = vmatprep.subr.mxu0 %v35_v12  ;;  %v65_v39 = vld [vmem:[%s371_s1 + $0x188] sm:$0xff]  ;;  %v64_v40 = vld [vmem:[%s371_s1 + $0x180] sm:$0xff]  ;;  %v63_v41 = vld [vmem:[%s371_s1 + $0x178] sm:$0xff] }
   0xf   :  { %101 = vmatpush1.msra.mxu0 %v34_v13  ;;  %v62_v42 = vld [vmem:[%s371_s1 + $0x170] sm:$0xff]  ;;  %v61_v43 = vld [vmem:[%s371_s1 + $0x168] sm:$0xff]  ;;  %v60_v44 = vld [vmem:[%s371_s1 + $0x160] sm:$0xff] }
  0x10   :  { %102 = vmatprep.subr.mxu0 %v33_v14  ;;  %v59_v45 = vld [vmem:[%s371_s1 + $0x158] sm:$0xff]  ;;  %v58_v46 = vld [vmem:[%s371_s1 + $0x150] sm:$0xff]  ;;  %v57_v47 = vld [vmem:[%s371_s1 + $0x148] sm:$0xff] }
  0x11   :  { %103 = vmatpush1.msra.mxu0 %v32_v15  ;;  %v56_v48 = vld [vmem:[%s371_s1 + $0x140] sm:$0xff]  ;;  %v55_v49 = vld [vmem:[%s371_s1 + $0x138] sm:$0xff]  ;;  %v54_v50 = vld [vmem:[%s371_s1 + $0x130] sm:$0xff] }
  0x12   :  { %104 = vmatprep.subr.mxu0 %v31_v16  ;;  %v53_v51 = vld [vmem:[%s371_s1 + $0x128] sm:$0xff]  ;;  %v52_v52 = vld [vmem:[%s371_s1 + $0x120] sm:$0xff]  ;;  %v51_v53 = vld [vmem:[%s371_s1 + $0x118] sm:$0xff] }
  0x13   :  { %105 = vmatpush1.msra.mxu0 %v30_v17  ;;  %v50_v54 = vld [vmem:[%s371_s1 + $0x110] sm:$0xff]  ;;  %v49_v55 = vld [vmem:[%s371_s1 + $0x108] sm:$0xff]  ;;  %v48_v56 = vld [vmem:[%s371_s1 + $0x100] sm:$0xff] }
  0x14   :  { %106 = vmatprep.subr.mxu0 %v29_v18  ;;  %v14_v57 = vld [vmem:[%s372_s0] sm:$0xff] }
  0x15   :  { %107 = vmatpush1.msra.mxu0 %v28_v19  ;;  %v72_v61 = vld [vmem:[%s373_s2] sm:$0x3] }
  0x16   :  { %108 = vmatprep.subr.mxu0 %v27_v20  ;;  %v77_v63 = vrot.slane %v72_v61, %v76_v60  ;;  %v81_v0 = vrot.slane %v72_v61, %v80_v62 }
  0x17   :  { %109 = vmatpush1.msra.mxu0 %v26_v22 }
  0x18   :  { %110 = vmatprep.subr.mxu0 %v25_v23 }
  0x19   :  { %111 = vmatpush1.msra.mxu0 %v24_v24 }
  0x1a   :  { %112 = vmatprep.subr.mxu0 %v23_v25 }
  0x1b   :  { %113 = vmatpush1.msra.mxu0 %v22_v26 }
  0x1c   :  { %114 = vmatprep.subr.mxu0 %v21_v27 }
  0x1d   :  { %115 = vmatpush1.msra.mxu0 %v20_v28 }
  0x1e   :  { %116 = vmatprep.subr.mxu0 %v19_v29 }
  0x1f   :  { %117 = vmatpush1.msra.mxu0 %v18_v30 }
  0x20   :  { %118 = vmatprep.subr.mxu0 %v17_v31 }
  0x21   :  { %119 = vmatpush1.msra.mxu0 %v16_v32 }
  0x22   :  { %128 = vmatprep.subr.mxu0 %v71_v33 }
  0x23   :  { %129 = vmatpush2.msra.mxu0 %v70_v34 }
  0x24   :  { %130 = vmatprep.subr.mxu0 %v69_v35 }
  0x25   :  { %131 = vmatpush2.msra.mxu0 %v68_v36 }
  0x26   :  { %132 = vmatprep.subr.mxu0 %v67_v37 }
  0x27   :  { %133 = vmatpush2.msra.mxu0 %v66_v38 }
  0x28   :  { %134 = vmatprep.subr.mxu0 %v65_v39 }
  0x29   :  { %135 = vmatpush2.msra.mxu0 %v64_v40 }
  0x2a   :  { %136 = vmatprep.subr.mxu0 %v63_v41 }
  0x2b   :  { %137 = vmatpush2.msra.mxu0 %v62_v42 }
  0x2c   :  { %138 = vmatprep.subr.mxu0 %v61_v43 }
  0x2d   :  { %139 = vmatpush2.msra.mxu0 %v60_v44 }
  0x2e   :  { %140 = vmatprep.subr.mxu0 %v59_v45 }
  0x2f   :  { %141 = vmatpush2.msra.mxu0 %v58_v46 }
  0x30   :  { %142 = vmatprep.subr.mxu0 %v57_v47 }
  0x31   :  { %143 = vmatpush2.msra.mxu0 %v56_v48 }
  0x32   :  { %144 = vmatprep.subr.mxu0 %v55_v49 }
  0x33   :  { %145 = vmatpush2.msra.mxu0 %v54_v50 }
  0x34   :  { %146 = vmatprep.subr.mxu0 %v53_v51 }
  0x35   :  { %147 = vmatpush2.msra.mxu0 %v52_v52 }
  0x36   :  { %148 = vmatprep.subr.mxu0 %v51_v53 }
  0x37   :  { %149 = vmatpush2.msra.mxu0 %v50_v54 }
  0x38   :  { %150 = vmatprep.subr.mxu0 %v49_v55 }
  0x39   :  { %151 = vmatpush2.msra.mxu0 %v48_v56 }
  0x3a   :  { %153 = vmatmul.mubr.f32.vlgmr.msra.gmra.mxu0 %v14_v57 }
  0xfa   :  { %v154_v1 = vpop.f32.mrf.mxu0 }
  0xfb   :  { %v155_v2 = vadd.f32 %v154_v1, %v77_v63 }
  0xfc   :  { %v156_v3 = vpop.f32.mrf.mxu0 }
  0xfd   :  { %159 = vst [vmem:[%s374_s3] sm:$0xff] %v155_v2  ;;  %v157_v4 = vadd.f32 %v156_v3, %v81_v0 }
  0xff   :  { %160 = vst.msk [vmem:[%s374_s3 + $0x8] sm:$0xff] %vm84_vm0, %v157_v4 }

// kernel: model_forward.12
= control target key start
LH: loop header
LB: loop body
LE: loop exit
PB: predicated region body
PF: predicated region fallthrough
CT: control target
= control target key end

     0   :  { %v158_v3 = vmov 0.0   ;;  %vm41_vm0 = vcmask 195584   ;;  %v159_v12 = vmov 0   ;;  %vm135_vm1 = vcmask 261120   ;;  %s237_s1 = inlined_call_operand.vmem [shape: f32[24,160], index: 1, kind: input, shape index: {}]   ;;  %s238_s0 = inlined_call_operand.vmem [shape: f32[24,24], index: 0, kind: input, shape index: {}]   ;;  %s239_s2 = inlined_call_operand.vmem [shape: f32[24,1], index: 2, kind: input, shape index: {}]   ;;  %s240_s3 = inlined_call_operand.vmem [shape: f32[24,160], index: 3, kind: output, shape index: {}]  }
   0x1   :  { %v22_v0 = vld [vmem:[%s237_s1 + $0x28] sm:$0xff]  ;;  %v21_v1 = vld [vmem:[%s237_s1 + $0x20] sm:$0xff]  ;;  %v20_v2 = vld [vmem:[%s237_s1 + $0x18] sm:$0xff]  ;;  %115 = vmatprep.mubr.f32.mxu0 %v158_v3  ;;  %121 = vmatprep.mubr.f32.mxu1 %v158_v3 }
   0x2   :  { %77 = vmatprep.subr.mxu0 %v22_v0  ;;  %148 = vmatprep.subr.mxu1 %v22_v0  ;;  %v19_v4 = vld [vmem:[%s237_s1 + $0x10] sm:$0xff]  ;;  %v18_v5 = vld [vmem:[%s237_s1 + $0x8] sm:$0xff]  ;;  %v17_v6 = vld [vmem:[%s237_s1] sm:$0xff] }
   0x3   :  { %78 = vmatpush1.msra.mxu0 %v21_v1  ;;  %151 = vmatpush1.msra.mxu1 %v21_v1  ;;  %v14_v7 = vld [vmem:[%s238_s0] sm:$0xff]  ;;  %v15_v8 = vld [vmem:[%s238_s0 + $0x8] sm:$0xff]  ;;  %v25_v10 = vld [vmem:[%s239_s2 + $0x10] sm:$0xff] }
   0x4   :  { %79 = vmatprep.subr.mxu0 %v20_v2  ;;  %149 = vmatprep.subr.mxu1 %v20_v2  ;;  %v23_v9 = vld [vmem:[%s239_s2] sm:$0xff]  ;;  %v16_v11 = vld [vmem:[%s238_s0 + $0x10] sm:$0xff]  ;;  %v24_v13 = vld [vmem:[%s239_s2 + $0x8] sm:$0xff] }
   0x5   :  { %80 = vmatpush1.msra.mxu0 %v19_v4  ;;  %152 = vmatpush1.msra.mxu1 %v19_v4 }
   0x6   :  { %81 = vmatprep.subr.mxu0 %v18_v5  ;;  %150 = vmatprep.subr.mxu1 %v18_v5 }
   0x7   :  { %82 = vmatpush1.msra.mxu0 %v17_v6  ;;  %153 = vmatpush1.msra.mxu1 %v17_v6 }
   0x8   :  { %145 = vmatmul.mubr.msk.f32.vlgmr.msra.gmra.mxu0 %vm41_vm0, %v14_v7  ;;  %146 = vmatmul.mubr.msk.f32.vlgmr.msra.gmra.mxu1 %vm41_vm0, %v15_v8 }
   0x9   :  { %127 = vmatprep.mubr.f32.mxu1 %v158_v3  ;;  %156 = vset.pattern.permute.xlu0 %v159_v12 }
   0xa   :  { %28 = vperm.xlu0 %156, %v23_v9   ;;  %157 = vset.pattern.permute.xlu1 %v159_v12 }
   0xb   :  { %38 = vperm.xlu1 %157, %v25_v10  }
   0xc   :  { %147 = vmatmul.mubr.msk.f32.gmra.mxu1 %vm41_vm0, %v16_v11 }
   0xe   :  { %33 = vperm.xlu0 %156, %v24_v13  }
  0x85   :  { %v29_v14 = vpop.permute.xlu0 %28 }
  0x86   :  { %v39_v20 = vpop.permute.xlu1 %38 }
  0x89   :  { %v34_v15 = vpop.permute.xlu0 %33 }
  0xc8   :  { %v117_v16 = vpop.f32.mrf.mxu0  ;;  %v123_v17 = vpop.f32.mrf.mxu1 }
  0xc9   :  { %v118_v18 = vadd.f32 %v117_v16, %v29_v14  ;;  %v124_v19 = vadd.f32 %v123_v17, %v34_v15 }
  0xca   :  { %v119_v21 = vpop.f32.mrf.mxu0  ;;  %v125_v22 = vpop.f32.mrf.mxu1 }
  0xcb   :  { %134 = vst [vmem:[%s240_s3] sm:$0xff] %v118_v18  ;;  %137 = vst [vmem:[%s240_s3 + $0x10] sm:$0xff] %v124_v19  ;;  %v120_v23 = vadd.f32 %v119_v21, %v29_v14  ;;  %v126_v24 = vadd.f32 %v125_v22, %v34_v15 }
  0xcc   :  { %v129_v25 = vpop.f32.mrf.mxu1 }
  0xcd   :  { %136 = vst.msk [vmem:[%s240_s3 + $0x8] sm:$0xff] %vm135_vm1, %v120_v23  ;;  %138 = vst.msk [vmem:[%s240_s3 + $0x18] sm:$0xff] %vm135_vm1, %v126_v24  ;;  %v130_v26 = vadd.f32 %v129_v25, %v39_v20 }
  0xce   :  { %v131_v27 = vpop.f32.mrf.mxu1 }
  0xcf   :  { %139 = vst [vmem:[%s240_s3 + $0x20] sm:$0xff] %v130_v26  ;;  %v132_v28 = vadd.f32 %v131_v27, %v39_v20 }
  0xd1   :  { %140 = vst.msk [vmem:[%s240_s3 + $0x28] sm:$0xff] %vm135_vm1, %v132_v28 }

// kernel: model_forward.13
= control target key start
LH: loop header
LB: loop body
LE: loop exit
PB: predicated region body
PF: predicated region fallthrough
CT: control target
= control target key end

     0   :  { %s2042_s9 = smov 127   ;;  %s3781_s0 = inlined_call_operand.vmem [shape: f32[16,336], index: 0, kind: input, shape index: {}]   ;;  %s3782_s1 = inlined_call_operand.vmem [shape: f32[16,1], index: 1, kind: input, shape index: {}]   ;;  %s3783_s2 = inlined_call_operand.vmem [shape: f32[8,8], index: 2, kind: input, shape index: {}]   ;;  %s3784_s3 = inlined_call_operand.vmem [shape: f32[8,1], index: 3, kind: input, shape index: {}]   ;;  %s3785_s4 = inlined_call_operand.vmem [shape: f32[8,8], index: 4, kind: input, shape index: {}]   ;;  %s3786_s5 = inlined_call_operand.vmem [shape: f32[8,1], index: 5, kind: input, shape index: {}]   ;;  %s3787_s6 = inlined_call_operand.vmem [shape: f32[112,176], index: 6, kind: input, shape index: {}]   ;;  %s3788_s7 = inlined_call_operand.hbm [shape: f32[8,128], index: 7, kind: output, shape index: {0}]   ;;  %s3789_s8 = inlined_call_operand.vmem [shape: f32[8,32], index: 8, kind: output, shape index: {1}]  }
   0x1   :  { %v2111_v0 = vld [vmem:[%s3787_s6 + $0x20] sm:$0xff]  ;;  %v2125_v2 = vld [vmem:[%s3787_s6 + $0x30] sm:$0xff] }
   0x2   :  { %v2116_v1 = vld [vmem:[%s3787_s6] sm:$0xff]  ;;  %75 = vrot.lane.b32.xlu1 %v2111_v0, %s2042_s9  ;;  %v2130_v3 = vld [vmem:[%s3787_s6 + $0x10] sm:$0xff] }
   0x3   :  { %71 = vrot.lane.b32.xlu0 %v2116_v1, %s2042_s9  ;;  %v2139_v4 = vld [vmem:[%s3787_s6 + $0x50] sm:$0xff]  ;;  %v2144_v5 = vld [vmem:[%s3787_s6 + $0x40] sm:$0xff] }
   0x4   :  { %v2153_v6 = vld [vmem:[%s3787_s6 + $0x70] sm:$0xff]  ;;  %v2158_v7 = vld [vmem:[%s3787_s6 + $0x60] sm:$0xff] }
   0x6   :  { %77 = vrot.lane.b32.xlu1 %v2125_v2, %s2042_s9 }
   0x7   :  { %73 = vrot.lane.b32.xlu0 %v2130_v3, %s2042_s9 }
   0xa   :  { %81 = vrot.lane.b32.xlu1 %v2139_v4, %s2042_s9 }
   0xb   :  { %79 = vrot.lane.b32.xlu0 %v2144_v5, %s2042_s9 }
   0xc   :  { %14 = vsyncpa [#allocation3], 0  ;;  %v2167_v8 = vld [vmem:[%s3787_s6 + $0x90] sm:$0xff]  ;;  %v2172_v9 = vld [vmem:[%s3787_s6 + $0x80] sm:$0xff]  ;;  %s2043_s13 = smov 126   ;;  %s2046_s22 = smov 120  }
   0xd   :  { %v2181_v10 = vld [vmem:[%s3787_s6 + $0xb0] sm:$0xff]  ;;  %v2186_v11 = vld [vmem:[%s3787_s6 + $0xa0] sm:$0xff]  ;;  %v2237_v14 = vld [vmem:[%s3787_s6 + $0x18] sm:$0xff]  ;;  %vm197_vm0 = vcmask 1039360   ;;  %s2047_s23 = smov 118   ;;  %s2048_s24 = smov 116  }
   0xe   :  { %85 = vrot.lane.b32.xlu1 %v2153_v6, %s2042_s9  ;;  %v2195_v12 = vld [vmem:[%s3787_s6 + $0xd0] sm:$0xff]  ;;  %v2200_v13 = vld [vmem:[%s3787_s6 + $0xc0] sm:$0xff]  ;;  %v2242_v15 = vld [vmem:[%s3787_s6 + $0x8] sm:$0xff]  ;;  %s2049_s25 = smov 114   ;;  %vm1222_vm1 = vcmask 162816   ;;  %vm1265_vm2 = vcmask 326656  }
   0xf   :  { %83 = vrot.lane.b32.xlu0 %v2158_v7, %s2042_s9  ;;  %v2251_v16 = vld [vmem:[%s3787_s6 + $0x38] sm:$0xff]  ;;  %v2256_v17 = vld [vmem:[%s3787_s6 + $0x28] sm:$0xff]  ;;  %vm885_vm3 = vcmask 965632   ;;  %vm1308_vm4 = vcmask 490496   ;;  %vm1351_vm5 = vcmask 654336   ;;  %vm1480_vm6 = vcmask 97280  }
  0x10   :  { %v2265_v18 = vld [vmem:[%s3787_s6 + $0x58] sm:$0xff]  ;;  %v2270_v19 = vld [vmem:[%s3787_s6 + $0x48] sm:$0xff]  ;;  %vm1394_vm7 = vcmask 818176   ;;  %vm1437_vm8 = vcmask 982016   ;;  %vm240_vm9 = vcmask 1031168   ;;  %vm1724_vm10 = vcmask 64512  }
  0x11   :  { %v2279_v20 = vld [vmem:[%s3787_s6 + $0x78] sm:$0xff]  ;;  %v2284_v21 = vld [vmem:[%s3787_s6 + $0x68] sm:$0xff]  ;;  %s2054_s18 = smov 80   ;;  %s2056_s19 = smov 104   ;;  %vm1907_vm11 = vcmask 130048   ;;  %vm1909_vm12 = vcmask 261120  }
  0x12   :  { %89 = vrot.lane.b32.xlu1 %v2167_v8, %s2042_s9  ;;  %v2293_v22 = vld [vmem:[%s3787_s6 + $0x98] sm:$0xff]  ;;  %v2298_v23 = vld [vmem:[%s3787_s6 + $0x88] sm:$0xff]  ;;  %s2057_s20 = smov 108   ;;  %s2060_s21 = smov 32   ;;  %vm1911_vm13 = vcmask 392192   ;;  %vm1901_vm14 = vcmask 850944  }
  0x13   :  { %87 = vrot.lane.b32.xlu0 %v2172_v9, %s2042_s9  ;;  %v2307_v24 = vld [vmem:[%s3787_s6 + $0xb8] sm:$0xff]  ;;  %v2312_v25 = vld [vmem:[%s3787_s6 + $0xa8] sm:$0xff]  ;;  %vm1913_vm15 = vcmask 523264  }
  0x14   :  { %v2321_v26 = vld [vmem:[%s3787_s6 + $0xd8] sm:$0xff]  ;;  %v2326_v27 = vld [vmem:[%s3787_s6 + $0xc8] sm:$0xff] }
  0x16   :  { %93 = vrot.lane.b32.xlu1 %v2181_v10, %s2042_s9 }
  0x17   :  { %91 = vrot.lane.b32.xlu0 %v2186_v11, %s2042_s9 }
  0x1a   :  { %97 = vrot.lane.b32.xlu1 %v2195_v12, %s2042_s9 }
  0x1b   :  { %95 = vrot.lane.b32.xlu0 %v2200_v13, %s2042_s9 }
  0x1e   :  { %115 = vrot.lane.b32.xlu1 %v2130_v3, %s2043_s13 }
  0x1f   :  { %113 = vrot.lane.b32.xlu0 %v2116_v1, %s2043_s13 }
  0x22   :  { %119 = vrot.lane.b32.xlu1 %v2125_v2, %s2043_s13 }
  0x23   :  { %117 = vrot.lane.b32.xlu0 %v2111_v0, %s2043_s13 }
  0x26   :  { %123 = vrot.lane.b32.xlu1 %v2139_v4, %s2043_s13 }
  0x27   :  { %121 = vrot.lane.b32.xlu0 %v2144_v5, %s2043_s13 }
  0x2a   :  { %127 = vrot.lane.b32.xlu1 %v2153_v6, %s2043_s13 }
  0x2b   :  { %125 = vrot.lane.b32.xlu0 %v2158_v7, %s2043_s13 }
  0x2e   :  { %131 = vrot.lane.b32.xlu1 %v2167_v8, %s2043_s13 }
  0x2f   :  { %129 = vrot.lane.b32.xlu0 %v2172_v9, %s2043_s13 }
  0x32   :  { %135 = vrot.lane.b32.xlu1 %v2181_v10, %s2043_s13 }
  0x33   :  { %133 = vrot.lane.b32.xlu0 %v2186_v11, %s2043_s13 }
  0x36   :  { %139 = vrot.lane.b32.xlu1 %v2195_v12, %s2043_s13 }
  0x37   :  { %137 = vrot.lane.b32.xlu0 %v2200_v13, %s2043_s13 }
  0x3a   :  { %171 = vrot.lane.b32.xlu1 %v2237_v14, %s2042_s9 }
  0x3b   :  { %169 = vrot.lane.b32.xlu0 %v2242_v15, %s2042_s9 }
  0x3e   :  { %175 = vrot.lane.b32.xlu1 %v2251_v16, %s2042_s9 }
  0x3f   :  { %173 = vrot.lane.b32.xlu0 %v2256_v17, %s2042_s9 }
  0x42   :  { %179 = vrot.lane.b32.xlu1 %v2265_v18, %s2042_s9 }
  0x43   :  { %177 = vrot.lane.b32.xlu0 %v2270_v19, %s2042_s9 }
  0x46   :  { %183 = vrot.lane.b32.xlu1 %v2279_v20, %s2042_s9 }
  0x47   :  { %181 = vrot.lane.b32.xlu0 %v2284_v21, %s2042_s9 }
  0x4a   :  { %187 = vrot.lane.b32.xlu1 %v2293_v22, %s2042_s9 }
  0x4b   :  { %185 = vrot.lane.b32.xlu0 %v2298_v23, %s2042_s9 }
  0x4e   :  { %191 = vrot.lane.b32.xlu1 %v2307_v24, %s2042_s9 }
  0x4f   :  { %189 = vrot.lane.b32.xlu0 %v2312_v25, %s2042_s9 }
  0x52   :  { %195 = vrot.lane.b32.xlu1 %v2321_v26, %s2042_s9 }
  0x53   :  { %193 = vrot.lane.b32.xlu0 %v2326_v27, %s2042_s9  ;;  %s2044_s9 = smov 124  }
  0x56   :  { %214 = vrot.lane.b32.xlu1 %v2237_v14, %s2043_s13 }
  0x57   :  { %212 = vrot.lane.b32.xlu0 %v2242_v15, %s2043_s13 }
  0x5a   :  { %218 = vrot.lane.b32.xlu1 %v2251_v16, %s2043_s13 }
  0x5b   :  { %216 = vrot.lane.b32.xlu0 %v2256_v17, %s2043_s13 }
  0x5e   :  { %222 = vrot.lane.b32.xlu1 %v2265_v18, %s2043_s13 }
  0x5f   :  { %220 = vrot.lane.b32.xlu0 %v2270_v19, %s2043_s13 }
  0x62   :  { %226 = vrot.lane.b32.xlu1 %v2279_v20, %s2043_s13 }
  0x63   :  { %224 = vrot.lane.b32.xlu0 %v2284_v21, %s2043_s13 }
  0x66   :  { %230 = vrot.lane.b32.xlu1 %v2293_v22, %s2043_s13 }
  0x67   :  { %228 = vrot.lane.b32.xlu0 %v2298_v23, %s2043_s13 }
  0x6a   :  { %234 = vrot.lane.b32.xlu1 %v2307_v24, %s2043_s13 }
  0x6b   :  { %232 = vrot.lane.b32.xlu0 %v2312_v25, %s2043_s13 }
  0x6e   :  { %238 = vrot.lane.b32.xlu1 %v2321_v26, %s2043_s13 }
  0x6f   :  { %236 = vrot.lane.b32.xlu0 %v2326_v27, %s2043_s13 }
  0x74   :  { %v2360_v28 = vpop.permute.xlu1 %75 }
  0x75   :  { %3826 = vst [vmem:[#allocation5_spill] sm:$0xff] %v2360_v28  ;;  %v2362_v29 = vpop.permute.xlu0 %71 }
  0x76   :  { %255 = vrot.lane.b32.xlu0 %v2362_v29, %s2043_s13 }
  0x78   :  { %v2366_v30 = vpop.permute.xlu1 %77 }
  0x79   :  { %3827 = vst [vmem:[#allocation6_spill] sm:$0xff] %v2366_v30  ;;  %v2368_v31 = vpop.permute.xlu0 %73 }
  0x7a   :  { %259 = vrot.lane.b32.xlu0 %v2360_v28, %s2043_s13  ;;  %257 = vrot.lane.b32.xlu1 %v2368_v31, %s2043_s13 }
  0x7c   :  { %v2374_v32 = vpop.permute.xlu1 %81 }
  0x7d   :  { %3828 = vst [vmem:[#allocation7_spill] sm:$0xff] %v2374_v32  ;;  %v2376_v33 = vpop.permute.xlu0 %79 }
  0x7e   :  { %3829 = vst [vmem:[#allocation8_spill] sm:$0xff] %v2376_v33  ;;  %261 = vrot.lane.b32.xlu1 %v2366_v30, %s2043_s13  ;;  %263 = vrot.lane.b32.xlu0 %v2376_v33, %s2043_s13 }
  0x80   :  { %v2382_v34 = vpop.permute.xlu1 %85 }
  0x81   :  { %3830 = vst [vmem:[#allocation9_spill] sm:$0xff] %v2382_v34  ;;  %v2384_v35 = vpop.permute.xlu0 %83 }
  0x82   :  { %3831 = vst [vmem:[#allocation10_spill] sm:$0xff] %v2384_v35  ;;  %265 = vrot.lane.b32.xlu1 %v2374_v32, %s2043_s13  ;;  %267 = vrot.lane.b32.xlu0 %v2384_v35, %s2043_s13 }
  0x84   :  { %v2390_v36 = vpop.permute.xlu1 %89 }
  0x85   :  { %3832 = vst [vmem:[#allocation11_spill] sm:$0xff] %v2390_v36  ;;  %v2392_v37 = vpop.permute.xlu0 %87 }
  0x86   :  { %3833 = vst [vmem:[#allocation12_spill] sm:$0xff] %v2392_v37  ;;  %269 = vrot.lane.b32.xlu1 %v2382_v34, %s2043_s13  ;;  %271 = vrot.lane.b32.xlu0 %v2392_v37, %s2043_s13 }
  0x88   :  { %v2398_v38 = vpop.permute.xlu1 %93 }
  0x89   :  { %v2400_v39 = vpop.permute.xlu0 %91 }
  0x8a   :  { %273 = vrot.lane.b32.xlu1 %v2390_v36, %s2043_s13  ;;  %275 = vrot.lane.b32.xlu0 %v2400_v39, %s2043_s13 }
  0x8c   :  { %v2406_v40 = vpop.permute.xlu1 %97 }
  0x8d   :  { %v2408_v41 = vpop.permute.xlu0 %95 }
  0x8e   :  { %277 = vrot.lane.b32.xlu1 %v2398_v38, %s2043_s13  ;;  %279 = vrot.lane.b32.xlu0 %v2408_v41, %s2043_s13 }
  0x90   :  { %v2414_v42 = vpop.permute.xlu1 %115 }
  0x91   :  { %v2416_v43 = vpop.permute.xlu0 %113 }
  0x92   :  { %281 = vrot.lane.b32.xlu1 %v2406_v40, %s2043_s13  ;;  %283 = vrot.lane.b32.xlu0 %v2416_v43, %s2043_s13 }
  0x94   :  { %v2422_v44 = vpop.permute.xlu1 %119 }
  0x95   :  { %v2424_v45 = vpop.permute.xlu0 %117 }
  0x96   :  { %285 = vrot.lane.b32.xlu1 %v2414_v42, %s2043_s13  ;;  %287 = vrot.lane.b32.xlu0 %v2424_v45, %s2043_s13 }
  0x98   :  { %v2430_v46 = vpop.permute.xlu1 %123 }
  0x99   :  { %v2432_v47 = vpop.permute.xlu0 %121 }
  0x9a   :  { %289 = vrot.lane.b32.xlu1 %v2422_v44, %s2043_s13  ;;  %291 = vrot.lane.b32.xlu0 %v2432_v47, %s2043_s13 }
  0x9c   :  { %v2438_v48 = vpop.permute.xlu1 %127 }
  0x9d   :  { %v2440_v49 = vpop.permute.xlu0 %125 }
  0x9e   :  { %293 = vrot.lane.b32.xlu1 %v2430_v46, %s2043_s13  ;;  %295 = vrot.lane.b32.xlu0 %v2440_v49, %s2043_s13 }
  0xa0   :  { %v2446_v50 = vpop.permute.xlu1 %131 }
  0xa1   :  { %v2448_v51 = vpop.permute.xlu0 %129 }
  0xa2   :  { %297 = vrot.lane.b32.xlu1 %v2438_v48, %s2043_s13  ;;  %299 = vrot.lane.b32.xlu0 %v2448_v51, %s2043_s13 }
  0xa4   :  { %v2454_v52 = vpop.permute.xlu1 %135 }
  0xa5   :  { %v2456_v53 = vpop.permute.xlu0 %133 }
  0xa6   :  { %301 = vrot.lane.b32.xlu1 %v2446_v50, %s2043_s13  ;;  %303 = vrot.lane.b32.xlu0 %v2456_v53, %s2043_s13 }
  0xa8   :  { %v2462_v54 = vpop.permute.xlu1 %139 }
  0xa9   :  { %v2464_v55 = vpop.permute.xlu0 %137 }
  0xaa   :  { %305 = vrot.lane.b32.xlu1 %v2454_v52, %s2043_s13  ;;  %307 = vrot.lane.b32.xlu0 %v2464_v55, %s2043_s13 }
  0xac   :  { %v172_v56 = vpop.permute.xlu1 %171 }
  0xad   :  { %v170_v57 = vpop.permute.xlu0 %169  ;;  %v199_v28 = vsel %vm197_vm0, %v2368_v31, %v172_v56 }
  0xae   :  { %309 = vrot.lane.b32.xlu1 %v2462_v54, %s2043_s13  ;;  %339 = vrot.lane.b32.xlu0 %v2116_v1, %s2044_s9  ;;  %s2045_s13 = smov 122   ;;  %v198_v32 = vsel %vm197_vm0, %v2362_v29, %v170_v57 }
  0xb0   :  { %v2474_v58 = vpop.permute.xlu1 %175 }
  0xb1   :  { %3834 = vst [vmem:[#allocation13_spill] sm:$0xff] %v2474_v58  ;;  %v2476_v59 = vpop.permute.xlu0 %173 }
  0xb2   :  { %3835 = vst [vmem:[#allocation14_spill] sm:$0xff] %v2476_v59  ;;  %341 = vrot.lane.b32.xlu1 %v2130_v3, %s2044_s9  ;;  %343 = vrot.lane.b32.xlu0 %v2111_v0, %s2044_s9 }
  0xb4   :  { %v2482_v60 = vpop.permute.xlu1 %179 }
  0xb5   :  { %3836 = vst [vmem:[#allocation15_spill] sm:$0xff] %v2482_v60  ;;  %v2484_v61 = vpop.permute.xlu0 %177 }
  0xb6   :  { %3837 = vst [vmem:[#allocation16_spill] sm:$0xff] %v2484_v61  ;;  %369 = vrot.lane.b32.xlu1 %v2368_v31, %s2044_s9  ;;  %495 = vrot.lane.b32.xlu0 %v2368_v31, %s2045_s13 }
  0xb8   :  { %v2490_v62 = vpop.permute.xlu1 %183 }
  0xb9   :  { %3838 = vst [vmem:[#allocation17_spill] sm:$0xff] %v2490_v62  ;;  %v2492_v63 = vpop.permute.xlu0 %181 }
  0xba   :  { %3839 = vst [vmem:[#allocation18_spill] sm:$0xff] %v2492_v63  ;;  %367 = vrot.lane.b32.xlu1 %v2362_v29, %s2044_s9  ;;  %621 = vrot.lane.b32.xlu0 %v2368_v31, %s2046_s22 }
  0xbc   :  { %v2498_v59 = vpop.permute.xlu1 %187 }
  0xbd   :  { %3840 = vst [vmem:[#allocation19_spill] sm:$0xff] %v2498_v59  ;;  %v2500_v58 = vpop.permute.xlu0 %185 }
  0xbe   :  { %3841 = vst [vmem:[#allocation20_spill] sm:$0xff] %v2500_v58  ;;  %777 = vrot.lane.b32.xlu1 %v199_v28, %s2047_s23  ;;  %779 = vrot.lane.b32.xlu0 %v172_v56, %s2047_s23 }
  0xc0   :  { %v2506_v61 = vpop.permute.xlu1 %191 }
  0xc1   :  { %3842 = vst [vmem:[#allocation21_spill] sm:$0xff] %v2506_v61  ;;  %v2508_v30 = vpop.permute.xlu0 %189 }
  0xc2   :  { %3843 = vst [vmem:[#allocation22_spill] sm:$0xff] %v2508_v30  ;;  %493 = vrot.lane.b32.xlu1 %v2362_v29, %s2045_s13  ;;  %1000 = vrot.lane.b32.xlu0 %v172_v56, %s2048_s24 }
  0xc4   :  { %v2513_v60 = vpop.permute.xlu1 %195 }
  0xc5   :  { %v2515_v33 = vpop.permute.xlu0 %193 }
  0xc6   :  { %1126 = vrot.lane.b32.xlu1 %v172_v56, %s2049_s25  ;;  %365 = vrot.lane.b32.xlu0 %v2195_v12, %s2044_s9 }
  0xc8   :  { %v2520_v28 = vpop.permute.xlu1 %214 }
  0xc9   :  { %v2522_v63 = vpop.permute.xlu0 %212 }
  0xca   :  { %619 = vrot.lane.b32.xlu1 %v2362_v29, %s2046_s22  ;;  %773 = vrot.lane.b32.xlu0 %v198_v32, %s2047_s23 }
  0xcc   :  { %v2529_v62 = vpop.permute.xlu1 %218 }
  0xcd   :  { %v2531_v35 = vpop.permute.xlu0 %216 }
  0xce   :  { %491 = vrot.lane.b32.xlu0 %v2195_v12, %s2045_s13  ;;  %775 = vrot.lane.b32.xlu1 %v170_v57, %s2047_s23 }
  0xd0   :  { %v2536_v56 = vpop.permute.xlu1 %222 }
  0xd1   :  { %3844 = vst [vmem:[#allocation23_spill] sm:$0xff] %v2536_v56  ;;  %v2538_v58 = vpop.permute.xlu0 %220 }
  0xd2   :  { %3845 = vst [vmem:[#allocation24_spill] sm:$0xff] %v2538_v58  ;;  %1124 = vrot.lane.b32.xlu0 %v170_v57, %s2049_s25  ;;  %998 = vrot.lane.b32.xlu1 %v170_v57, %s2048_s24 }
  0xd4   :  { %v2544_v32 = vpop.permute.xlu1 %226 }
  0xd5   :  { %v2542_v34 = vpop.permute.xlu0 %224  ;;  %3847 = vst [vmem:[#allocation26_spill] sm:$0xff] %v2544_v32 }
  0xd6   :  { %3846 = vst [vmem:[#allocation25_spill] sm:$0xff] %v2542_v34  ;;  %617 = vrot.lane.b32.xlu0 %v2195_v12, %s2046_s22  ;;  %363 = vrot.lane.b32.xlu1 %v2200_v13, %s2044_s9 }
  0xd8   :  { %v2556_v58 = vpop.permute.xlu1 %230 }
  0xd9   :  { %v2550_v59 = vpop.permute.xlu0 %228  ;;  %3849 = vst [vmem:[#allocation28_spill] sm:$0xff] %v2556_v58 }
  0xda   :  { %3848 = vst [vmem:[#allocation27_spill] sm:$0xff] %v2550_v59  ;;  %771 = vrot.lane.b32.xlu0 %v2321_v26, %s2047_s23  ;;  %769 = vrot.lane.b32.xlu1 %v2195_v12, %s2047_s23 }
  0xdc   :  { %v2564_v56 = vpop.permute.xlu1 %234 }
  0xdd   :  { %v2558_v57 = vpop.permute.xlu0 %232  ;;  %3851 = vst [vmem:[#allocation30_spill] sm:$0xff] %v2564_v56 }
  0xde   :  { %3850 = vst [vmem:[#allocation29_spill] sm:$0xff] %v2558_v57  ;;  %996 = vrot.lane.b32.xlu0 %v2321_v26, %s2048_s24  ;;  %489 = vrot.lane.b32.xlu1 %v2200_v13, %s2045_s13 }
  0xe0   :  { %v2576_v32 = vpop.permute.xlu1 %238 }
  0xe1   :  { %v2570_v34 = vpop.permute.xlu0 %236  ;;  %3853 = vst [vmem:[#allocation32_spill] sm:$0xff] %v2576_v32 }
  0xe2   :  { %361 = vrot.lane.b32.xlu0 %v2181_v10, %s2044_s9  ;;  %1122 = vrot.lane.b32.xlu1 %v2321_v26, %s2049_s25  ;;  %3852 = vst [vmem:[#allocation31_spill] sm:$0xff] %v2570_v34 }
  0xe6   :  { %765 = vrot.lane.b32.xlu0 %v2200_v13, %s2047_s23  ;;  %615 = vrot.lane.b32.xlu1 %v2200_v13, %s2046_s22 }
  0xe8   :  { %v2578_v59 = vpop.permute.xlu0 %255 }
  0xea   :  { %487 = vrot.lane.b32.xlu0 %v2181_v10, %s2045_s13  ;;  %767 = vrot.lane.b32.xlu1 %v2326_v27, %s2047_s23 }
  0xec   :  { %v2584_v58 = vpop.permute.xlu1 %257  ;;  %v2586_v26 = vpop.permute.xlu0 %259 }
  0xed   :  { %3854 = vst [vmem:[#allocation33_spill] sm:$0xff] %v2586_v26 }
  0xee   :  { %1120 = vrot.lane.b32.xlu0 %v2326_v27, %s2049_s25  ;;  %994 = vrot.lane.b32.xlu1 %v2326_v27, %s2048_s24 }
  0xf0   :  { %v2592_v57 = vpop.permute.xlu1 %261  ;;  %v2594_v56 = vpop.permute.xlu0 %263 }
  0xf1   :  { %3855 = vst [vmem:[#allocation34_spill] sm:$0xff] %v2592_v57  ;;  %3856 = vst [vmem:[#allocation35_spill] sm:$0xff] %v2594_v56 }
  0xf2   :  { %613 = vrot.lane.b32.xlu0 %v2181_v10, %s2046_s22  ;;  %359 = vrot.lane.b32.xlu1 %v2186_v11, %s2044_s9 }
  0xf4   :  { %v2600_v34 = vpop.permute.xlu1 %265  ;;  %v2602_v37 = vpop.permute.xlu0 %267 }
  0xf5   :  { %3857 = vst [vmem:[#allocation36_spill] sm:$0xff] %v2600_v34  ;;  %3858 = vst [vmem:[#allocation37_spill] sm:$0xff] %v2602_v37 }
  0xf6   :  { %763 = vrot.lane.b32.xlu0 %v2307_v24, %s2047_s23  ;;  %761 = vrot.lane.b32.xlu1 %v2181_v10, %s2047_s23 }
  0xf8   :  { %v2608_v27 = vpop.permute.xlu1 %269  ;;  %v2610_v26 = vpop.permute.xlu0 %271 }
  0xf9   :  { %3859 = vst [vmem:[#allocation38_spill] sm:$0xff] %v2608_v27  ;;  %3860 = vst [vmem:[#allocation39_spill] sm:$0xff] %v2610_v26 }
  0xfa   :  { %992 = vrot.lane.b32.xlu0 %v2307_v24, %s2048_s24  ;;  %485 = vrot.lane.b32.xlu1 %v2186_v11, %s2045_s13 }
  0xfc   :  { %v2616_v57 = vpop.permute.xlu1 %273  ;;  %v2618_v56 = vpop.permute.xlu0 %275 }
  0xfd   :  { %3861 = vst [vmem:[#allocation40_spill] sm:$0xff] %v2616_v57  ;;  %3862 = vst [vmem:[#allocation41_spill] sm:$0xff] %v2618_v56 }
  0xfe   :  { %357 = vrot.lane.b32.xlu0 %v2167_v8, %s2044_s9  ;;  %1118 = vrot.lane.b32.xlu1 %v2307_v24, %s2049_s25 }
 0x100   :  { %v2624_v34 = vpop.permute.xlu1 %277  ;;  %v2626_v37 = vpop.permute.xlu0 %279 }
 0x101   :  { %3863 = vst [vmem:[#allocation42_spill] sm:$0xff] %v2624_v34  ;;  %3864 = vst [vmem:[#allocation43_spill] sm:$0xff] %v2626_v37 }
 0x102   :  { %757 = vrot.lane.b32.xlu0 %v2186_v11, %s2047_s23  ;;  %611 = vrot.lane.b32.xlu1 %v2186_v11, %s2046_s22 }
 0x104   :  { %v2632_v27 = vpop.permute.xlu1 %281  ;;  %v2634_v26 = vpop.permute.xlu0 %283 }
 0x105   :  { %3865 = vst [vmem:[#allocation44_spill] sm:$0xff] %v2632_v27  ;;  %3866 = vst [vmem:[#allocation45_spill] sm:$0xff] %v2634_v26 }
 0x106   :  { %759 = vrot.lane.b32.xlu1 %v2312_v25, %s2047_s23  ;;  %483 = vrot.lane.b32.xlu0 %v2167_v8, %s2045_s13 }
 0x108   :  { %v2640_v24 = vpop.permute.xlu1 %285  ;;  %v2642_v57 = vpop.permute.xlu0 %287 }
 0x109   :  { %3867 = vst [vmem:[#allocation46_spill] sm:$0xff] %v2640_v24  ;;  %3868 = vst [vmem:[#allocation47_spill] sm:$0xff] %v2642_v57 }
 0x10a   :  { %990 = vrot.lane.b32.xlu1 %v2312_v25, %s2048_s24  ;;  %1116 = vrot.lane.b32.xlu0 %v2312_v25, %s2049_s25 }
 0x10c   :  { %v2648_v56 = vpop.permute.xlu1 %289  ;;  %v2650_v34 = vpop.permute.xlu0 %291 }
 0x10d   :  { %3869 = vst [vmem:[#allocation48_spill] sm:$0xff] %v2648_v56  ;;  %3870 = vst [vmem:[#allocation49_spill] sm:$0xff] %v2650_v34 }
 0x10e   :  { %355 = vrot.lane.b32.xlu1 %v2172_v9, %s2044_s9  ;;  %609 = vrot.lane.b32.xlu0 %v2167_v8, %s2046_s22 }
 0x110   :  { %v2656_v37 = vpop.permute.xlu1 %293  ;;  %v2658_v27 = vpop.permute.xlu0 %295 }
 0x111   :  { %3871 = vst [vmem:[#allocation50_spill] sm:$0xff] %v2656_v37  ;;  %3872 = vst [vmem:[#allocation51_spill] sm:$0xff] %v2658_v27 }
 0x112   :  { %753 = vrot.lane.b32.xlu1 %v2167_v8, %s2047_s23  ;;  %755 = vrot.lane.b32.xlu0 %v2293_v22, %s2047_s23 }
 0x114   :  { %v2664_v25 = vpop.permute.xlu1 %297  ;;  %v2666_v26 = vpop.permute.xlu0 %299 }
 0x115   :  { %3873 = vst [vmem:[#allocation52_spill] sm:$0xff] %v2664_v25  ;;  %3874 = vst [vmem:[#allocation53_spill] sm:$0xff] %v2666_v26 }
 0x116   :  { %481 = vrot.lane.b32.xlu1 %v2172_v9, %s2045_s13  ;;  %988 = vrot.lane.b32.xlu0 %v2293_v22, %s2048_s24 }
 0x118   :  { %v2672_v34 = vpop.permute.xlu1 %301  ;;  %v2674_v37 = vpop.permute.xlu0 %303 }
 0x119   :  { %3875 = vst [vmem:[#allocation54_spill] sm:$0xff] %v2672_v34  ;;  %3876 = vst [vmem:[#allocation55_spill] sm:$0xff] %v2674_v37 }
 0x11a   :  { %1114 = vrot.lane.b32.xlu1 %v2293_v22, %s2049_s25  ;;  %353 = vrot.lane.b32.xlu0 %v2153_v6, %s2044_s9 }
 0x11c   :  { %v2680_v27 = vpop.permute.xlu1 %305  ;;  %v2682_v25 = vpop.permute.xlu0 %307 }
 0x11d   :  { %3877 = vst [vmem:[#allocation56_spill] sm:$0xff] %v2680_v27  ;;  %3878 = vst [vmem:[#allocation57_spill] sm:$0xff] %v2682_v25 }
 0x11e   :  { %607 = vrot.lane.b32.xlu1 %v2172_v9, %s2046_s22  ;;  %749 = vrot.lane.b32.xlu0 %v2172_v9, %s2047_s23 }
 0x120   :  { %v2688_v26 = vpop.permute.xlu1 %309  ;;  %v2690_v34 = vpop.permute.xlu0 %339 }
 0x121   :  { %3879 = vst [vmem:[#allocation58_spill] sm:$0xff] %v2688_v26  ;;  %3880 = vst [vmem:[#allocation59_spill] sm:$0xff] %v2690_v34 }
 0x122   :  { %751 = vrot.lane.b32.xlu1 %v2298_v23, %s2047_s23  ;;  %479 = vrot.lane.b32.xlu0 %v2153_v6, %s2045_s13 }
 0x124   :  { %v2696_v22 = vpop.permute.xlu1 %341  ;;  %v2698_v37 = vpop.permute.xlu0 %343 }
 0x125   :  { %3881 = vst [vmem:[#allocation60_spill] sm:$0xff] %v2696_v22 }
 0x126   :  { %986 = vrot.lane.b32.xlu1 %v2298_v23, %s2048_s24  ;;  %1112 = vrot.lane.b32.xlu0 %v2298_v23, %s2049_s25  ;;  %v1238_v23 = vsel %vm1222_vm1, %v2368_v31, %v2584_v58 }
 0x128   :  { %v370_v27 = vpop.permute.xlu1 %369  ;;  %v496_v25 = vpop.permute.xlu0 %495 }
 0x129   :  { %v1281_v30 = vsel %vm1265_vm2, %v1238_v23, %v370_v27 }
 0x12a   :  { %351 = vrot.lane.b32.xlu1 %v2158_v7, %s2044_s9  ;;  %605 = vrot.lane.b32.xlu0 %v2153_v6, %s2046_s22  ;;  %v1324_v31 = vsel %vm1308_vm4, %v1281_v30, %v496_v25 }
 0x12c   :  { %v368_v26 = vpop.permute.xlu1 %367  ;;  %v622_v24 = vpop.permute.xlu0 %621 }
 0x12d   :  { %v1367_v61 = vsel %vm1351_vm5, %v1324_v31, %v622_v24  ;;  %v1237_v24 = vsel %vm1222_vm1, %v2362_v29, %v2578_v59 }
 0x12e   :  { %745 = vrot.lane.b32.xlu1 %v2153_v6, %s2047_s23  ;;  %747 = vrot.lane.b32.xlu0 %v2279_v20, %s2047_s23 }
 0x130   :  { %v778_v57 = vpop.permute.xlu1 %777  ;;  %v780_v56 = vpop.permute.xlu0 %779 }
 0x131   :  { %v901_v36 = vsel %vm885_vm3, %v778_v57, %v780_v56 }
 0x132   :  { %477 = vrot.lane.b32.xlu1 %v2158_v7, %s2045_s13  ;;  %984 = vrot.lane.b32.xlu0 %v2279_v20, %s2048_s24 }
 0x134   :  { %v494_v32 = vpop.permute.xlu1 %493  ;;  %v1001_v34 = vpop.permute.xlu0 %1000 }
 0x136   :  { %1110 = vrot.lane.b32.xlu1 %v2279_v20, %s2049_s25  ;;  %349 = vrot.lane.b32.xlu0 %v2139_v4, %s2044_s9  ;;  %v1410_v20 = vsel %vm1394_vm7, %v1367_v61, %v901_v36  ;;  %v1280_v36 = vsel %vm1265_vm2, %v1237_v24, %v368_v26  ;;  %v1236_v24 = vsel %vm1222_vm1, %v2195_v12, %v2462_v54 }
 0x137   :  { %v1453_v56 = vsel %vm1437_vm8, %v1410_v20, %v1001_v34 }
 0x138   :  { %v1127_v58 = vpop.permute.xlu1 %1126  ;;  %v366_v22 = vpop.permute.xlu0 %365 }
 0x139   :  { %v1496_v27 = vsel %vm1480_vm6, %v1001_v34, %v1127_v58  ;;  %v1323_v34 = vsel %vm1308_vm4, %v1280_v36, %v494_v32 }
 0x13a   :  { %603 = vrot.lane.b32.xlu1 %v2158_v7, %s2046_s22  ;;  %741 = vrot.lane.b32.xlu0 %v2158_v7, %s2047_s23 }
 0x13b   :  { %1547 = vmatprep.subr.mxu0 %v1496_v27 }
 0x13c   :  { %1548 = vmatpush1.msra.mxu0 %v1453_v56  ;;  %v620_v30 = vpop.permute.xlu1 %619  ;;  %v774_v57 = vpop.permute.xlu0 %773 }
 0x13d   :  { %v1366_v31 = vsel %vm1351_vm5, %v1323_v34, %v620_v30 }
 0x13e   :  { %743 = vrot.lane.b32.xlu1 %v2284_v21, %s2047_s23  ;;  %475 = vrot.lane.b32.xlu0 %v2139_v4, %s2045_s13 }
 0x140   :  { %v776_v25 = vpop.permute.xlu1 %775  ;;  %v492_v23 = vpop.permute.xlu0 %491 }
 0x141   :  { %v900_v61 = vsel %vm885_vm3, %v774_v57, %v776_v25 }
 0x142   :  { %982 = vrot.lane.b32.xlu1 %v2284_v21, %s2048_s24  ;;  %1108 = vrot.lane.b32.xlu0 %v2284_v21, %s2049_s25  ;;  %v1409_v29 = vsel %vm1394_vm7, %v1366_v31, %v900_v61 }
 0x144   :  { %v999_v58 = vpop.permute.xlu1 %998  ;;  %v1125_v27 = vpop.permute.xlu0 %1124 }
 0x145   :  { %v1495_v59 = vsel %vm1480_vm6, %v999_v58, %v1125_v27  ;;  %v1452_v26 = vsel %vm1437_vm8, %v1409_v29, %v999_v58  ;;  %v1235_v27 = vsel %vm1222_vm1, %v2200_v13, %v2464_v55 }
 0x146   :  { %347 = vrot.lane.b32.xlu1 %v2144_v5, %s2044_s9  ;;  %601 = vrot.lane.b32.xlu0 %v2139_v4, %s2046_s22 }
 0x147   :  { %1549 = vmatprep.subr.mxu0 %v1495_v59 }
 0x148   :  { %1550 = vmatpush1.msra.mxu0 %v1452_v26  ;;  %v364_v32 = vpop.permute.xlu1 %363  ;;  %v618_v21 = vpop.permute.xlu0 %617 }
 0x149   :  { %v1278_v59 = vsel %vm1265_vm2, %v1235_v27, %v364_v32 }
 0x14a   :  { %737 = vrot.lane.b32.xlu1 %v2139_v4, %s2047_s23  ;;  %739 = vrot.lane.b32.xlu0 %v2265_v18, %s2047_s23  ;;  %v1279_v4 = vsel %vm1265_vm2, %v1236_v24, %v366_v22 }
 0x14b   :  { %v1322_v36 = vsel %vm1308_vm4, %v1279_v4, %v492_v23 }
 0x14c   :  { %v770_v20 = vpop.permute.xlu1 %769  ;;  %v772_v56 = vpop.permute.xlu0 %771  ;;  %v1365_v31 = vsel %vm1351_vm5, %v1322_v36, %v618_v21 }
 0x14d   :  { %v899_v25 = vsel %vm885_vm3, %v770_v20, %v772_v56 }
 0x14e   :  { %473 = vrot.lane.b32.xlu1 %v2144_v5, %s2045_s13  ;;  %980 = vrot.lane.b32.xlu0 %v2265_v18, %s2048_s24  ;;  %v1408_v12 = vsel %vm1394_vm7, %v1365_v31, %v899_v25 }
 0x150   :  { %v490_v30 = vpop.permute.xlu1 %489  ;;  %v997_v57 = vpop.permute.xlu0 %996 }
 0x151   :  { %v1321_v21 = vsel %vm1308_vm4, %v1278_v59, %v490_v30 }
 0x152   :  { %1106 = vrot.lane.b32.xlu1 %v2265_v18, %s2049_s25  ;;  %345 = vrot.lane.b32.xlu0 %v2125_v2, %s2044_s9  ;;  %v1451_v18 = vsel %vm1437_vm8, %v1408_v12, %v997_v57 }
 0x154   :  { %v1123_v61 = vpop.permute.xlu1 %1122  ;;  %v362_v34 = vpop.permute.xlu0 %361 }
 0x155   :  { %v1494_v58 = vsel %vm1480_vm6, %v997_v57, %v1123_v61  ;;  %v1234_v61 = vsel %vm1222_vm1, %v2181_v10, %v2454_v52 }
 0x156   :  { %599 = vrot.lane.b32.xlu1 %v2144_v5, %s2046_s22  ;;  %733 = vrot.lane.b32.xlu0 %v2144_v5, %s2047_s23  ;;  %v1277_v31 = vsel %vm1265_vm2, %v1234_v61, %v362_v34 }
 0x157   :  { %1551 = vmatprep.subr.mxu0 %v1494_v58 }
 0x158   :  { %1552 = vmatpush1.msra.mxu0 %v1451_v18  ;;  %v616_v22 = vpop.permute.xlu1 %615  ;;  %v766_v23 = vpop.permute.xlu0 %765 }
 0x159   :  { %v1364_v20 = vsel %vm1351_vm5, %v1321_v21, %v616_v22 }
 0x15a   :  { %735 = vrot.lane.b32.xlu1 %v2270_v19, %s2047_s23  ;;  %471 = vrot.lane.b32.xlu0 %v2125_v2, %s2045_s13 }
 0x15c   :  { %v768_v29 = vpop.permute.xlu1 %767  ;;  %v488_v5 = vpop.permute.xlu0 %487 }
 0x15d   :  { %v898_v26 = vsel %vm885_vm3, %v766_v23, %v768_v29  ;;  %v1320_v12 = vsel %vm1308_vm4, %v1277_v31, %v488_v5  ;;  %v1233_v29 = vsel %vm1222_vm1, %v2186_v11, %v2456_v53 }
 0x15e   :  { %978 = vrot.lane.b32.xlu1 %v2270_v19, %s2048_s24  ;;  %1104 = vrot.lane.b32.xlu0 %v2270_v19, %s2049_s25  ;;  %v1407_v13 = vsel %vm1394_vm7, %v1364_v20, %v898_v26 }
 0x160   :  { %v995_v56 = vpop.permute.xlu1 %994  ;;  %v1121_v57 = vpop.permute.xlu0 %1120 }
 0x161   :  { %v1493_v24 = vsel %vm1480_vm6, %v995_v56, %v1121_v57  ;;  %v1450_v32 = vsel %vm1437_vm8, %v1407_v13, %v995_v56 }
 0x162   :  { %597 = vrot.lane.b32.xlu1 %v2125_v2, %s2046_s22  ;;  %729 = vrot.lane.b32.xlu0 %v2125_v2, %s2047_s23 }
 0x163   :  { %1553 = vmatprep.subr.mxu0 %v1493_v24 }
 0x164   :  { %1554 = vmatpush1.msra.mxu0 %v1450_v32  ;;  %v360_v30 = vpop.permute.xlu1 %359  ;;  %v614_v19 = vpop.permute.xlu0 %613 }
 0x165   :  { %v1363_v22 = vsel %vm1351_vm5, %v1320_v12, %v614_v19  ;;  %v1276_v26 = vsel %vm1265_vm2, %v1233_v29, %v360_v30  ;;  %v244_v29 = vsel %vm240_vm9, %v2422_v44, %v2529_v62 }
 0x166   :  { %731 = vrot.lane.b32.xlu1 %v2251_v16, %s2047_s23  ;;  %469 = vrot.lane.b32.xlu0 %v2111_v0, %s2045_s13 }
 0x168   :  { %v762_v4 = vpop.permute.xlu1 %761  ;;  %v764_v25 = vpop.permute.xlu0 %763 }
 0x169   :  { %v897_v58 = vsel %vm885_vm3, %v762_v4, %v764_v25 }
 0x16a   :  { %976 = vrot.lane.b32.xlu1 %v2251_v16, %s2048_s24  ;;  %1102 = vrot.lane.b32.xlu0 %v2251_v16, %s2049_s25 }
 0x16c   :  { %v486_v36 = vpop.permute.xlu1 %485  ;;  %v993_v2 = vpop.permute.xlu0 %992 }
 0x16d   :  { %v1319_v20 = vsel %vm1308_vm4, %v1276_v26, %v486_v36  ;;  %v1232_v36 = vsel %vm1222_vm1, %v2167_v8, %v2446_v50 }
 0x16e   :  { %595 = vrot.lane.b32.xlu1 %v2111_v0, %s2046_s22  ;;  %725 = vrot.lane.b32.xlu0 %v2111_v0, %s2047_s23  ;;  %v1406_v0 = vsel %vm1394_vm7, %v1363_v22, %v897_v58 }
 0x16f   :  { %v1449_v10 = vsel %vm1437_vm8, %v1406_v0, %v993_v2 }
 0x170   :  { %v1119_v18 = vpop.permute.xlu1 %1118  ;;  %v358_v16 = vpop.permute.xlu0 %357 }
 0x171   :  { %v1492_v23 = vsel %vm1480_vm6, %v993_v2, %v1119_v18 }
 0x172   :  { %727 = vrot.lane.b32.xlu1 %v2256_v17, %s2047_s23  ;;  %467 = vrot.lane.b32.xlu0 %v2130_v3, %s2045_s13 }
 0x173   :  { %1555 = vmatprep.subr.mxu0 %v1492_v23  ;;  %v1231_v23 = vsel %vm1222_vm1, %v2172_v9, %v2448_v51 }
 0x174   :  { %1556 = vmatpush1.msra.mxu0 %v1449_v10  ;;  %v612_v34 = vpop.permute.xlu1 %611  ;;  %v758_v27 = vpop.permute.xlu0 %757 }
 0x176   :  { %974 = vrot.lane.b32.xlu1 %v2256_v17, %s2048_s24  ;;  %1100 = vrot.lane.b32.xlu0 %v2256_v17, %s2049_s25  ;;  %v1362_v17 = vsel %vm1351_vm5, %v1319_v20, %v612_v34 }
 0x178   :  { %v760_v5 = vpop.permute.xlu1 %759  ;;  %v484_v59 = vpop.permute.xlu0 %483 }
 0x179   :  { %v896_v21 = vsel %vm885_vm3, %v758_v27, %v760_v5 }
 0x17a   :  { %593 = vrot.lane.b32.xlu1 %v2130_v3, %s2046_s22  ;;  %721 = vrot.lane.b32.xlu0 %v2130_v3, %s2047_s23  ;;  %v1405_v11 = vsel %vm1394_vm7, %v1362_v17, %v896_v21 }
 0x17c   :  { %v991_v56 = vpop.permute.xlu1 %990  ;;  %v1117_v57 = vpop.permute.xlu0 %1116 }
 0x17d   :  { %v1491_v13 = vsel %vm1480_vm6, %v991_v56, %v1117_v57  ;;  %v1448_v24 = vsel %vm1437_vm8, %v1405_v11, %v991_v56 }
 0x17e   :  { %723 = vrot.lane.b32.xlu1 %v2237_v14, %s2047_s23  ;;  %465 = vrot.lane.b32.xlu0 %v2116_v1, %s2045_s13 }
 0x17f   :  { %1557 = vmatprep.subr.mxu0 %v1491_v13 }
 0x180   :  { %1558 = vmatpush1.msra.mxu0 %v1448_v24  ;;  %v356_v32 = vpop.permute.xlu1 %355  ;;  %v610_v3 = vpop.permute.xlu0 %609 }
 0x181   :  { %v1274_v34 = vsel %vm1265_vm2, %v1231_v23, %v356_v32  ;;  %v243_v32 = vsel %vm240_vm9, %v2424_v45, %v2531_v35 }
 0x182   :  { %972 = vrot.lane.b32.xlu1 %v2237_v14, %s2048_s24  ;;  %1098 = vrot.lane.b32.xlu0 %v2237_v14, %s2049_s25  ;;  %v1275_v14 = vsel %vm1265_vm2, %v1232_v36, %v358_v16 }
 0x183   :  { %v1318_v61 = vsel %vm1308_vm4, %v1275_v14, %v484_v59 }
 0x184   :  { %v754_v30 = vpop.permute.xlu1 %753  ;;  %v756_v19 = vpop.permute.xlu0 %755  ;;  %v1361_v12 = vsel %vm1351_vm5, %v1318_v61, %v610_v3  ;;  %v1230_v3 = vsel %vm1222_vm1, %v2153_v6, %v2438_v48 }
 0x185   :  { %v895_v2 = vsel %vm885_vm3, %v754_v30, %v756_v19 }
 0x186   :  { %401 = vrot.lane.b32.xlu1 %v2422_v44, %s2044_s9  ;;  %591 = vrot.lane.b32.xlu0 %v2116_v1, %s2046_s22 }
 0x188   :  { %v482_v4 = vpop.permute.xlu1 %481  ;;  %v989_v25 = vpop.permute.xlu0 %988 }
 0x18a   :  { %717 = vrot.lane.b32.xlu1 %v2116_v1, %s2047_s23  ;;  %719 = vrot.lane.b32.xlu0 %v2242_v15, %s2047_s23  ;;  %v1404_v1 = vsel %vm1394_vm7, %v1361_v12, %v895_v2 }
 0x18b   :  { %v1447_v8 = vsel %vm1437_vm8, %v1404_v1, %v989_v25 }
 0x18c   :  { %v1115_v31 = vpop.permute.xlu1 %1114  ;;  %v354_v58 = vpop.permute.xlu0 %353 }
 0x18d   :  { %v1490_v18 = vsel %vm1480_vm6, %v989_v25, %v1115_v31 }
 0x18e   :  { %527 = vrot.lane.b32.xlu1 %v2422_v44, %s2045_s13  ;;  %970 = vrot.lane.b32.xlu0 %v2242_v15, %s2048_s24 }
 0x18f   :  { %1559 = vmatprep.subr.mxu0 %v1490_v18 }
 0x190   :  { %1560 = vmatpush1.msra.mxu0 %v1447_v8  ;;  %v608_v16 = vpop.permute.xlu1 %607  ;;  %v750_v22 = vpop.permute.xlu0 %749 }
 0x192   :  { %1096 = vrot.lane.b32.xlu1 %v2242_v15, %s2049_s25  ;;  %399 = vrot.lane.b32.xlu0 %v2424_v45, %s2044_s9  ;;  %v1317_v15 = vsel %vm1308_vm4, %v1274_v34, %v482_v4 }
 0x193   :  { %v1360_v9 = vsel %vm1351_vm5, %v1317_v15, %v608_v16  ;;  %v242_v16 = vsel %vm240_vm9, %v2414_v42, %v2520_v28 }
 0x194   :  { %v752_v0 = vpop.permute.xlu1 %751  ;;  %v480_v10 = vpop.permute.xlu0 %479 }
 0x195   :  { %v894_v27 = vsel %vm885_vm3, %v750_v22, %v752_v0 }
 0x196   :  { %653 = vrot.lane.b32.xlu1 %v2422_v44, %s2046_s22  ;;  %841 = vrot.lane.b32.xlu0 %v244_v29, %s2047_s23  ;;  %v1403_v26 = vsel %vm1394_vm7, %v1360_v9, %v894_v27 }
 0x198   :  { %v987_v5 = vpop.permute.xlu1 %986  ;;  %v1113_v59 = vpop.permute.xlu0 %1112 }
 0x199   :  { %v1489_v21 = vsel %vm1480_vm6, %v987_v5, %v1113_v59  ;;  %v1446_v20 = vsel %vm1437_vm8, %v1403_v26, %v987_v5  ;;  %v241_v26 = vsel %vm240_vm9, %v2416_v43, %v2522_v63 }
 0x19a   :  { %843 = vrot.lane.b32.xlu1 %v2529_v62, %s2047_s23  ;;  %525 = vrot.lane.b32.xlu0 %v2424_v45, %s2045_s13 }
 0x19b   :  { %1561 = vmatprep.subr.mxu0 %v1489_v21  ;;  %v2014_v21 = vld [vmem:[%s3787_s6 + $0x50] sm:$0xff] }
 0x19c   :  { %1562 = vmatpush1.msra.mxu0 %v1446_v20  ;;  %v352_v17 = vpop.permute.xlu1 %351  ;;  %v606_v56 = vpop.permute.xlu0 %605 }
 0x19e   :  { %1032 = vrot.lane.b32.xlu1 %v2529_v62, %s2048_s24  ;;  %1158 = vrot.lane.b32.xlu0 %v2529_v62, %s2049_s25  ;;  %v1273_v62 = vsel %vm1265_vm2, %v1230_v3, %v354_v58  ;;  %v1229_v58 = vsel %vm1222_vm1, %v2158_v7, %v2440_v49 }
 0x19f   :  { %v1316_v19 = vsel %vm1308_vm4, %v1273_v62, %v480_v10  ;;  %v1272_v1 = vsel %vm1265_vm2, %v1229_v58, %v352_v17 }
 0x1a0   :  { %v746_v57 = vpop.permute.xlu1 %745  ;;  %v748_v11 = vpop.permute.xlu0 %747  ;;  %v1359_v36 = vsel %vm1351_vm5, %v1316_v19, %v606_v56  ;;  %v2015_v19 = vld [vmem:[%s3787_s6 + $0x40] sm:$0xff] }
 0x1a1   :  { %v893_v30 = vsel %vm885_vm3, %v746_v57, %v748_v11 }
 0x1a2   :  { %397 = vrot.lane.b32.xlu1 %v2414_v42, %s2044_s9  ;;  %651 = vrot.lane.b32.xlu0 %v2424_v45, %s2046_s22  ;;  %v1402_v6 = vsel %vm1394_vm7, %v1359_v36, %v893_v30 }
 0x1a4   :  { %v478_v13 = vpop.permute.xlu1 %477  ;;  %v985_v24 = vpop.permute.xlu0 %984 }
 0x1a5   :  { %v1445_v2 = vsel %vm1437_vm8, %v1402_v6, %v985_v24  ;;  %v1315_v22 = vsel %vm1308_vm4, %v1272_v1, %v478_v13 }
 0x1a6   :  { %837 = vrot.lane.b32.xlu1 %v243_v32, %s2047_s23  ;;  %839 = vrot.lane.b32.xlu0 %v2531_v35, %s2047_s23 }
 0x1a8   :  { %v1111_v4 = vpop.permute.xlu1 %1110  ;;  %v350_v25 = vpop.permute.xlu0 %349 }
 0x1a9   :  { %v1488_v14 = vsel %vm1480_vm6, %v985_v24, %v1111_v4  ;;  %v1227_v4 = vsel %vm1222_vm1, %v2015_v19, %v2432_v47 }
 0x1aa   :  { %523 = vrot.lane.b32.xlu1 %v2414_v42, %s2045_s13  ;;  %1030 = vrot.lane.b32.xlu0 %v2531_v35, %s2048_s24 }
 0x1ab   :  { %1563 = vmatprep.subr.mxu0 %v1488_v14 }
 0x1ac   :  { %1564 = vmatpush1.msra.mxu0 %v1445_v2  ;;  %v604_v61 = vpop.permute.xlu1 %603  ;;  %v742_v31 = vpop.permute.xlu0 %741 }
 0x1ae   :  { %1156 = vrot.lane.b32.xlu1 %v2531_v35, %s2049_s25  ;;  %395 = vrot.lane.b32.xlu0 %v2416_v43, %s2044_s9  ;;  %v1358_v35 = vsel %vm1351_vm5, %v1315_v22, %v604_v61  ;;  %v2016_v22 = vld [vmem:[%s3787_s6 + $0x30] sm:$0xff] }
 0x1b0   :  { %v744_v12 = vpop.permute.xlu1 %743  ;;  %v476_v18 = vpop.permute.xlu0 %475 }
 0x1b1   :  { %v892_v8 = vsel %vm885_vm3, %v742_v31, %v744_v12 }
 0x1b2   :  { %649 = vrot.lane.b32.xlu1 %v2414_v42, %s2046_s22  ;;  %833 = vrot.lane.b32.xlu0 %v242_v16, %s2047_s23  ;;  %v1401_v0 = vsel %vm1394_vm7, %v1358_v35, %v892_v8  ;;  %v1226_v35 = vsel %vm1222_vm1, %v2016_v22, %v2422_v44 }
 0x1b4   :  { %v983_v7 = vpop.permute.xlu1 %982  ;;  %v1109_v23 = vpop.permute.xlu0 %1108 }
 0x1b5   :  { %v1487_v10 = vsel %vm1480_vm6, %v983_v7, %v1109_v23  ;;  %v1444_v34 = vsel %vm1437_vm8, %v1401_v0, %v983_v7 }
 0x1b6   :  { %835 = vrot.lane.b32.xlu1 %v2520_v28, %s2047_s23  ;;  %521 = vrot.lane.b32.xlu0 %v2416_v43, %s2045_s13 }
 0x1b7   :  { %1565 = vmatprep.subr.mxu0 %v1487_v10 }
 0x1b8   :  { %1566 = vmatpush1.msra.mxu0 %v1444_v34  ;;  %v348_v27 = vpop.permute.xlu1 %347  ;;  %v602_v29 = vpop.permute.xlu0 %601 }
 0x1b9   :  { %v1270_v14 = vsel %vm1265_vm2, %v1227_v4, %v348_v27  ;;  %v3882_v4 = vld [vmem:[#allocation21_spill] sm:$0xff] }
 0x1ba   :  { %1028 = vrot.lane.b32.xlu1 %v2520_v28, %s2048_s24  ;;  %1154 = vrot.lane.b32.xlu0 %v2520_v28, %s2049_s25  ;;  %v1228_v28 = vsel %vm1222_vm1, %v2014_v21, %v2430_v46 }
 0x1bb   :  { %v1271_v20 = vsel %vm1265_vm2, %v1228_v28, %v350_v25  ;;  %v2017_v28 = vld [vmem:[%s3787_s6 + $0x20] sm:$0xff] }
 0x1bc   :  { %v738_v15 = vpop.permute.xlu1 %737  ;;  %v740_v9 = vpop.permute.xlu0 %739  ;;  %v1314_v56 = vsel %vm1308_vm4, %v1271_v20, %v476_v18  ;;  %v1225_v20 = vsel %vm1222_vm1, %v2017_v28, %v2424_v45 }
 0x1bd   :  { %v891_v17 = vsel %vm885_vm3, %v738_v15, %v740_v9  ;;  %v1357_v13 = vsel %vm1351_vm5, %v1314_v56, %v602_v29  ;;  %v210_v9 = vsel %vm197_vm0, %v2408_v41, %v2515_v33 }
 0x1be   :  { %393 = vrot.lane.b32.xlu1 %v2406_v40, %s2044_s9  ;;  %647 = vrot.lane.b32.xlu0 %v2416_v43, %s2046_s22  ;;  %v1400_v32 = vsel %vm1394_vm7, %v1357_v13, %v891_v17 }
 0x1c0   :  { %v474_v5 = vpop.permute.xlu1 %473  ;;  %v981_v59 = vpop.permute.xlu0 %980 }
 0x1c1   :  { %v1443_v3 = vsel %vm1437_vm8, %v1400_v32, %v981_v59  ;;  %v1313_v2 = vsel %vm1308_vm4, %v1270_v14, %v474_v5 }
 0x1c2   :  { %829 = vrot.lane.b32.xlu1 %v241_v26, %s2047_s23  ;;  %831 = vrot.lane.b32.xlu0 %v2522_v63, %s2047_s23 }
 0x1c4   :  { %v1107_v57 = vpop.permute.xlu1 %1106  ;;  %v346_v11 = vpop.permute.xlu0 %345 }
 0x1c5   :  { %v1486_v24 = vsel %vm1480_vm6, %v981_v59, %v1107_v57  ;;  %v1269_v0 = vsel %vm1265_vm2, %v1226_v35, %v346_v11  ;;  %v1268_v57 = vsel %vm1265_vm2, %v1225_v20, %v2698_v37 }
 0x1c6   :  { %519 = vrot.lane.b32.xlu1 %v2406_v40, %s2045_s13  ;;  %1026 = vrot.lane.b32.xlu0 %v2522_v63, %s2048_s24 }
 0x1c7   :  { %1567 = vmatprep.subr.mxu0 %v1486_v24 }
 0x1c8   :  { %1568 = vmatpush1.msra.mxu0 %v1443_v3  ;;  %v600_v62 = vpop.permute.xlu1 %599  ;;  %v734_v30 = vpop.permute.xlu0 %733 }
 0x1c9   :  { %v1356_v61 = vsel %vm1351_vm5, %v1313_v2, %v600_v62  ;;  %v3883_v2 = vld [vmem:[#allocation60_spill] sm:$0xff] }
 0x1ca   :  { %1152 = vrot.lane.b32.xlu1 %v2522_v63, %s2049_s25  ;;  %391 = vrot.lane.b32.xlu0 %v2408_v41, %s2044_s9  ;;  %v211_v63 = vsel %vm197_vm0, %v2406_v40, %v2513_v60 }
 0x1cc   :  { %v736_v25 = vpop.permute.xlu1 %735  ;;  %v472_v36 = vpop.permute.xlu0 %471 }
 0x1cd   :  { %v890_v6 = vsel %vm885_vm3, %v734_v30, %v736_v25  ;;  %v1312_v34 = vsel %vm1308_vm4, %v1269_v0, %v472_v36  ;;  %v209_v25 = vsel %vm197_vm0, %v2398_v38, %v3882_v4  ;;  %v2018_v36 = vld [vmem:[%s3787_s6 + $0x10] sm:$0xff] }
 0x1ce   :  { %645 = vrot.lane.b32.xlu1 %v2406_v40, %s2046_s22  ;;  %825 = vrot.lane.b32.xlu0 %v211_v63, %s2047_s23  ;;  %v1399_v12 = vsel %vm1394_vm7, %v1356_v61, %v890_v6  ;;  %v1224_v14 = vsel %vm1222_vm1, %v2018_v36, %v2414_v42 }
 0x1cf   :  { %v1267_v61 = vsel %vm1265_vm2, %v1224_v14, %v3883_v2 }
 0x1d0   :  { %v979_v31 = vpop.permute.xlu1 %978  ;;  %v1105_v58 = vpop.permute.xlu0 %1104 }
 0x1d1   :  { %v1485_v18 = vsel %vm1480_vm6, %v979_v31, %v1105_v58  ;;  %v1442_v1 = vsel %vm1437_vm8, %v1399_v12, %v979_v31 }
 0x1d2   :  { %827 = vrot.lane.b32.xlu1 %v2513_v60, %s2047_s23  ;;  %517 = vrot.lane.b32.xlu0 %v2408_v41, %s2045_s13 }
 0x1d3   :  { %1569 = vmatprep.subr.mxu0 %v1485_v18 }
 0x1d4   :  { %1570 = vmatpush1.msra.mxu0 %v1442_v1  ;;  %v598_v8 = vpop.permute.xlu1 %597  ;;  %v730_v16 = vpop.permute.xlu0 %729 }
 0x1d6   :  { %1024 = vrot.lane.b32.xlu1 %v2513_v60, %s2048_s24  ;;  %1150 = vrot.lane.b32.xlu0 %v2513_v60, %s2049_s25  ;;  %v1355_v60 = vsel %vm1351_vm5, %v1312_v34, %v598_v8 }
 0x1d8   :  { %v732_v7 = vpop.permute.xlu1 %731  ;;  %v470_v23 = vpop.permute.xlu0 %469 }
 0x1d9   :  { %v889_v10 = vsel %vm885_vm3, %v730_v16, %v732_v7  ;;  %v1311_v13 = vsel %vm1308_vm4, %v1268_v57, %v470_v23  ;;  %v3884_v23 = vld [vmem:[#allocation11_spill] sm:$0xff] }
 0x1da   :  { %389 = vrot.lane.b32.xlu1 %v2398_v38, %s2044_s9  ;;  %643 = vrot.lane.b32.xlu0 %v2408_v41, %s2046_s22  ;;  %v1398_v15 = vsel %vm1394_vm7, %v1355_v60, %v889_v10 }
 0x1dc   :  { %v977_v27 = vpop.permute.xlu1 %976  ;;  %v1103_v29 = vpop.permute.xlu0 %1102 }
 0x1dd   :  { %v1484_v5 = vsel %vm1480_vm6, %v977_v27, %v1103_v29  ;;  %v1441_v59 = vsel %vm1437_vm8, %v1398_v15, %v977_v27  ;;  %v3885_v27 = vld [vmem:[#allocation22_spill] sm:$0xff]  ;;  %v2019_v15 = vld [vmem:[%s3787_s6] sm:$0xff]  ;;  %s2053_s6 = smov 112  }
 0x1de   :  { %821 = vrot.lane.b32.xlu1 %v210_v9, %s2047_s23  ;;  %823 = vrot.lane.b32.xlu0 %v2515_v33, %s2047_s23  ;;  %v208_v29 = vsel %vm197_vm0, %v2400_v39, %v3885_v27  ;;  %v1223_v9 = vsel %vm1222_vm1, %v2019_v15, %v2416_v43  ;;  %v3892_v15 = vld [vmem:[#allocation31_spill] sm:$0xff] }
 0x1df   :  { %1571 = vmatprep.subr.mxu0 %v1484_v5  ;;  %v3886_v5 = vld [vmem:[#allocation59_spill] sm:$0xff] }
 0x1e0   :  { %1572 = vmatpush1.msra.mxu0 %v1441_v59  ;;  %v596_v26 = vpop.permute.xlu1 %595  ;;  %v726_v21 = vpop.permute.xlu0 %725  ;;  %v1266_v59 = vsel %vm1265_vm2, %v1223_v9, %v3886_v5  ;;  %v253_v9 = vsel %vm240_vm9, %v2464_v55, %v3892_v15 }
 0x1e1   :  { %v1354_v24 = vsel %vm1351_vm5, %v1311_v13, %v596_v26 }
 0x1e2   :  { %515 = vrot.lane.b32.xlu1 %v2398_v38, %s2045_s13  ;;  %1022 = vrot.lane.b32.xlu0 %v2515_v33, %s2048_s24 }
 0x1e4   :  { %v728_v17 = vpop.permute.xlu1 %727  ;;  %v468_v56 = vpop.permute.xlu0 %467 }
 0x1e5   :  { %v888_v11 = vsel %vm885_vm3, %v726_v21, %v728_v17  ;;  %v1310_v58 = vsel %vm1308_vm4, %v1267_v61, %v468_v56  ;;  %v3887_v56 = vld [vmem:[#allocation32_spill] sm:$0xff] }
 0x1e6   :  { %1148 = vrot.lane.b32.xlu1 %v2515_v33, %s2049_s25  ;;  %387 = vrot.lane.b32.xlu0 %v2400_v39, %s2044_s9  ;;  %v1397_v62 = vsel %vm1394_vm7, %v1354_v24, %v888_v11  ;;  %v254_v57 = vsel %vm240_vm9, %v2462_v54, %v3887_v56 }
 0x1e8   :  { %v975_v32 = vpop.permute.xlu1 %974  ;;  %v1101_v3 = vpop.permute.xlu0 %1100 }
 0x1e9   :  { %v1483_v30 = vsel %vm1480_vm6, %v975_v32, %v1101_v3  ;;  %v1440_v37 = vsel %vm1437_vm8, %v1397_v62, %v975_v32  ;;  %v3888_v62 = vld [vmem:[#allocation48_spill] sm:$0xff] }
 0x1ea   :  { %421 = vrot.lane.b32.xlu1 %v2462_v54, %s2044_s9  ;;  %641 = vrot.lane.b32.xlu0 %v2398_v38, %s2046_s22 }
 0x1eb   :  { %1573 = vmatprep.subr.mxu0 %v1483_v30  ;;  %v1254_v30 = vsel %vm1222_vm1, %v2422_v44, %v3888_v62 }
 0x1ec   :  { %1574 = vmatpush1.msra.mxu0 %v1440_v37  ;;  %v594_v33 = vpop.permute.xlu1 %593  ;;  %v722_v19 = vpop.permute.xlu0 %721 }
 0x1ed   :  { %v1353_v12 = vsel %vm1351_vm5, %v1310_v58, %v594_v33  ;;  %v3889_v58 = vld [vmem:[#allocation12_spill] sm:$0xff] }
 0x1ee   :  { %817 = vrot.lane.b32.xlu1 %v209_v25, %s2047_s23  ;;  %819 = vrot.lane.b32.xlu0 %v3882_v4, %s2047_s23 }
 0x1f0   :  { %v724_v6 = vpop.permute.xlu1 %723  ;;  %v466_v63 = vpop.permute.xlu0 %465 }
 0x1f1   :  { %v887_v31 = vsel %vm885_vm3, %v722_v19, %v724_v6  ;;  %v1309_v21 = vsel %vm1308_vm4, %v1266_v59, %v466_v63 }
 0x1f2   :  { %513 = vrot.lane.b32.xlu1 %v2400_v39, %s2045_s13  ;;  %547 = vrot.lane.b32.xlu0 %v2462_v54, %s2045_s13  ;;  %v1396_v8 = vsel %vm1394_vm7, %v1353_v12, %v887_v31 }
 0x1f4   :  { %v973_v18 = vpop.permute.xlu1 %972  ;;  %v1099_v1 = vpop.permute.xlu0 %1098 }
 0x1f5   :  { %v1482_v16 = vsel %vm1480_vm6, %v973_v18, %v1099_v1  ;;  %v1439_v22 = vsel %vm1437_vm8, %v1396_v8, %v973_v18 }
 0x1f6   :  { %1020 = vrot.lane.b32.xlu1 %v3882_v4, %s2048_s24  ;;  %1146 = vrot.lane.b32.xlu0 %v3882_v4, %s2049_s25 }
 0x1f7   :  { %1575 = vmatprep.subr.mxu0 %v1482_v16  ;;  %v3890_v16 = vld [vmem:[#allocation19_spill] sm:$0xff] }
 0x1f8   :  { %1576 = vmatpush1.msra.mxu0 %v1439_v22  ;;  %v402_v35 = vpop.permute.xlu1 %401  ;;  %v592_v7 = vpop.permute.xlu0 %591  ;;  %v207_v22 = vsel %vm197_vm0, %v3884_v23, %v3890_v16 }
 0x1f9   :  { %v1352_v17 = vsel %vm1351_vm5, %v1309_v21, %v592_v7  ;;  %v1297_v19 = vsel %vm1265_vm2, %v1254_v30, %v402_v35  ;;  %v3891_v35 = vld [vmem:[#allocation47_spill] sm:$0xff] }
 0x1fa   :  { %385 = vrot.lane.b32.xlu1 %v3884_v23, %s2044_s9  ;;  %419 = vrot.lane.b32.xlu0 %v2464_v55, %s2044_s9  ;;  %v1253_v7 = vsel %vm1222_vm1, %v2424_v45, %v3891_v35 }
 0x1fc   :  { %v718_v0 = vpop.permute.xlu1 %717  ;;  %v720_v10 = vpop.permute.xlu0 %719 }
 0x1fd   :  { %v886_v26 = vsel %vm885_vm3, %v718_v0, %v720_v10 }
 0x1fe   :  { %639 = vrot.lane.b32.xlu1 %v2400_v39, %s2046_s22  ;;  %673 = vrot.lane.b32.xlu0 %v2462_v54, %s2046_s22  ;;  %v1395_v13 = vsel %vm1394_vm7, %v1352_v17, %v886_v26 }
 0x200   :  { %v528_v34 = vpop.permute.xlu1 %527  ;;  %v971_v60 = vpop.permute.xlu0 %970 }
 0x201   :  { %v1438_v24 = vsel %vm1437_vm8, %v1395_v13, %v971_v60  ;;  %v1340_v25 = vsel %vm1308_vm4, %v1297_v19, %v528_v34  ;;  %v3894_v19 = vld [vmem:[#allocation9_spill] sm:$0xff] }
 0x202   :  { %813 = vrot.lane.b32.xlu1 %v208_v29, %s2047_s23  ;;  %815 = vrot.lane.b32.xlu0 %v3885_v27, %s2047_s23 }
 0x204   :  { %v1097_v28 = vpop.permute.xlu1 %1096  ;;  %v400_v20 = vpop.permute.xlu0 %399 }
 0x205   :  { %v1481_v11 = vsel %vm1480_vm6, %v971_v60, %v1097_v28  ;;  %v1296_v0 = vsel %vm1265_vm2, %v1253_v7, %v400_v20  ;;  %v3893_v28 = vld [vmem:[#allocation46_spill] sm:$0xff] }
 0x206   :  { %881 = vrot.lane.b32.xlu1 %v254_v57, %s2047_s23  ;;  %883 = vrot.lane.b32.xlu0 %v3887_v56, %s2047_s23  ;;  %v1252_v20 = vsel %vm1222_vm1, %v2414_v42, %v3893_v28 }
 0x207   :  { %1577 = vmatprep.subr.mxu0 %v1481_v11 }
 0x208   :  { %1578 = vmatpush1.msra.mxu0 %v1438_v24  ;;  %v654_v32 = vpop.permute.xlu1 %653  ;;  %v842_v3 = vpop.permute.xlu0 %841 }
 0x209   :  { %v1383_v36 = vsel %vm1351_vm5, %v1340_v25, %v654_v32 }
 0x20a   :  { %511 = vrot.lane.b32.xlu1 %v3884_v23, %s2045_s13  ;;  %545 = vrot.lane.b32.xlu0 %v2464_v55, %s2045_s13 }
 0x20c   :  { %v844_v37 = vpop.permute.xlu1 %843  ;;  %v526_v33 = vpop.permute.xlu0 %525 }
 0x20d   :  { %v917_v4 = vsel %vm885_vm3, %v842_v3, %v844_v37  ;;  %v1339_v34 = vsel %vm1308_vm4, %v1296_v0, %v526_v33 }
 0x20e   :  { %1018 = vrot.lane.b32.xlu1 %v3885_v27, %s2048_s24  ;;  %1052 = vrot.lane.b32.xlu0 %v3887_v56, %s2048_s24  ;;  %v1426_v44 = vsel %vm1394_vm7, %v1383_v36, %v917_v4 }
 0x210   :  { %v1033_v14 = vpop.permute.xlu1 %1032  ;;  %v1159_v6 = vpop.permute.xlu0 %1158 }
 0x211   :  { %v1512_v63 = vsel %vm1480_vm6, %v1033_v14, %v1159_v6  ;;  %v1469_v2 = vsel %vm1437_vm8, %v1426_v44, %v1033_v14  ;;  %v3895_v6 = vld [vmem:[#allocation20_spill] sm:$0xff] }
 0x212   :  { %1144 = vrot.lane.b32.xlu1 %v3885_v27, %s2049_s25  ;;  %1178 = vrot.lane.b32.xlu0 %v3887_v56, %s2049_s25  ;;  %v206_v44 = vsel %vm197_vm0, %v3889_v58, %v3895_v6 }
 0x213   :  { %1579 = vmatprep.subr.mxu0 %v1512_v63  ;;  %v3896_v63 = vld [vmem:[#allocation45_spill] sm:$0xff] }
 0x214   :  { %1580 = vmatpush2.msra.mxu0 %v1469_v2  ;;  %v398_v61 = vpop.permute.xlu1 %397  ;;  %v652_v31 = vpop.permute.xlu0 %651  ;;  %v1251_v2 = vsel %vm1222_vm1, %v2416_v43, %v3896_v63 }
 0x215   :  { %v1382_v29 = vsel %vm1351_vm5, %v1339_v34, %v652_v31  ;;  %v1295_v57 = vsel %vm1265_vm2, %v1252_v20, %v398_v61  ;;  %v3898_v34 = vld [vmem:[#allocation44_spill] sm:$0xff] }
 0x216   :  { %383 = vrot.lane.b32.xlu1 %v3889_v58, %s2044_s9  ;;  %417 = vrot.lane.b32.xlu0 %v2454_v52, %s2044_s9 }
 0x218   :  { %v838_v12 = vpop.permute.xlu1 %837  ;;  %v840_v18 = vpop.permute.xlu0 %839 }
 0x219   :  { %v916_v10 = vsel %vm885_vm3, %v838_v12, %v840_v18 }
 0x21a   :  { %637 = vrot.lane.b32.xlu1 %v3884_v23, %s2046_s22  ;;  %671 = vrot.lane.b32.xlu0 %v2464_v55, %s2046_s22  ;;  %v1425_v5 = vsel %vm1394_vm7, %v1382_v29, %v916_v10 }
 0x21c   :  { %v524_v1 = vpop.permute.xlu1 %523  ;;  %v1031_v8 = vpop.permute.xlu0 %1030 }
 0x21d   :  { %v1468_v59 = vsel %vm1437_vm8, %v1425_v5, %v1031_v8  ;;  %v1338_v13 = vsel %vm1308_vm4, %v1295_v57, %v524_v1 }
 0x21e   :  { %809 = vrot.lane.b32.xlu1 %v207_v22, %s2047_s23  ;;  %811 = vrot.lane.b32.xlu0 %v3890_v16, %s2047_s23 }
 0x220   :  { %v1157_v60 = vpop.permute.xlu1 %1156  ;;  %v396_v27 = vpop.permute.xlu0 %395 }
 0x221   :  { %v1511_v45 = vsel %vm1480_vm6, %v1031_v8, %v1157_v60  ;;  %v1294_v61 = vsel %vm1265_vm2, %v1251_v2, %v396_v27  ;;  %v1250_v60 = vsel %vm1222_vm1, %v2406_v40, %v3898_v34 }
 0x222   :  { %877 = vrot.lane.b32.xlu1 %v253_v9, %s2047_s23  ;;  %879 = vrot.lane.b32.xlu0 %v3892_v15, %s2047_s23 }
 0x223   :  { %1581 = vmatprep.subr.mxu0 %v1511_v45 }
 0x224   :  { %1582 = vmatpush2.msra.mxu0 %v1468_v59  ;;  %v650_v26 = vpop.permute.xlu1 %649  ;;  %v834_v21 = vpop.permute.xlu0 %833 }
 0x225   :  { %v1381_v24 = vsel %vm1351_vm5, %v1338_v13, %v650_v26 }
 0x226   :  { %509 = vrot.lane.b32.xlu1 %v3889_v58, %s2045_s13  ;;  %543 = vrot.lane.b32.xlu0 %v2454_v52, %s2045_s13 }
 0x228   :  { %v836_v17 = vpop.permute.xlu1 %835  ;;  %v522_v56 = vpop.permute.xlu0 %521 }
 0x229   :  { %v915_v11 = vsel %vm885_vm3, %v834_v21, %v836_v17  ;;  %v1337_v12 = vsel %vm1308_vm4, %v1294_v61, %v522_v56  ;;  %v3899_v56 = vld [vmem:[#allocation10_spill] sm:$0xff] }
 0x22a   :  { %1016 = vrot.lane.b32.xlu1 %v3890_v16, %s2048_s24  ;;  %1050 = vrot.lane.b32.xlu0 %v3892_v15, %s2048_s24  ;;  %v1424_v42 = vsel %vm1394_vm7, %v1381_v24, %v915_v11 }
 0x22c   :  { %v1029_v32 = vpop.permute.xlu1 %1028  ;;  %v1155_v3 = vpop.permute.xlu0 %1154 }
 0x22d   :  { %v1510_v62 = vsel %vm1480_vm6, %v1029_v32, %v1155_v3  ;;  %v1467_v30 = vsel %vm1437_vm8, %v1424_v42, %v1029_v32  ;;  %v3900_v32 = vld [vmem:[#allocation17_spill] sm:$0xff]  ;;  %v3901_v42 = vld [vmem:[#allocation43_spill] sm:$0xff] }
 0x22e   :  { %1142 = vrot.lane.b32.xlu1 %v3890_v16, %s2049_s25  ;;  %1176 = vrot.lane.b32.xlu0 %v3892_v15, %s2049_s25  ;;  %v3897_v16 = vld [vmem:[#allocation30_spill] sm:$0xff]  ;;  %v205_v3 = vsel %vm197_vm0, %v3894_v19, %v3900_v32 }
 0x22f   :  { %1583 = vmatprep.subr.mxu0 %v1510_v62  ;;  %v252_v22 = vsel %vm240_vm9, %v2454_v52, %v3897_v16  ;;  %v1249_v62 = vsel %vm1222_vm1, %v2408_v41, %v3901_v42  ;;  %v3908_v42 = vld [vmem:[#allocation58_spill] sm:$0xff] }
 0x230   :  { %1584 = vmatpush2.msra.mxu0 %v1467_v30  ;;  %v394_v37 = vpop.permute.xlu1 %393  ;;  %v648_v33 = vpop.permute.xlu0 %647 }
 0x231   :  { %v1380_v8 = vsel %vm1351_vm5, %v1337_v12, %v648_v33  ;;  %v1293_v15 = vsel %vm1265_vm2, %v1250_v60, %v394_v37 }
 0x232   :  { %381 = vrot.lane.b32.xlu1 %v3894_v19, %s2044_s9  ;;  %415 = vrot.lane.b32.xlu0 %v2456_v53, %s2044_s9 }
 0x234   :  { %v830_v4 = vpop.permute.xlu1 %829  ;;  %v832_v25 = vpop.permute.xlu0 %831 }
 0x235   :  { %v914_v31 = vsel %vm885_vm3, %v830_v4, %v832_v25 }
 0x236   :  { %635 = vrot.lane.b32.xlu1 %v3889_v58, %s2046_s22  ;;  %669 = vrot.lane.b32.xlu0 %v2454_v52, %s2046_s22  ;;  %v1423_v35 = vsel %vm1394_vm7, %v1380_v8, %v914_v31 }
 0x238   :  { %v520_v36 = vpop.permute.xlu1 %519  ;;  %v1027_v14 = vpop.permute.xlu0 %1026 }
 0x239   :  { %v1466_v7 = vsel %vm1437_vm8, %v1423_v35, %v1027_v14  ;;  %v1336_v45 = vsel %vm1308_vm4, %v1293_v15, %v520_v36 }
 0x23a   :  { %805 = vrot.lane.b32.xlu1 %v206_v44, %s2047_s23  ;;  %807 = vrot.lane.b32.xlu0 %v3895_v6, %s2047_s23 }
 0x23c   :  { %v1153_v18 = vpop.permute.xlu1 %1152  ;;  %v392_v1 = vpop.permute.xlu0 %391 }
 0x23d   :  { %v1509_v43 = vsel %vm1480_vm6, %v1027_v14, %v1153_v18  ;;  %v1292_v30 = vsel %vm1265_vm2, %v1249_v62, %v392_v1  ;;  %v3902_v14 = vld [vmem:[#allocation29_spill] sm:$0xff]  ;;  %v3903_v18 = vld [vmem:[#allocation42_spill] sm:$0xff]  ;;  %v1264_v62 = vsel %vm1222_vm1, %v2462_v54, %v3908_v42 }
 0x23e   :  { %873 = vrot.lane.b32.xlu1 %v252_v22, %s2047_s23  ;;  %875 = vrot.lane.b32.xlu0 %v3897_v16, %s2047_s23  ;;  %v251_v41 = vsel %vm240_vm9, %v2456_v53, %v3902_v14  ;;  %v1248_v1 = vsel %vm1222_vm1, %v2398_v38, %v3903_v18 }
 0x23f   :  { %1585 = vmatprep.subr.mxu0 %v1509_v43 }
 0x240   :  { %1586 = vmatpush2.msra.mxu0 %v1466_v7  ;;  %v646_v0 = vpop.permute.xlu1 %645  ;;  %v826_v10 = vpop.permute.xlu0 %825 }
 0x241   :  { %v1379_v5 = vsel %vm1351_vm5, %v1336_v45, %v646_v0 }
 0x242   :  { %507 = vrot.lane.b32.xlu1 %v3894_v19, %s2045_s13  ;;  %541 = vrot.lane.b32.xlu0 %v2456_v53, %s2045_s13 }
 0x244   :  { %v828_v27 = vpop.permute.xlu1 %827  ;;  %v518_v29 = vpop.permute.xlu0 %517 }
 0x245   :  { %v913_v9 = vsel %vm885_vm3, %v826_v10, %v828_v27  ;;  %v1335_v33 = vsel %vm1308_vm4, %v1292_v30, %v518_v29  ;;  %v3904_v27 = vld [vmem:[#allocation7_spill] sm:$0xff] }
 0x246   :  { %1014 = vrot.lane.b32.xlu1 %v3895_v6, %s2048_s24  ;;  %1048 = vrot.lane.b32.xlu0 %v3897_v16, %s2048_s24  ;;  %v1422_v40 = vsel %vm1394_vm7, %v1379_v5, %v913_v9  ;;  %v3905_v5 = vld [vmem:[#allocation18_spill] sm:$0xff] }
 0x248   :  { %v1025_v59 = vpop.permute.xlu1 %1024  ;;  %v1151_v26 = vpop.permute.xlu0 %1150 }
 0x249   :  { %v1508_v21 = vsel %vm1480_vm6, %v1025_v59, %v1151_v26  ;;  %v1465_v28 = vsel %vm1437_vm8, %v1422_v40, %v1025_v59  ;;  %v204_v59 = vsel %vm197_vm0, %v3899_v56, %v3905_v5 }
 0x24a   :  { %1140 = vrot.lane.b32.xlu1 %v3895_v6, %s2049_s25  ;;  %1174 = vrot.lane.b32.xlu0 %v3897_v16, %s2049_s25 }
 0x24b   :  { %1587 = vmatprep.subr.mxu0 %v1508_v21  ;;  %v3906_v21 = vld [vmem:[#allocation28_spill] sm:$0xff] }
 0x24c   :  { %1588 = vmatpush2.msra.mxu0 %v1465_v28  ;;  %v390_v20 = vpop.permute.xlu1 %389  ;;  %v644_v17 = vpop.permute.xlu0 %643  ;;  %v250_v28 = vsel %vm240_vm9, %v2446_v50, %v3906_v21 }
 0x24d   :  { %v1378_v36 = vsel %vm1351_vm5, %v1335_v33, %v644_v17  ;;  %v1291_v22 = vsel %vm1265_vm2, %v1248_v1, %v390_v20 }
 0x24e   :  { %379 = vrot.lane.b32.xlu1 %v3899_v56, %s2044_s9  ;;  %413 = vrot.lane.b32.xlu0 %v2446_v50, %s2044_s9 }
 0x250   :  { %v822_v57 = vpop.permute.xlu1 %821  ;;  %v824_v11 = vpop.permute.xlu0 %823 }
 0x251   :  { %v912_v37 = vsel %vm885_vm3, %v822_v57, %v824_v11 }
 0x252   :  { %633 = vrot.lane.b32.xlu1 %v3894_v19, %s2046_s22  ;;  %667 = vrot.lane.b32.xlu0 %v2456_v53, %s2046_s22  ;;  %v1421_v44 = vsel %vm1394_vm7, %v1378_v36, %v912_v37 }
 0x254   :  { %v516_v13 = vpop.permute.xlu1 %515  ;;  %v1023_v24 = vpop.permute.xlu0 %1022 }
 0x255   :  { %v1464_v63 = vsel %vm1437_vm8, %v1421_v44, %v1023_v24  ;;  %v1334_v35 = vsel %vm1308_vm4, %v1291_v22, %v516_v13  ;;  %v3910_v22 = vld [vmem:[#allocation15_spill] sm:$0xff] }
 0x256   :  { %801 = vrot.lane.b32.xlu1 %v205_v3, %s2047_s23  ;;  %803 = vrot.lane.b32.xlu0 %v3900_v32, %s2047_s23 }
 0x258   :  { %v1149_v4 = vpop.permute.xlu1 %1148  ;;  %v3267_v25 = vpop.permute.xlu0 %387 }
 0x259   :  { %v1507_v6 = vsel %vm1480_vm6, %v1023_v24, %v1149_v4 }
 0x25a   :  { %869 = vrot.lane.b32.xlu1 %v251_v41, %s2047_s23  ;;  %871 = vrot.lane.b32.xlu0 %v3902_v14, %s2047_s23 }
 0x25b   :  { %1589 = vmatprep.subr.mxu0 %v1507_v6 }
 0x25c   :  { %1590 = vmatpush2.msra.mxu0 %v1464_v63  ;;  %v422_v2 = vpop.permute.xlu1 %421  ;;  %v642_v61 = vpop.permute.xlu0 %641  ;;  %v3909_v63 = vld [vmem:[#allocation8_spill] sm:$0xff] }
 0x25d   :  { %v1377_v7 = vsel %vm1351_vm5, %v1334_v35, %v642_v61  ;;  %v1307_v37 = vsel %vm1265_vm2, %v1264_v62, %v422_v2  ;;  %v3914_v62 = vld [vmem:[#allocation6_spill] sm:$0xff] }
 0x25e   :  { %505 = vrot.lane.b32.xlu1 %v3899_v56, %s2045_s13  ;;  %539 = vrot.lane.b32.xlu0 %v2446_v50, %s2045_s13 }
 0x260   :  { %v818_v31 = vpop.permute.xlu1 %817  ;;  %v820_v12 = vpop.permute.xlu0 %819 }
 0x261   :  { %v911_v43 = vsel %vm885_vm3, %v818_v31, %v820_v12 }
 0x262   :  { %1012 = vrot.lane.b32.xlu1 %v3900_v32, %s2048_s24  ;;  %1046 = vrot.lane.b32.xlu0 %v3902_v14, %s2048_s24  ;;  %v1420_v38 = vsel %vm1394_vm7, %v1377_v7, %v911_v43  ;;  %v203_v43 = vsel %vm197_vm0, %v3904_v27, %v3910_v22 }
 0x264   :  { %v514_v8 = vpop.permute.xlu1 %513  ;;  %v548_v16 = vpop.permute.xlu0 %547 }
 0x265   :  { %v1350_v36 = vsel %vm1308_vm4, %v1307_v37, %v548_v16 }
 0x266   :  { %1138 = vrot.lane.b32.xlu1 %v3900_v32, %s2049_s25  ;;  %1172 = vrot.lane.b32.xlu0 %v3902_v14, %s2049_s25  ;;  %v3907_v32 = vld [vmem:[#allocation41_spill] sm:$0xff] }
 0x267   :  { %v1247_v3 = vsel %vm1222_vm1, %v2400_v39, %v3907_v32 }
 0x268   :  { %v1021_v0 = vpop.permute.xlu1 %1020  ;;  %v1147_v10 = vpop.permute.xlu0 %1146  ;;  %v1290_v30 = vsel %vm1265_vm2, %v1247_v3, %v3267_v25 }
 0x269   :  { %v1506_v34 = vsel %vm1480_vm6, %v1021_v0, %v1147_v10  ;;  %v1463_v60 = vsel %vm1437_vm8, %v1420_v38, %v1021_v0  ;;  %v1333_v39 = vsel %vm1308_vm4, %v1290_v30, %v514_v8  ;;  %v3911_v0 = vld [vmem:[#allocation27_spill] sm:$0xff] }
 0x26a   :  { %377 = vrot.lane.b32.xlu1 %v3904_v27, %s2044_s9  ;;  %411 = vrot.lane.b32.xlu0 %v2448_v51, %s2044_s9  ;;  %v249_v10 = vsel %vm240_vm9, %v2448_v51, %v3911_v0 }
 0x26b   :  { %1591 = vmatprep.subr.mxu0 %v1506_v34 }
 0x26c   :  { %1592 = vmatpush2.msra.mxu0 %v1463_v60  ;;  %v3305_v29 = vpop.permute.xlu1 %385  ;;  %v3307_v15 = vpop.permute.xlu0 %419 }
 0x26e   :  { %631 = vrot.lane.b32.xlu1 %v3899_v56, %s2046_s22  ;;  %665 = vrot.lane.b32.xlu0 %v2446_v50, %s2046_s22 }
 0x270   :  { %v640_v9 = vpop.permute.xlu1 %639  ;;  %v674_v45 = vpop.permute.xlu0 %673 }
 0x271   :  { %v1376_v41 = vsel %vm1351_vm5, %v1333_v39, %v640_v9  ;;  %v1393_v6 = vsel %vm1351_vm5, %v1350_v36, %v674_v45 }
 0x272   :  { %797 = vrot.lane.b32.xlu1 %v204_v59, %s2047_s23  ;;  %799 = vrot.lane.b32.xlu0 %v3905_v5, %s2047_s23  ;;  %v3912_v59 = vld [vmem:[#allocation40_spill] sm:$0xff] }
 0x274   :  { %v814_v26 = vpop.permute.xlu1 %813  ;;  %v816_v40 = vpop.permute.xlu0 %815 }
 0x275   :  { %v910_v33 = vsel %vm885_vm3, %v814_v26, %v816_v40  ;;  %v1246_v26 = vsel %vm1222_vm1, %v3884_v23, %v3912_v59  ;;  %v3913_v40 = vld [vmem:[#allocation57_spill] sm:$0xff] }
 0x276   :  { %865 = vrot.lane.b32.xlu1 %v250_v28, %s2047_s23  ;;  %867 = vrot.lane.b32.xlu0 %v3906_v21, %s2047_s23  ;;  %v1419_v2 = vsel %vm1394_vm7, %v1376_v41, %v910_v33  ;;  %v1289_v28 = vsel %vm1265_vm2, %v1246_v26, %v3305_v29 }
 0x278   :  { %v882_v20 = vpop.permute.xlu1 %881  ;;  %v884_v17 = vpop.permute.xlu0 %883 }
 0x279   :  { %v927_v4 = vsel %vm885_vm3, %v882_v20, %v884_v17 }
 0x27a   :  { %503 = vrot.lane.b32.xlu1 %v3904_v27, %s2045_s13  ;;  %537 = vrot.lane.b32.xlu0 %v2448_v51, %s2045_s13  ;;  %v1436_v61 = vsel %vm1394_vm7, %v1393_v6, %v927_v4 }
 0x27c   :  { %v3329_v57 = vpop.permute.xlu1 %511  ;;  %v3331_v11 = vpop.permute.xlu0 %545 }
 0x27e   :  { %1010 = vrot.lane.b32.xlu1 %v3905_v5, %s2048_s24  ;;  %1044 = vrot.lane.b32.xlu0 %v3906_v21, %s2048_s24 }
 0x280   :  { %v1019_v13 = vpop.permute.xlu1 %1018  ;;  %v1053_v24 = vpop.permute.xlu0 %1052 }
 0x281   :  { %v1462_v31 = vsel %vm1437_vm8, %v1419_v2, %v1019_v13  ;;  %v1479_v12 = vsel %vm1437_vm8, %v1436_v61, %v1053_v24 }
 0x282   :  { %1136 = vrot.lane.b32.xlu1 %v3905_v5, %s2049_s25  ;;  %1170 = vrot.lane.b32.xlu0 %v3906_v21, %s2049_s25  ;;  %v1263_v21 = vsel %vm1222_vm1, %v2464_v55, %v3913_v40  ;;  %v3919_v40 = vld [vmem:[#allocation5_spill] sm:$0xff] }
 0x283   :  { %v1306_v20 = vsel %vm1265_vm2, %v1263_v21, %v3307_v15 }
 0x284   :  { %v1145_v54 = vpop.permute.xlu1 %1144  ;;  %v1179_v14 = vpop.permute.xlu0 %1178  ;;  %v1349_v55 = vsel %vm1308_vm4, %v1306_v20, %v3331_v11 }
 0x285   :  { %v1505_v44 = vsel %vm1480_vm6, %v1019_v13, %v1145_v54  ;;  %v1522_v25 = vsel %vm1480_vm6, %v1053_v24, %v1179_v14  ;;  %v1332_v13 = vsel %vm1308_vm4, %v1289_v28, %v3329_v57  ;;  %v3915_v54 = vld [vmem:[#allocation16_spill] sm:$0xff] }
 0x286   :  { %375 = vrot.lane.b32.xlu1 %v3909_v63, %s2044_s9  ;;  %409 = vrot.lane.b32.xlu0 %v2438_v48, %s2044_s9  ;;  %v202_v14 = vsel %vm197_vm0, %v3909_v63, %v3915_v54 }
 0x287   :  { %1593 = vmatprep.subr.mxu0 %v1505_v44  ;;  %1636 = vmatprep.subr.mxu1 %v1522_v25  ;;  %v3916_v44 = vld [vmem:[#allocation26_spill] sm:$0xff] }
 0x288   :  { %1594 = vmatpush2.msra.mxu0 %v1462_v31  ;;  %1637 = vmatpush1.msra.mxu1 %v1479_v12  ;;  %v3366_v18 = vpop.permute.xlu1 %383  ;;  %v3368_v1 = vpop.permute.xlu0 %417  ;;  %v248_v25 = vsel %vm240_vm9, %v2438_v48, %v3916_v44 }
 0x28a   :  { %629 = vrot.lane.b32.xlu1 %v3904_v27, %s2046_s22  ;;  %663 = vrot.lane.b32.xlu0 %v2448_v51, %s2046_s22 }
 0x28c   :  { %v638_v8 = vpop.permute.xlu1 %637  ;;  %v672_v16 = vpop.permute.xlu0 %671 }
 0x28d   :  { %v1375_v3 = vsel %vm1351_vm5, %v1332_v13, %v638_v8  ;;  %v1392_v42 = vsel %vm1351_vm5, %v1349_v55, %v672_v16  ;;  %v3920_v55 = vld [vmem:[#allocation13_spill] sm:$0xff] }
 0x28e   :  { %793 = vrot.lane.b32.xlu1 %v203_v43, %s2047_s23  ;;  %795 = vrot.lane.b32.xlu0 %v3910_v22, %s2047_s23 }
 0x290   :  { %v810_v35 = vpop.permute.xlu1 %809  ;;  %v812_v7 = vpop.permute.xlu0 %811 }
 0x291   :  { %v909_v17 = vsel %vm885_vm3, %v810_v35, %v812_v7  ;;  %v3918_v35 = vld [vmem:[#allocation56_spill] sm:$0xff] }
 0x292   :  { %861 = vrot.lane.b32.xlu1 %v249_v10, %s2047_s23  ;;  %863 = vrot.lane.b32.xlu0 %v3911_v0, %s2047_s23  ;;  %v1418_v57 = vsel %vm1394_vm7, %v1375_v3, %v909_v17  ;;  %v1262_v7 = vsel %vm1222_vm1, %v2454_v52, %v3918_v35 }
 0x293   :  { %v1305_v10 = vsel %vm1265_vm2, %v1262_v7, %v3368_v1 }
 0x294   :  { %v878_v38 = vpop.permute.xlu1 %877  ;;  %v880_v34 = vpop.permute.xlu0 %879 }
 0x295   :  { %v926_v23 = vsel %vm885_vm3, %v878_v38, %v880_v34 }
 0x296   :  { %501 = vrot.lane.b32.xlu1 %v3909_v63, %s2045_s13  ;;  %535 = vrot.lane.b32.xlu0 %v2438_v48, %s2045_s13  ;;  %v1435_v11 = vsel %vm1394_vm7, %v1392_v42, %v926_v23  ;;  %v3921_v42 = vld [vmem:[#allocation25_spill] sm:$0xff] }
 0x298   :  { %v3390_v60 = vpop.permute.xlu1 %509  ;;  %v3392_v9 = vpop.permute.xlu0 %543 }
 0x299   :  { %v1348_v52 = vsel %vm1308_vm4, %v1305_v10, %v3392_v9  ;;  %v3924_v10 = vld [vmem:[#allocation14_spill] sm:$0xff] }
 0x29a   :  { %1008 = vrot.lane.b32.xlu1 %v3910_v22, %s2048_s24  ;;  %1042 = vrot.lane.b32.xlu0 %v3911_v0, %s2048_s24 }
 0x29c   :  { %v1017_v45 = vpop.permute.xlu1 %1016  ;;  %v1051_v5 = vpop.permute.xlu0 %1050 }
 0x29d   :  { %v1461_v30 = vsel %vm1437_vm8, %v1418_v57, %v1017_v45  ;;  %v1478_v37 = vsel %vm1437_vm8, %v1435_v11, %v1051_v5 }
 0x29e   :  { %1134 = vrot.lane.b32.xlu1 %v3910_v22, %s2049_s25  ;;  %1168 = vrot.lane.b32.xlu0 %v3911_v0, %s2049_s25  ;;  %v3917_v22 = vld [vmem:[#allocation39_spill] sm:$0xff] }
 0x29f   :  { %v1245_v43 = vsel %vm1222_vm1, %v3889_v58, %v3917_v22 }
 0x2a0   :  { %v1143_v24 = vpop.permute.xlu1 %1142  ;;  %v1177_v32 = vpop.permute.xlu0 %1176  ;;  %v1288_v0 = vsel %vm1265_vm2, %v1245_v43, %v3366_v18 }
 0x2a1   :  { %v1504_v29 = vsel %vm1480_vm6, %v1017_v45, %v1143_v24  ;;  %v1521_v15 = vsel %vm1480_vm6, %v1051_v5, %v1177_v32  ;;  %v1331_v34 = vsel %vm1308_vm4, %v1288_v0, %v3390_v60  ;;  %v201_v24 = vsel %vm197_vm0, %v3914_v62, %v3920_v55 }
 0x2a2   :  { %373 = vrot.lane.b32.xlu1 %v3914_v62, %s2044_s9  ;;  %407 = vrot.lane.b32.xlu0 %v2440_v49, %s2044_s9 }
 0x2a3   :  { %1595 = vmatprep.subr.mxu0 %v1504_v29  ;;  %1638 = vmatprep.subr.mxu1 %v1521_v15  ;;  %v247_v29 = vsel %vm240_vm9, %v2440_v49, %v3921_v42 }
 0x2a4   :  { %1596 = vmatpush2.msra.mxu0 %v1461_v30  ;;  %1639 = vmatpush1.msra.mxu1 %v1478_v37  ;;  %v3430_v33 = vpop.permute.xlu1 %381  ;;  %v3432_v4 = vpop.permute.xlu0 %415 }
 0x2a6   :  { %627 = vrot.lane.b32.xlu1 %v3909_v63, %s2046_s22  ;;  %661 = vrot.lane.b32.xlu0 %v2438_v48, %s2046_s22 }
 0x2a8   :  { %v636_v39 = vpop.permute.xlu1 %635  ;;  %v670_v36 = vpop.permute.xlu0 %669 }
 0x2a9   :  { %v1374_v59 = vsel %vm1351_vm5, %v1331_v34, %v636_v39  ;;  %v1391_v26 = vsel %vm1351_vm5, %v1348_v52, %v670_v36  ;;  %v3922_v36 = vld [vmem:[#allocation38_spill] sm:$0xff]  ;;  %v3925_v52 = vld [vmem:[#allocation23_spill] sm:$0xff] }
 0x2aa   :  { %789 = vrot.lane.b32.xlu1 %v202_v14, %s2047_s23  ;;  %791 = vrot.lane.b32.xlu0 %v3915_v54, %s2047_s23  ;;  %v3923_v14 = vld [vmem:[#allocation55_spill] sm:$0xff] }
 0x2ac   :  { %v806_v41 = vpop.permute.xlu1 %805  ;;  %v808_v6 = vpop.permute.xlu0 %807 }
 0x2ad   :  { %v908_v38 = vsel %vm885_vm3, %v806_v41, %v808_v6  ;;  %v1261_v41 = vsel %vm1222_vm1, %v2456_v53, %v3923_v14 }
 0x2ae   :  { %857 = vrot.lane.b32.xlu1 %v248_v25, %s2047_s23  ;;  %859 = vrot.lane.b32.xlu0 %v3916_v44, %s2047_s23  ;;  %v1417_v60 = vsel %vm1394_vm7, %v1374_v59, %v908_v38  ;;  %v200_v38 = vsel %vm197_vm0, %v3919_v40, %v3924_v10  ;;  %vm1944_vm0 = vcmask 31744  }
 0x2b0   :  { %v874_v2 = vpop.permute.xlu1 %873  ;;  %v876_v61 = vpop.permute.xlu0 %875 }
 0x2b1   :  { %v925_v58 = vsel %vm885_vm3, %v874_v2, %v876_v61 }
 0x2b2   :  { %499 = vrot.lane.b32.xlu1 %v3914_v62, %s2045_s13  ;;  %533 = vrot.lane.b32.xlu0 %v2440_v49, %s2045_s13  ;;  %v1434_v9 = vsel %vm1394_vm7, %v1391_v26, %v925_v58 }
 0x2b4   :  { %v3454_v31 = vpop.permute.xlu1 %507  ;;  %v3456_v12 = vpop.permute.xlu0 %541 }
 0x2b6   :  { %1006 = vrot.lane.b32.xlu1 %v3915_v54, %s2048_s24  ;;  %1040 = vrot.lane.b32.xlu0 %v3916_v44, %s2048_s24 }
 0x2b8   :  { %v1015_v8 = vpop.permute.xlu1 %1014  ;;  %v1049_v16 = vpop.permute.xlu0 %1048 }
 0x2b9   :  { %v1460_v21 = vsel %vm1437_vm8, %v1417_v60, %v1015_v8  ;;  %v1477_v28 = vsel %vm1437_vm8, %v1434_v9, %v1049_v16 }
 0x2ba   :  { %1132 = vrot.lane.b32.xlu1 %v3915_v54, %s2049_s25  ;;  %1166 = vrot.lane.b32.xlu0 %v3916_v44, %s2049_s25  ;;  %v1244_v54 = vsel %vm1222_vm1, %v3894_v19, %v3922_v36  ;;  %v1304_v44 = vsel %vm1265_vm2, %v1261_v41, %v3432_v4  ;;  %v2051_v41 = vmov 0  }
 0x2bb   :  { %v1287_v6 = vsel %vm1265_vm2, %v1244_v54, %v3430_v33  ;;  %v1347_v53 = vsel %vm1308_vm4, %v1304_v44, %v3456_v12  ;;  %2001 = vset.pattern.permute.xlu1 %v2051_v41  ;;  %2000 = vset.pattern.permute.xlu0 %v2051_v41 }
 0x2bc   :  { %v1141_v45 = vpop.permute.xlu1 %1140  ;;  %v1175_v5 = vpop.permute.xlu0 %1174  ;;  %v1330_v2 = vsel %vm1308_vm4, %v1287_v6, %v3454_v31 }
 0x2bd   :  { %v1503_v18 = vsel %vm1480_vm6, %v1015_v8, %v1141_v45  ;;  %v1520_v1 = vsel %vm1480_vm6, %v1049_v16, %v1175_v5  ;;  %v246_v45 = vsel %vm240_vm9, %v2430_v46, %v3925_v52 }
 0x2be   :  { %371 = vrot.lane.b32.xlu1 %v3919_v40, %s2044_s9  ;;  %405 = vrot.lane.b32.xlu0 %v2430_v46, %s2044_s9 }
 0x2bf   :  { %1597 = vmatprep.subr.mxu0 %v1503_v18  ;;  %1640 = vmatprep.subr.mxu1 %v1520_v1  ;;  %v1524_v1 = vld [vmem:[%s3781_s0 + $0x8] sm:$0xff] }
 0x2c0   :  { %1598 = vmatpush2.msra.mxu0 %v1460_v21  ;;  %1641 = vmatpush1.msra.mxu1 %v1477_v28  ;;  %v3494_v20 = vpop.permute.xlu1 %379  ;;  %v3496_v17 = vpop.permute.xlu0 %413 }
 0x2c1   :  { %1611 = vmatprep.mubr.f32.mxu0 %v1524_v1 }
 0x2c2   :  { %625 = vrot.lane.b32.xlu1 %v3914_v62, %s2046_s22  ;;  %659 = vrot.lane.b32.xlu0 %v2440_v49, %s2046_s22 }
 0x2c4   :  { %v634_v23 = vpop.permute.xlu1 %633  ;;  %v668_v13 = vpop.permute.xlu0 %667 }
 0x2c5   :  { %v1373_v16 = vsel %vm1351_vm5, %v1330_v2, %v634_v23  ;;  %v1390_v22 = vsel %vm1351_vm5, %v1347_v53, %v668_v13  ;;  %v2050_v23 = vmov 0.0   ;;  %v3926_v13 = vld [vmem:[#allocation37_spill] sm:$0xff]  ;;  %v1529_v53 = vld [vmem:[%s3782_s1] sm:$0xff] }
 0x2c6   :  { %785 = vrot.lane.b32.xlu1 %v201_v24, %s2047_s23  ;;  %787 = vrot.lane.b32.xlu0 %v3920_v55, %s2047_s23  ;;  %v3927_v24 = vld [vmem:[#allocation24_spill] sm:$0xff] }
 0x2c7   :  { %1688 = vmatprep.mubr.f32.mxu1 %v2050_v23 }
 0x2c8   :  { %v802_v32 = vpop.permute.xlu1 %801  ;;  %v804_v3 = vpop.permute.xlu0 %803 }
 0x2c9   :  { %v907_v25 = vsel %vm885_vm3, %v802_v32, %v804_v3  ;;  %v245_v32 = vsel %vm240_vm9, %v2432_v47, %v3927_v24  ;;  %v3928_v3 = vld [vmem:[#allocation54_spill] sm:$0xff] }
 0x2ca   :  { %853 = vrot.lane.b32.xlu1 %v247_v29, %s2047_s23  ;;  %855 = vrot.lane.b32.xlu0 %v3921_v42, %s2047_s23  ;;  %v1416_v31 = vsel %vm1394_vm7, %v1373_v16, %v907_v25  ;;  %v1530_v25 = vld [vmem:[%s3782_s1 + $0x8] sm:$0xff] }
 0x2cc   :  { %v870_v15 = vpop.permute.xlu1 %869  ;;  %v872_v57 = vpop.permute.xlu0 %871 }
 0x2cd   :  { %v924_v19 = vsel %vm885_vm3, %v870_v15, %v872_v57 }
 0x2ce   :  { %497 = vrot.lane.b32.xlu1 %v3919_v40, %s2045_s13  ;;  %531 = vrot.lane.b32.xlu0 %v2430_v46, %s2045_s13  ;;  %v1433_v12 = vsel %vm1394_vm7, %v1390_v22, %v924_v19  ;;  %v1718_v22 = vld [vmem:[%s3784_s3] sm:$0xff] }
 0x2d0   :  { %v3518_v11 = vpop.permute.xlu1 %505  ;;  %v3520_v30 = vpop.permute.xlu0 %539 }
 0x2d2   :  { %1004 = vrot.lane.b32.xlu1 %v3920_v55, %s2048_s24  ;;  %1038 = vrot.lane.b32.xlu0 %v3921_v42, %s2048_s24 }
 0x2d4   :  { %v1013_v37 = vpop.permute.xlu1 %1012  ;;  %v1047_v39 = vpop.permute.xlu0 %1046 }
 0x2d5   :  { %v1459_v43 = vsel %vm1437_vm8, %v1416_v31, %v1013_v37  ;;  %v1476_v35 = vsel %vm1437_vm8, %v1433_v12, %v1047_v39 }
 0x2d6   :  { %1130 = vrot.lane.b32.xlu1 %v3920_v55, %s2049_s25  ;;  %1164 = vrot.lane.b32.xlu0 %v3921_v42, %s2049_s25  ;;  %v1243_v55 = vsel %vm1222_vm1, %v3899_v56, %v3926_v13  ;;  %v1260_v42 = vsel %vm1222_vm1, %v2446_v50, %v3928_v3 }
 0x2d7   :  { %v1286_v29 = vsel %vm1265_vm2, %v1243_v55, %v3494_v20  ;;  %v1303_v15 = vsel %vm1265_vm2, %v1260_v42, %v3496_v17 }
 0x2d8   :  { %v1139_v61 = vpop.permute.xlu1 %1138  ;;  %v1173_v8 = vpop.permute.xlu0 %1172  ;;  %v1329_v56 = vsel %vm1308_vm4, %v1286_v29, %v3518_v11  ;;  %v1346_v50 = vsel %vm1308_vm4, %v1303_v15, %v3520_v30 }
 0x2d9   :  { %v1502_v33 = vsel %vm1480_vm6, %v1013_v37, %v1139_v61  ;;  %v1519_v4 = vsel %vm1480_vm6, %v1047_v39, %v1173_v8  ;;  %v1800_v61 = vld [vmem:[%s3786_s5] sm:$0xff] }
 0x2da   :  { %403 = vrot.lane.b32.xlu1 %v2432_v47, %s2044_s9  ;;  %623 = vrot.lane.b32.xlu0 %v3919_v40, %s2046_s22 }
 0x2db   :  { %1599 = vmatprep.subr.mxu0 %v1502_v33  ;;  %1642 = vmatprep.subr.mxu1 %v1519_v4 }
 0x2dc   :  { %1600 = vmatpush2.msra.mxu0 %v1459_v43  ;;  %1643 = vmatpush1.msra.mxu1 %v1476_v35  ;;  %v3558_v7 = vpop.permute.xlu1 %377  ;;  %v3560_v0 = vpop.permute.xlu0 %411 }
 0x2de   :  { %657 = vrot.lane.b32.xlu1 %v2430_v46, %s2046_s22  ;;  %781 = vrot.lane.b32.xlu0 %v200_v38, %s2047_s23 }
 0x2e0   :  { %v632_v58 = vpop.permute.xlu1 %631  ;;  %v666_v34 = vpop.permute.xlu0 %665 }
 0x2e1   :  { %v1372_v20 = vsel %vm1351_vm5, %v1329_v56, %v632_v58  ;;  %v1389_v54 = vsel %vm1351_vm5, %v1346_v50, %v666_v34  ;;  %v3929_v58 = vld [vmem:[#allocation36_spill] sm:$0xff] }
 0x2e2   :  { %783 = vrot.lane.b32.xlu1 %v3924_v10, %s2047_s23  ;;  %849 = vrot.lane.b32.xlu0 %v246_v45, %s2047_s23  ;;  %v1242_v34 = vsel %vm1222_vm1, %v3904_v27, %v3929_v58 }
 0x2e4   :  { %v798_v5 = vpop.permute.xlu1 %797  ;;  %v800_v59 = vpop.permute.xlu0 %799 }
 0x2e5   :  { %v906_v57 = vsel %vm885_vm3, %v798_v5, %v800_v59  ;;  %v1285_v5 = vsel %vm1265_vm2, %v1242_v34, %v3558_v7 }
 0x2e6   :  { %851 = vrot.lane.b32.xlu1 %v3925_v52, %s2047_s23  ;;  %529 = vrot.lane.b32.xlu0 %v2432_v47, %s2045_s13  ;;  %v1415_v11 = vsel %vm1394_vm7, %v1372_v20, %v906_v57  ;;  %s2061_s13 = smov 16  }
 0x2e8   :  { %v866_v26 = vpop.permute.xlu1 %865  ;;  %v868_v18 = vpop.permute.xlu0 %867 }
 0x2e9   :  { %v923_v37 = vsel %vm885_vm3, %v866_v26, %v868_v18 }
 0x2ea   :  { %1002 = vrot.lane.b32.xlu1 %v3924_v10, %s2048_s24  ;;  %1036 = vrot.lane.b32.xlu0 %v3925_v52, %s2048_s24  ;;  %v1432_v30 = vsel %vm1394_vm7, %v1389_v54, %v923_v37  ;;  %v3931_v54 = vld [vmem:[#allocation35_spill] sm:$0xff] }
 0x2ec   :  { %v3585_v60 = vpop.permute.xlu1 %503  ;;  %v3587_v9 = vpop.permute.xlu0 %537 }
 0x2ed   :  { %v1328_v1 = vsel %vm1308_vm4, %v1285_v5, %v3585_v60 }
 0x2ee   :  { %1128 = vrot.lane.b32.xlu1 %v3924_v10, %s2049_s25  ;;  %1162 = vrot.lane.b32.xlu0 %v3925_v52, %s2049_s25  ;;  %v3930_v52 = vld [vmem:[#allocation53_spill] sm:$0xff] }
 0x2ef   :  { %v1259_v45 = vsel %vm1222_vm1, %v2448_v51, %v3930_v52 }
 0x2f0   :  { %v1011_v21 = vpop.permute.xlu1 %1010  ;;  %v1045_v28 = vpop.permute.xlu0 %1044  ;;  %v1302_v59 = vsel %vm1265_vm2, %v1259_v45, %v3560_v0 }
 0x2f1   :  { %v1458_v6 = vsel %vm1437_vm8, %v1415_v11, %v1011_v21  ;;  %v1475_v44 = vsel %vm1437_vm8, %v1432_v30, %v1045_v28  ;;  %v1345_v27 = vsel %vm1308_vm4, %v1302_v59, %v3587_v9 }
 0x2f2   :  { %655 = vrot.lane.b32.xlu1 %v2432_v47, %s2046_s22  ;;  %845 = vrot.lane.b32.xlu0 %v245_v32, %s2047_s23 }
 0x2f4   :  { %v1137_v39 = vpop.permute.xlu1 %1136  ;;  %v1171_v36 = vpop.permute.xlu0 %1170 }
 0x2f5   :  { %v1501_v14 = vsel %vm1480_vm6, %v1011_v21, %v1137_v39  ;;  %v1518_v17 = vsel %vm1480_vm6, %v1045_v28, %v1171_v36 }
 0x2f6   :  { %847 = vrot.lane.b32.xlu1 %v3927_v24, %s2047_s23  ;;  %1034 = vrot.lane.b32.xlu0 %v3927_v24, %s2048_s24 }
 0x2f7   :  { %1601 = vmatprep.subr.mxu0 %v1501_v14  ;;  %1644 = vmatprep.subr.mxu1 %v1518_v17  ;;  %v1241_v14 = vsel %vm1222_vm1, %v3909_v63, %v3931_v54  ;;  %v3932_v17 = vld [vmem:[#allocation52_spill] sm:$0xff] }
 0x2f8   :  { %1602 = vmatpush2.msra.mxu0 %v1458_v6  ;;  %1645 = vmatpush1.msra.mxu1 %v1475_v44  ;;  %v376_v19 = vpop.permute.xlu1 %375  ;;  %v410_v2 = vpop.permute.xlu0 %409  ;;  %v1258_v41 = vsel %vm1222_vm1, %v2438_v48, %v3932_v17  ;;  %v3935_v17 = vld [vmem:[#allocation33_spill] sm:$0xff] }
 0x2f9   :  { %v1284_v11 = vsel %vm1265_vm2, %v1241_v14, %v376_v19  ;;  %v1301_v30 = vsel %vm1265_vm2, %v1258_v41, %v410_v2  ;;  %v1239_v41 = vsel %vm1222_vm1, %v3919_v40, %v3935_v17 }
 0x2fa   :  { %1160 = vrot.lane.b32.xlu1 %v3927_v24, %s2049_s25  ;;  %1538 = vperm.xlu0 %2000, %v1530_v25  }
 0x2fc   :  { %v630_v8 = vpop.permute.xlu1 %629  ;;  %v664_v16 = vpop.permute.xlu0 %663 }
 0x2fd   :  { %v1371_v21 = vsel %vm1351_vm5, %v1328_v1, %v630_v8  ;;  %v1388_v51 = vsel %vm1351_vm5, %v1345_v27, %v664_v16  ;;  %v3934_v1 = vld [vmem:[#allocation51_spill] sm:$0xff] }
 0x2fe   :  { %1533 = vperm.xlu1 %2001, %v1529_v53   ;;  %1803 = vperm.xlu0 %2000, %v1800_v61   ;;  %v1257_v27 = vsel %vm1222_vm1, %v2440_v49, %v3934_v1 }
 0x300   :  { %v794_v33 = vpop.permute.xlu1 %793  ;;  %v796_v4 = vpop.permute.xlu0 %795 }
 0x301   :  { %v905_v26 = vsel %vm885_vm3, %v794_v33, %v796_v4 }
 0x302   :  { %1721 = vperm.xlu1 %2001, %v1718_v22   ;;  %v1414_v55 = vsel %vm1394_vm7, %v1371_v21, %v905_v26  ;;  %v3933_v26 = vld [vmem:[#allocation34_spill] sm:$0xff] }
 0x304   :  { %v862_v31 = vpop.permute.xlu1 %861  ;;  %v864_v12 = vpop.permute.xlu0 %863 }
 0x305   :  { %v922_v18 = vsel %vm885_vm3, %v862_v31, %v864_v12 }
 0x306   :  { %v1431_v24 = vsel %vm1394_vm7, %v1388_v51, %v922_v18  ;;  %v1240_v18 = vsel %vm1222_vm1, %v3914_v62, %v3933_v26 }
 0x308   :  { %v502_v43 = vpop.permute.xlu1 %501  ;;  %v536_v35 = vpop.permute.xlu0 %535 }
 0x309   :  { %v1327_v25 = vsel %vm1308_vm4, %v1284_v11, %v502_v43  ;;  %v1344_v53 = vsel %vm1308_vm4, %v1301_v30, %v536_v35  ;;  %v3936_v11 = vld [vmem:[#allocation50_spill] sm:$0xff] }
 0x30a   :  { %v1256_v30 = vsel %vm1222_vm1, %v2430_v46, %v3936_v11 }
 0x30c   :  { %v1009_v10 = vpop.permute.xlu1 %1008  ;;  %v1043_v38 = vpop.permute.xlu0 %1042 }
 0x30d   :  { %v1457_v60 = vsel %vm1437_vm8, %v1414_v55, %v1009_v10  ;;  %v1474_v9 = vsel %vm1437_vm8, %v1431_v24, %v1043_v38 }
 0x310   :  { %v1135_v28 = vpop.permute.xlu1 %1134  ;;  %v1169_v13 = vpop.permute.xlu0 %1168 }
 0x311   :  { %v1500_v7 = vsel %vm1480_vm6, %v1009_v10, %v1135_v28  ;;  %v1517_v0 = vsel %vm1480_vm6, %v1043_v38, %v1169_v13 }
 0x312   :  { %1603 = vmatprep.subr.mxu0 %v1500_v7  ;;  %1646 = vmatprep.subr.mxu1 %v1517_v0 }
 0x313   :  { %1604 = vmatpush2.msra.mxu0 %v1457_v60  ;;  %1647 = vmatpush1.msra.mxu1 %v1474_v9 }
 0x314   :  { %v374_v32 = vpop.permute.xlu1 %373  ;;  %v408_v3 = vpop.permute.xlu0 %407 }
 0x315   :  { %v1283_v21 = vsel %vm1265_vm2, %v1240_v18, %v374_v32  ;;  %v1300_v51 = vsel %vm1265_vm2, %v1257_v27, %v408_v3 }
 0x318   :  { %v628_v42 = vpop.permute.xlu1 %627  ;;  %v662_v29 = vpop.permute.xlu0 %661 }
 0x319   :  { %v1370_v61 = vsel %vm1351_vm5, %v1327_v25, %v628_v42  ;;  %v1387_v63 = vsel %vm1351_vm5, %v1344_v53, %v662_v29 }
 0x31c   :  { %v790_v15 = vpop.permute.xlu1 %789  ;;  %v792_v56 = vpop.permute.xlu0 %791 }
 0x31d   :  { %v904_v6 = vsel %vm885_vm3, %v790_v15, %v792_v56 }
 0x31e   :  { %v1413_v2 = vsel %vm1394_vm7, %v1370_v61, %v904_v6 }
 0x320   :  { %v858_v57 = vpop.permute.xlu1 %857  ;;  %v860_v37 = vpop.permute.xlu0 %859 }
 0x321   :  { %v921_v44 = vsel %vm885_vm3, %v858_v57, %v860_v37 }
 0x322   :  { %v1430_v22 = vsel %vm1394_vm7, %v1387_v63, %v921_v44 }
 0x324   :  { %v500_v50 = vpop.permute.xlu1 %499  ;;  %v534_v20 = vpop.permute.xlu0 %533 }
 0x325   :  { %v1326_v7 = vsel %vm1308_vm4, %v1283_v21, %v500_v50  ;;  %v1343_v0 = vsel %vm1308_vm4, %v1300_v51, %v534_v20  ;;  %v1528_v51 = vld [vmem:[%s3781_s0 + $0x28] sm:$0xff] }
 0x328   :  { %v1007_v39 = vpop.permute.xlu1 %1006  ;;  %v1041_v36 = vpop.permute.xlu0 %1040 }
 0x329   :  { %v1456_v33 = vsel %vm1437_vm8, %v1413_v2, %v1007_v39  ;;  %v1473_v4 = vsel %vm1437_vm8, %v1430_v22, %v1041_v36 }
 0x32c   :  { %v1133_v8 = vpop.permute.xlu1 %1132  ;;  %v1167_v16 = vpop.permute.xlu0 %1166 }
 0x32d   :  { %v1499_v48 = vsel %vm1480_vm6, %v1007_v39, %v1133_v8  ;;  %v1516_v19 = vsel %vm1480_vm6, %v1041_v36, %v1167_v16 }
 0x32e   :  { %1605 = vmatprep.subr.mxu0 %v1499_v48  ;;  %1648 = vmatprep.subr.mxu1 %v1516_v19 }
 0x32f   :  { %1606 = vmatpush2.msra.mxu0 %v1456_v33  ;;  %1649 = vmatpush1.msra.mxu1 %v1473_v4  ;;  %v1523_v33 = vld [vmem:[%s3781_s0] sm:$0xff] }
 0x330   :  { %v372_v31 = vpop.permute.xlu1 %371  ;;  %v406_v12 = vpop.permute.xlu0 %405 }
 0x331   :  { %v1282_v6 = vsel %vm1265_vm2, %v1239_v41, %v372_v31  ;;  %v1299_v44 = vsel %vm1265_vm2, %v1256_v30, %v406_v12  ;;  %v1527_v12 = vld [vmem:[%s3781_s0 + $0x20] sm:$0xff] }
 0x334   :  { %v626_v43 = vpop.permute.xlu1 %625  ;;  %v660_v35 = vpop.permute.xlu0 %659 }
 0x335   :  { %v1369_v55 = vsel %vm1351_vm5, %v1326_v7, %v626_v43  ;;  %v1386_v62 = vsel %vm1351_vm5, %v1343_v0, %v660_v35  ;;  %v1526_v35 = vld [vmem:[%s3781_s0 + $0x18] sm:$0xff] }
 0x338   :  { %v786_v10 = vpop.permute.xlu1 %785  ;;  %v788_v38 = vpop.permute.xlu0 %787 }
 0x339   :  { %v903_v28 = vsel %vm885_vm3, %v786_v10, %v788_v38  ;;  %v3937_v38 = vld [vmem:[#allocation49_spill] sm:$0xff] }
 0x33a   :  { %v1412_v32 = vsel %vm1394_vm7, %v1369_v55, %v903_v28 }
 0x33c   :  { %v854_v58 = vpop.permute.xlu1 %853  ;;  %v856_v34 = vpop.permute.xlu0 %855 }
 0x33d   :  { %v920_v13 = vsel %vm885_vm3, %v854_v58, %v856_v34  ;;  %v1255_v58 = vsel %vm1222_vm1, %v2432_v47, %v3937_v38  ;;  %v1525_v47 = vld [vmem:[%s3781_s0 + $0x10] sm:$0xff] }
 0x33e   :  { %v1429_v3 = vsel %vm1394_vm7, %v1386_v62, %v920_v13 }
 0x340   :  { %v498_v52 = vpop.permute.xlu1 %497  ;;  %v532_v45 = vpop.permute.xlu0 %531 }
 0x341   :  { %v1325_v61 = vsel %vm1308_vm4, %v1282_v6, %v498_v52  ;;  %v1342_v63 = vsel %vm1308_vm4, %v1299_v44, %v532_v45 }
 0x344   :  { %v1005_v5 = vpop.permute.xlu1 %1004  ;;  %v1039_v59 = vpop.permute.xlu0 %1038 }
 0x345   :  { %v1455_v42 = vsel %vm1437_vm8, %v1412_v32, %v1005_v5  ;;  %v1472_v29 = vsel %vm1437_vm8, %v1429_v3, %v1039_v59 }
 0x348   :  { %v1131_v24 = vpop.permute.xlu1 %1130  ;;  %v1165_v60 = vpop.permute.xlu0 %1164 }
 0x349   :  { %v1498_v49 = vsel %vm1480_vm6, %v1005_v5, %v1131_v24  ;;  %v1515_v9 = vsel %vm1480_vm6, %v1039_v59, %v1165_v60 }
 0x34a   :  { %1607 = vmatprep.subr.mxu0 %v1498_v49  ;;  %1650 = vmatprep.subr.mxu1 %v1515_v9 }
 0x34b   :  { %1608 = vmatpush2.msra.mxu0 %v1455_v42  ;;  %1651 = vmatpush1.msra.mxu1 %v1472_v29 }
 0x34c   :  { %v404_v15 = vpop.permute.xlu1 %403  ;;  %v624_v56 = vpop.permute.xlu0 %623 }
 0x34d   :  { %v1368_v8 = vsel %vm1351_vm5, %v1325_v61, %v624_v56  ;;  %v1298_v34 = vsel %vm1265_vm2, %v1255_v58, %v404_v15  ;;  %vm1916_vm2 = vcmask 785408  }
 0x350   :  { %v658_v57 = vpop.permute.xlu1 %657  ;;  %v782_v37 = vpop.permute.xlu0 %781 }
 0x351   :  { %v1385_v40 = vsel %vm1351_vm5, %v1342_v63, %v658_v57 }
 0x354   :  { %v784_v50 = vpop.permute.xlu1 %783  ;;  %v850_v20 = vpop.permute.xlu0 %849 }
 0x355   :  { %v902_v25 = vsel %vm885_vm3, %v782_v37, %v784_v50 }
 0x356   :  { %v1411_v2 = vsel %vm1394_vm7, %v1368_v8, %v902_v25  ;;  %v1717_v25 = vld [vmem:[%s3783_s2] sm:$0xff]  ;;  %s2052_s2 = smov 96  }
 0x358   :  { %v852_v39 = vpop.permute.xlu1 %851  ;;  %v530_v36 = vpop.permute.xlu0 %529 }
 0x359   :  { %v919_v53 = vsel %vm885_vm3, %v850_v20, %v852_v39  ;;  %v1341_v45 = vsel %vm1308_vm4, %v1298_v34, %v530_v36  ;;  %vm1950_vm4 = vcmask 195584  }
 0x35a   :  { %v1428_v22 = vsel %vm1394_vm7, %v1385_v40, %v919_v53  ;;  %v1799_v53 = vld [vmem:[%s3785_s4] sm:$0xff]  ;;  %s2055_s4 = smov 64  }
 0x35c   :  { %v1003_v54 = vpop.permute.xlu1 %1002  ;;  %v1037_v14 = vpop.permute.xlu0 %1036 }
 0x35d   :  { %v1454_v4 = vsel %vm1437_vm8, %v1411_v2, %v1003_v54  ;;  %v1471_v31 = vsel %vm1437_vm8, %v1428_v22, %v1037_v14 }
 0x360   :  { %v1129_v16 = vpop.permute.xlu1 %1128  ;;  %v1163_v48 = vpop.permute.xlu0 %1162 }
 0x361   :  { %v1497_v46 = vsel %vm1480_vm6, %v1003_v54, %v1129_v16  ;;  %v1514_v19 = vsel %vm1480_vm6, %v1037_v14, %v1163_v48 }
 0x362   :  { %1609 = vmatprep.subr.mxu0 %v1497_v46  ;;  %1652 = vmatprep.subr.mxu1 %v1514_v19 }
 0x363   :  { %1610 = vmatpush2.msra.mxu0 %v1454_v4  ;;  %1653 = vmatpush1.msra.mxu1 %v1471_v31 }
 0x364   :  { %v656_v43 = vpop.permute.xlu1 %655  ;;  %1612 = vmatmul.mubr.f32.vlgmr.msra.gmra.mxu0 %v1523_v33  ;;  %v846_v10 = vpop.permute.xlu0 %845 }
 0x365   :  { %1617 = vmatprep.mubr.f32.mxu0 %v1527_v12  ;;  %v1384_v59 = vsel %vm1351_vm5, %v1341_v45, %v656_v43 }
 0x368   :  { %v848_v52 = vpop.permute.xlu1 %847  ;;  %1618 = vmatmul.mubr.f32.gmra.mxu0 %v1526_v35  ;;  %v1035_v18 = vpop.permute.xlu0 %1034 }
 0x369   :  { %v918_v5 = vsel %vm885_vm3, %v846_v10, %v848_v52  ;;  %vm1918_vm3 = vcmask 916480  }
 0x36a   :  { %v1427_v26 = vsel %vm1394_vm7, %v1384_v59, %v918_v5  ;;  %vm1952_vm7 = vcmask 228352  }
 0x36b   :  { %v1470_v21 = vsel %vm1437_vm8, %v1427_v26, %v1035_v18 }
 0x36c   :  { %v1161_v1 = vpop.permute.xlu1 %1160 }
 0x36d   :  { %v1513_v27 = vsel %vm1480_vm6, %v1035_v18, %v1161_v1 }
 0x36e   :  { %1654 = vmatprep.subr.mxu1 %v1513_v27 }
 0x36f   :  { %1655 = vmatpush1.msra.mxu1 %v1470_v21 }
 0x370   :  { %1973 = vmatmul.mubr.msk.f32.vlgmr.msra.gmra.mxu1 %vm1351_vm5, %v1525_v47 }
 0x371   :  { %1694 = vmatprep.mubr.f32.mxu1 %v2050_v23 }
 0x374   :  { %1974 = vmatmul.mubr.msk.f32.gmra.mxu1 %vm1351_vm5, %v1528_v51 }
 0x375   :  { %1792 = vmatprep.mubr.f32.mxu1 %v2050_v23  ;;  %v1539_v55 = vpop.permute.xlu0 %1538 }
 0x379   :  { %v1534_v56 = vpop.permute.xlu1 %1533  ;;  %v1804_v16 = vpop.permute.xlu0 %1803 }
 0x37d   :  { %v1722_v61 = vpop.permute.xlu1 %1721 }
 0x424   :  { %v1613_v28 = vpop.f32.mrf.mxu0 }
 0x425   :  { %v1614_v37 = vadd.f32 %v1613_v28, %v1534_v56 }
 0x426   :  { %v1615_v13 = vpop.f32.mrf.mxu0 }
 0x427   :  { %v1616_v57 = vadd.f32 %v1615_v13, %v1534_v56 }
 0x428   :  { %v1619_v7 = vpop.f32.mrf.mxu0 }
 0x429   :  { %v1620_v62 = vadd.f32 %v1619_v7, %v1539_v55 }
 0x42a   :  { %v1621_v24 = vpop.f32.mrf.mxu0 }
 0x42b   :  { %v1622_v9 = vadd.f32 %v1621_v24, %v1539_v55 }
 0x430   :  { %v1690_v0 = vpop.f32.mrf.mxu1 }
 0x431   :  { %v1691_v54 = vadd.f32 %v1690_v0, %v1614_v37 }
 0x432   :  { %v1692_v60 = vpop.f32.mrf.mxu1 }
 0x433   :  { %v1693_v50 = vadd.f32 %v1692_v60, %v1616_v57 }
 0x434   :  { %v1696_v49 = vpop.f32.mrf.mxu1 }
 0x435   :  { %v1697_v32 = vadd.f32 %v1696_v49, %v1620_v62 }
 0x436   :  { %v1698_v3 = vpop.f32.mrf.mxu1 }
 0x437   :  { %v1975_v42 = vmul.f32 -1.442695, %v1697_v32  ;;  %v1699_v29 = vadd.f32 %v1698_v3, %v1622_v9 }
 0x439   :  { %2002 = vpow2.f32 %v1975_v42  ;;  %v1976_v15 = vmul.f32 -1.442695, %v1699_v29 }
 0x43b   :  { %2004 = vpow2.f32 %v1976_v15 }
 0x43c   :  { %2006 = vtanh.f32 %v1693_v50 }
 0x446   :  { %v2003_v20 = vpop.eup %2002 }
 0x447   :  { %v1709_v39 = vadd.f32 1.0, %v2003_v20 }
 0x448   :  { %v2005_v36 = vpop.eup %2004 }
 0x449   :  { %v1710_v14 = vadd.f32 1.0, %v2005_v36  ;;  %2008 = vrcp.f32 %v1709_v39  ;;  %v2007_v17 = vpop.eup %2006 }
 0x44b   :  { %2010 = vrcp.f32 %v1710_v14 }
 0x44c   :  { %2012 = vtanh.f32 %v1691_v54 }
 0x456   :  { %v2009_v41 = vpop.eup %2008 }
 0x458   :  { %v2011_v11 = vpop.eup %2010 }
 0x459   :  { %v2013_v30 = vpop.eup %2012  ;;  %v1716_v6 = vmul.f32 %v2011_v11, %v2007_v17 }
 0x45a   :  { %v1715_v44 = vmul.f32 %v2013_v30, %v2009_v41 }
 0x45b   :  { %1758 = vmatprep.subr.mxu1 %v1716_v6 }
 0x45c   :  { %1759 = vmatpush1.msra.mxu1 %v1715_v44 }
 0x45d   :  { %1977 = vmatmul.mubr.msk.f32.vlgmr.msra.gmra.mxu1 %vm1724_vm10, %v1717_v25  ;;  %1839 = vmatprep.subr.mxu1 %v1716_v6 }
 0x45e   :  { %1840 = vmatpush1.msra.mxu1 %v1715_v44  ;;  %1873 = vmatprep.mubr.f32.mxu1 %v2050_v23 }
 0x461   :  { %1978 = vmatmul.mubr.msk.f32.vlgmr.msra.gmra.mxu1 %vm1724_vm10, %v1799_v53 }
 0x51d   :  { %v1794_v63 = vpop.f32.mrf.mxu1 }
 0x51e   :  { %v1795_v8 = vadd.f32 %v1794_v63, %v1722_v61 }
 0x51f   :  { %v1796_v40 = vpop.f32.mrf.mxu1 }
 0x520   :  { %1884 = vrot.lane.b32.xlu0 %v1795_v8, %s2046_s22  ;;  %1881 = vrot.lane.b32.xlu1 %v1795_v8, %s2044_s9  ;;  %v1797_v23 = vadd.f32 %v1796_v40, %v1722_v61  ;;  %s2058_s9 = smov 48   ;;  %s2059_s22 = smov 100  }
 0x521   :  { %v1875_v48 = vpop.f32.mrf.mxu1 }
 0x522   :  { %v1876_v46 = vadd.f32 %v1875_v48, %v1804_v16 }
 0x523   :  { %v1877_v19 = vpop.f32.mrf.mxu1 }
 0x524   :  { %1925 = vrot.lane.b32.xlu0 %v1876_v46, %s2052_s2  ;;  %1922 = vrot.lane.b32.xlu1 %v1876_v46, %s2053_s6  ;;  %v1878_v2 = vadd.f32 %v1877_v19, %v1804_v16 }
 0x528   :  { %1928 = vrot.lane.b32.xlu0 %v1876_v46, %s2054_s18  ;;  %1887 = vrot.lane.b32.xlu1 %v1795_v8, %s2048_s24  ;;  %s2062_s24 = smov [#allocation2]  }
 0x529   :  { %s1961_s23 = sshll.u32 %s2062_s24, 4  ;;  %s1962_s23 = int_to_ptr.vmem [resolvable:$true] %s1961_s23 }
 0x52a   :  { %s2020_s26 = scalar_lea.vmem %s1962_s23, 128  ;;  %p2025_p1 = scmp.lt.s32.totalorder %s1962_s23, %s1962_s23 }
 0x52b   :  { %p2021_p0 = scmp.ne.s32.totalorder %s1962_s23, %s2020_s26  ;;  %p2026_p2 = scmp.lt.s32.totalorder %s2020_s26, %s2020_s26 }
 0x52c   :  { %1931 = vrot.lane.b32.xlu0 %v1876_v46, %s2055_s4  ;;  %1890 = vrot.lane.b32.xlu1 %v1795_v8, %s2053_s6 }
 0x52d   :  { %p2027_p3 = por %p2026_p2, %p2025_p1 }
 0x52f   :  { %p2028_p4 = pnand %p2027_p3, %p2021_p0 }
 0x530   :  { %1897 = vrot.lane.b32.xlu0 %v1795_v8, %s2056_s19  ;;  %1893 = vrot.lane.b32.xlu1 %v1795_v8, %s2057_s20 }
 0x534   :  { %1934 = vrot.lane.b32.xlu0 %v1876_v46, %s2058_s9  ;;  %1899 = vrot.lane.b32.xlu1 %v1797_v23, %s2056_s19 }
 0x538   :  { %1904 = vrot.lane.b32.xlu0 %v1797_v23, %s2059_s22  ;;  %1937 = vrot.lane.b32.xlu1 %v1876_v46, %s2060_s21 }
 0x53c   :  { %1941 = vrot.lane.b32.xlu1 %v1878_v2, %s2061_s13 }
 0x592   :  { %v1882_v22 = vpop.permute.xlu1 %1881  ;;  %v1885_v33 = vpop.permute.xlu0 %1884 }
 0x593   :  { %v1908_v34 = vsel %vm1907_vm11, %v1795_v8, %v1882_v22 }
 0x594   :  { %v1910_v52 = vsel %vm1909_vm12, %v1908_v34, %v1885_v33 }
 0x596   :  { %v1923_v4 = vpop.permute.xlu1 %1922  ;;  %v1926_v31 = vpop.permute.xlu0 %1925 }
 0x597   :  { %v1945_v27 = vsel %vm1944_vm0, %v1923_v4, %v1926_v31 }
 0x59a   :  { %v1888_v12 = vpop.permute.xlu1 %1887  ;;  %v1929_v43 = vpop.permute.xlu0 %1928 }
 0x59b   :  { %v1912_v59 = vsel %vm1911_vm13, %v1910_v52, %v1888_v12  ;;  %v1946_v28 = vsel %vm1724_vm10, %v1945_v27, %v1929_v43 }
 0x59e   :  { %v1891_v35 = vpop.permute.xlu1 %1890  ;;  %v1932_v10 = vpop.permute.xlu0 %1931 }
 0x59f   :  { %v1914_v18 = vsel %vm1913_vm15, %v1912_v59, %v1891_v35  ;;  %v1947_v7 = vsel %vm1480_vm6, %v1946_v28, %v1932_v10 }
 0x5a2   :  { %v1894_v38 = vpop.permute.xlu1 %1893  ;;  %v1898_v58 = vpop.permute.xlu0 %1897 }
 0x5a3   :  { %v1915_v1 = vsel %vm1351_vm5, %v1914_v18, %v1894_v38 }
 0x5a6   :  { %v1900_v45 = vpop.permute.xlu1 %1899  ;;  %v1935_v5 = vpop.permute.xlu0 %1934 }
 0x5a7   :  { %v1902_v26 = vsel %vm1901_vm14, %v1898_v58, %v1900_v45  ;;  %v1948_v0 = vsel %vm1907_vm11, %v1947_v7, %v1935_v5 }
 0x5a8   :  { %v1917_v21 = vsel %vm1916_vm2, %v1915_v1, %v1902_v26 }
 0x5aa   :  { %v1938_v47 = vpop.permute.xlu1 %1937  ;;  %v1905_v51 = vpop.permute.xlu0 %1904 }
 0x5ab   :  { %v1919_v13 = vsel %vm1918_vm3, %v1917_v21, %v1905_v51 }
 0x5ac   :  { %1920 = vst [vmem:[#allocation2] sm:$0xff] %v1919_v13 }
 0x5ad   :  { %2031 = shalt.err (!%p2028_p4)
}
 0x5ae   :  { %1964 = dma.vmem_to_hbm [thread:$0]  %s1962_s23, 128, %s3788_s7, [#allocation3]   ;;  %v1949_v55 = vsel %vm1222_vm1, %v1948_v0, %v1938_v47  ;;  %v1942_v62 = vpop.permute.xlu1 %1941 }
 0x5af   :  { %v1951_v24 = vsel %vm1950_vm4, %v1949_v55, %v1942_v62 }
 0x5b0   :  { %v1953_v60 = vsel %vm1952_vm7, %v1951_v24, %v1878_v2 }
 0x5b1   :  { %1954 = vst.msk [vmem:[%s3789_s8] sm:$0xff] %vm1909_vm12, %v1953_v60 }
 0x5b2   :  { %2040 = dma.done.wait [#allocation3], 128  }
 0x5b3   :  { %2041 = vsyncadd [#allocation3], 4294967168 }
 0x5b4   :  { %1972 = vsyncpa [#allocation3], 1 }

</bundles_post_ra>
